<compile_context>
chip_gen: v7x
topology: tpu7x:2x2x1
jax: 0.10.0
libtpu: 0.0.40
codegen_flags: <defaults>
</compile_context>

<pallas_src>
import math

import jax
import jax.numpy as jnp
from jax import lax
from jax.experimental import pallas as pl
from jax.experimental.pallas import tpu as pltpu

# Deterministic "trainable parameter" defaults (the template placeholders).
YOUNGS_MODULUS_LOG = 13.0
POISSONS_RATIO = 0.25
YIELD_STRESS = 1000.0
ALPHA = 0.3
COHESION = 0.01

_LANE = 128
_N_JACOBI_SWEEPS = 4
_LOG_005 = math.log(0.05)


def _svd3x3(F):
    """Batched 3x3 SVD, fully elementwise over the (sublane, lane) batch tile.

    F: 3x3 nested list of (SUB, LANE) float32 arrays.
    Returns (U, s, V): nested 3x3 lists U, V (columns of V are right singular
    vectors, i.e. Vh[j][k] == V[k][j]) and a list of 3 non-negative singular
    values.  Cyclic Jacobi on A = F^T F; then U = F V / s.

    The downstream physics (U diag(g(s)) V^T with elementwise g) is invariant
    to the SVD's ordering / sign / degenerate-subspace gauge freedom, so this
    matches LAPACK-based references for any non-singular F.
    # TODO(synk): for exactly rank-deficient F the U columns belonging to zero
    # singular values are not re-orthogonalized (LAPACK picks an arbitrary
    # orthonormal completion); such inputs already NaN in the water term.
    """
    zero = jnp.zeros_like(F[0][0])
    one = jnp.ones_like(F[0][0])

    # A = F^T F (symmetric PSD), A[i][j] = sum_k F[k][i] F[k][j]
    A = [[F[0][i] * F[0][j] + F[1][i] * F[1][j] + F[2][i] * F[2][j]
          for j in range(3)] for i in range(3)]
    V = [[one if i == j else zero for j in range(3)] for i in range(3)]

    for _ in range(_N_JACOBI_SWEEPS):
        for (p, q) in ((0, 1), (0, 2), (1, 2)):
            r = 3 - p - q
            app, aqq, apq = A[p][p], A[q][q], A[p][q]
            is_small = jnp.abs(apq) < 1e-30
            safe_apq = jnp.where(is_small, one, apq)
            tau = (aqq - app) / (2.0 * safe_apq)
            sgn = jnp.where(tau >= 0.0, 1.0, -1.0)
            t = sgn / (jnp.abs(tau) + jnp.sqrt(tau * tau + 1.0))
            t = jnp.where(is_small, zero, t)
            c = lax.rsqrt(t * t + 1.0)
            s = t * c
            cc, ss, cs = c * c, s * s, c * s
            new_app = cc * app - 2.0 * cs * apq + ss * aqq
            new_aqq = ss * app + 2.0 * cs * apq + cc * aqq
            arp, arq = A[r][p], A[r][q]
            new_arp = c * arp - s * arq
            new_arq = s * arp + c * arq
            A[p][p] = new_app
            A[q][q] = new_aqq
            A[p][q] = zero
            A[q][p] = zero
            A[r][p] = new_arp
            A[p][r] = new_arp
            A[r][q] = new_arq
            A[q][r] = new_arq
            # V <- V * J  (rotate columns p, q)
            for i in range(3):
                vip, viq = V[i][p], V[i][q]
                V[i][p] = c * vip - s * viq
                V[i][q] = s * vip + c * viq

    w = [jnp.maximum(A[j][j], 0.0) for j in range(3)]
    inv_s = [lax.rsqrt(jnp.maximum(wj, 1e-30)) for wj in w]
    sing = [wj * invj for wj, invj in zip(w, inv_s)]          # sqrt(w)
    U = [[(F[i][0] * V[0][j] + F[i][1] * V[1][j] + F[i][2] * V[2][j]) * inv_s[j]
          for j in range(3)] for i in range(3)]
    return U, sing, V


def _physics_kernel(params_ref, f_ref, out_ref):
    # params (SMEM): [yield_stress/(2*mu), (3*la+2*mu)/(2*mu)*alpha, coh, 3*coh]
    ys_over_2mu = params_ref[0]
    sand_coef = params_ref[1]
    coh = params_ref[2]
    coh3 = params_ref[3]

    # f_ref block: (9, SUB, LANE); each component is a dense (SUB, LANE) tile.
    F = [[f_ref[3 * i + j] for j in range(3)] for i in range(3)]

    U, sing, V = _svd3x3(F)

    # ---------------- plasticine ----------------
    s_cl = [jnp.maximum(sj, 0.01) for sj in sing]
    eps = [jnp.log(sj) for sj in s_cl]
    mean_e = (eps[0] + eps[1] + eps[2]) * (1.0 / 3.0)
    ebar = [e - mean_e for e in eps]
    nb = jnp.sqrt(ebar[0] * ebar[0] + ebar[1] * ebar[1] + ebar[2] * ebar[2]) + 1e-5
    dg = nb - ys_over_2mu
    ratio_p = dg / nb
    take_yield = dg > 0.0
    sig_pl = [jnp.where(take_yield, jnp.exp(eps[j] - ratio_p * ebar[j]), s_cl[j])
              for j in range(3)]

    # ---------------- sand ----------------
    # log(max(S, 0.05)) == max(log(max(S, 0.01)), log(0.05)) -> reuse plasticine log.
    eps_s = [jnp.maximum(e, _LOG_005) for e in eps]
    tr_s = eps_s[0] + eps_s[1] + eps_s[2]
    mean_s = tr_s * (1.0 / 3.0)
    ehat = [e - mean_s for e in eps_s]
    sumsq_h = ehat[0] * ehat[0] + ehat[1] * ehat[1] + ehat[2] * ehat[2]
    inv_nh = lax.rsqrt(sumsq_h)          # inf at 0 -> NaN path matches the reference 0-division
    nh = sumsq_h * inv_nh
    st = tr_s - coh3
    dg_s = nh + sand_coef * st
    ratio_s = jnp.maximum(dg_s, 0.0) * inv_nh
    cond_yield = st < 0.0
    sig_sand = [jnp.exp(jnp.where(cond_yield, eps_s[j] - ratio_s * ehat[j], coh))
                for j in range(3)]

    # ---------- reconstructions  U @ diag(sig) @ Vh (Vh[j][k] = V[k][j]) ----------
    def recon(sig):
        US = [[U[i][j] * sig[j] for j in range(3)] for i in range(3)]   # hoisted
        return [[US[i][0] * V[k][0] + US[i][1] * V[k][1] + US[i][2] * V[k][2]
                 for k in range(3)] for i in range(3)]

    Fp = recon(sig_pl)
    Fs = recon(sig_sand)

    # ---------------- water ----------------
    det = (F[0][0] * (F[1][1] * F[2][2] - F[1][2] * F[2][1])
           - F[0][1] * (F[1][0] * F[2][2] - F[1][2] * F[2][0])
           + F[0][2] * (F[1][0] * F[2][1] - F[1][1] * F[2][0]))
    # pow(J, 1/3) via exp/log (NaN for J < 0, like torch.pow).
    je13 = jnp.exp(jnp.log(det) * (1.0 / 3.0))

    for i in range(3):
        for k in range(3):
            val = 0.5 * Fp[i][k] + 0.3 * Fs[i][k]
            if i == k:
                val = val + 0.2 * je13
            out_ref[3 * i + k] = val


def physics_forward(F,
                    youngs_modulus_log=YOUNGS_MODULUS_LOG,
                    poissons_ratio=POISSONS_RATIO,
                    yield_stress=YIELD_STRESS,
                    alpha=ALPHA,
                    cohesion=COHESION,
                    *,
                    block_sub=32):
    """F: (B, 3, 3) float32 -> (B, 3, 3) float32.

    block_sub * 128 batch elements are processed per grid step (block_sub must
    be a multiple of 8).  The default (32 -> 4096 elements, ~150 KiB per
    double-buffered block) fits comfortably under the scoped-VMEM defaults of
    v5e (16 MiB), v6e (32 MiB) and v7x (64 MiB physical).
    """
    assert block_sub % 8 == 0 and block_sub > 0
    dtype = jnp.float32
    F = F.astype(dtype)
    B = F.shape[0]

    # Precompute scalar material constants on the host (drops per-call exp/divides).
    yml = jnp.asarray(youngs_modulus_log, dtype)
    pr = jnp.asarray(poissons_ratio, dtype)
    ys = jnp.asarray(yield_stress, dtype)
    al = jnp.asarray(alpha, dtype)
    coh = jnp.asarray(cohesion, dtype)
    E = jnp.exp(yml)
    mu = E / (2.0 * (1.0 + pr))
    la = E * pr / ((1.0 + pr) * (1.0 - 2.0 * pr))
    params = jnp.stack([ys / (2.0 * mu),
                        (3.0 * la + 2.0 * mu) / (2.0 * mu) * al,
                        coh,
                        3.0 * coh]).astype(dtype)

    # Pad the batch to whole (block_sub x 128) tiles (identity pad is SVD-safe).
    chunk = block_sub * _LANE
    n_tiles = max(1, -(-B // chunk))
    Bp = n_tiles * chunk
    if Bp != B:
        pad = jnp.broadcast_to(jnp.eye(3, dtype=dtype), (Bp - B, 3, 3))
        F_full = jnp.concatenate([F, pad], axis=0)
    else:
        F_full = F

    # Component-major SoA: (9, Bp) -> (9, n_tiles*block_sub, 128).
    # TODO(synk): callers that can keep F in SoA layout end-to-end avoid this
    # transpose (and the inverse one below) — one extra HBM pass each way.
    f_soa = jnp.transpose(F_full.reshape(Bp, 9), (1, 0)).reshape(
        9, n_tiles * block_sub, _LANE)

    block = (9, block_sub, _LANE)
    out_soa = pl.pallas_call(
        _physics_kernel,
        out_shape=jax.ShapeDtypeStruct((9, n_tiles * block_sub, _LANE), dtype),
        grid=(n_tiles,),
        in_specs=[
            pl.BlockSpec(memory_space=pltpu.MemorySpace.SMEM),   # params (4,)
            pl.BlockSpec(block, lambda i: (0, i, 0)),            # F (SoA)
        ],
        out_specs=pl.BlockSpec(block, lambda i: (0, i, 0)),
        compiler_params=pltpu.CompilerParams(
            dimension_semantics=("parallel",)),
    )(params, f_soa)

    out = jnp.transpose(out_soa.reshape(9, Bp), (1, 0)).reshape(Bp, 3, 3)
    return out[:B]


def physics_ref(F, yml, pr, ys, alpha, coh):
    """Pure-JAX reference mirroring the PyTorch module (for verification)."""
    E = jnp.exp(jnp.asarray(yml, jnp.float32))
    mu = E / (2.0 * (1.0 + pr))
    la = E * pr / ((1.0 + pr) * (1.0 - 2.0 * pr))
    U, S, Vh = jnp.linalg.svd(F)
    # plasticine
    s = jnp.maximum(S, 0.01)
    eps = jnp.log(s)
    trace = eps.sum(axis=1, keepdims=True)
    eps_bar = eps - trace / 3.0
    nb = jnp.linalg.norm(eps_bar, axis=1, keepdims=True) + 1e-5
    dg = nb - ys / (2.0 * mu)
    ye = eps - dg / nb * eps_bar
    sp = jnp.where(dg > 0.0, jnp.exp(ye), s)
    Fp = U @ (sp[:, :, None] * Vh)
    # sand
    s = jnp.maximum(S, 0.05)
    eps = jnp.log(s)
    trace = eps.sum(axis=1, keepdims=True)
    eh = eps - trace / 3.0
    nh = jnp.linalg.norm(eh, axis=1, keepdims=True)
    st = trace - coh * 3.0
    cond = st < 0.0
    dg = nh + (3.0 * la + 2.0 * mu) / (2.0 * mu) * st * alpha
    ce = eps - jnp.maximum(dg, 0.0) / nh * eh
    ef = jnp.where(cond, ce, jnp.ones_like(eps) * coh)
    Fs = U @ (jnp.exp(ef)[:, :, None] * Vh)
    # water
    J = jnp.linalg.det(F)
    Je13 = jnp.power(J, 1.0 / 3.0)
    Fw = Je13[:, None, None] * jnp.eye(3, dtype=F.dtype)
    return 0.5 * Fp + 0.3 * Fs + 0.2 * Fw


if __name__ == "__main__":
    key = jax.random.PRNGKey(0)
    B = 2500
    # Deformation gradients near identity (positive determinant).
    noise = 0.1 * jax.random.normal(key, (B, 3, 3), dtype=jnp.float32)
    F = jnp.eye(3, dtype=jnp.float32)[None, :, :] + noise

    # block_sub=8 -> 1024 elements/tile -> 3-step grid at this batch size
    # (exercises tiling + padding); production default is block_sub=32.
    out = physics_forward(F, block_sub=8)
    out = jax.block_until_ready(out)

    ref = physics_ref(F, YOUNGS_MODULUS_LOG, POISSONS_RATIO, YIELD_STRESS,
                      ALPHA, COHESION)
    assert out.shape == (B, 3, 3)
    max_err = float(jnp.max(jnp.abs(out - ref)))
    assert jnp.allclose(out, ref, atol=2e-4, rtol=2e-4), max_err
    print("KERNEL_OK")
</pallas_src>

<mosaic_0001>
module attributes {stable_mosaic.version = 11 : i64} {
  func.func @_physics_kernel(%arg0: i32, %arg1: memref<4xf32, #tpu.memory_space<smem>>, %arg2: memref<9x8x128xf32, #tpu.memory_space<vmem>>, %arg3: memref<9x8x128xf32, #tpu.memory_space<vmem>>) attributes {dimension_semantics = [#tpu.dimension_semantics<parallel>], iteration_bounds = array<i64: 3>, scalar_prefetch = 0 : i64, scratch_operands = 0 : i64, tpu.core_type = #tpu.core_type<tc>, window_params = [{transform_indices = @transform_0, window_bounds = array<i64: 4>}, {transform_indices = @transform_1, window_bounds = array<i64: 9, 8, 128>}, {transform_indices = @transform_2, window_bounds = array<i64: 9, 8, 128>}]} {
    %c0 = arith.constant 0 : index
    %0 = memref.load %arg1[%c0] : memref<4xf32, #tpu.memory_space<smem>>
    %c1 = arith.constant 1 : index
    %1 = memref.load %arg1[%c1] : memref<4xf32, #tpu.memory_space<smem>>
    %c2 = arith.constant 2 : index
    %2 = memref.load %arg1[%c2] : memref<4xf32, #tpu.memory_space<smem>>
    %c3 = arith.constant 3 : index
    %3 = memref.load %arg1[%c3] : memref<4xf32, #tpu.memory_space<smem>>
    %c0_0 = arith.constant 0 : index
    %c0_1 = arith.constant 0 : index
    %c0_2 = arith.constant 0 : index
    %4 = vector.load %arg2[%c0_0, %c0_1, %c0_2] : memref<9x8x128xf32, #tpu.memory_space<vmem>>, vector<1x8x128xf32>
    %5 = vector.shape_cast %4 : vector<1x8x128xf32> to vector<8x128xf32>
    %c1_3 = arith.constant 1 : index
    %c0_4 = arith.constant 0 : index
    %c0_5 = arith.constant 0 : index
    %6 = vector.load %arg2[%c1_3, %c0_4, %c0_5] : memref<9x8x128xf32, #tpu.memory_space<vmem>>, vector<1x8x128xf32>
    %7 = vector.shape_cast %6 : vector<1x8x128xf32> to vector<8x128xf32>
    %c2_6 = arith.constant 2 : index
    %c0_7 = arith.constant 0 : index
    %c0_8 = arith.constant 0 : index
    %8 = vector.load %arg2[%c2_6, %c0_7, %c0_8] : memref<9x8x128xf32, #tpu.memory_space<vmem>>, vector<1x8x128xf32>
    %9 = vector.shape_cast %8 : vector<1x8x128xf32> to vector<8x128xf32>
    %c3_9 = arith.constant 3 : index
    %c0_10 = arith.constant 0 : index
    %c0_11 = arith.constant 0 : index
    %10 = vector.load %arg2[%c3_9, %c0_10, %c0_11] : memref<9x8x128xf32, #tpu.memory_space<vmem>>, vector<1x8x128xf32>
    %11 = vector.shape_cast %10 : vector<1x8x128xf32> to vector<8x128xf32>
    %c4 = arith.constant 4 : index
    %c0_12 = arith.constant 0 : index
    %c0_13 = arith.constant 0 : index
    %12 = vector.load %arg2[%c4, %c0_12, %c0_13] : memref<9x8x128xf32, #tpu.memory_space<vmem>>, vector<1x8x128xf32>
    %13 = vector.shape_cast %12 : vector<1x8x128xf32> to vector<8x128xf32>
    %c5 = arith.constant 5 : index
    %c0_14 = arith.constant 0 : index
    %c0_15 = arith.constant 0 : index
    %14 = vector.load %arg2[%c5, %c0_14, %c0_15] : memref<9x8x128xf32, #tpu.memory_space<vmem>>, vector<1x8x128xf32>
    %15 = vector.shape_cast %14 : vector<1x8x128xf32> to vector<8x128xf32>
    %c6 = arith.constant 6 : index
    %c0_16 = arith.constant 0 : index
    %c0_17 = arith.constant 0 : index
    %16 = vector.load %arg2[%c6, %c0_16, %c0_17] : memref<9x8x128xf32, #tpu.memory_space<vmem>>, vector<1x8x128xf32>
    %17 = vector.shape_cast %16 : vector<1x8x128xf32> to vector<8x128xf32>
    %c7 = arith.constant 7 : index
    %c0_18 = arith.constant 0 : index
    %c0_19 = arith.constant 0 : index
    %18 = vector.load %arg2[%c7, %c0_18, %c0_19] : memref<9x8x128xf32, #tpu.memory_space<vmem>>, vector<1x8x128xf32>
    %19 = vector.shape_cast %18 : vector<1x8x128xf32> to vector<8x128xf32>
    %c8 = arith.constant 8 : index
    %c0_20 = arith.constant 0 : index
    %c0_21 = arith.constant 0 : index
    %20 = vector.load %arg2[%c8, %c0_20, %c0_21] : memref<9x8x128xf32, #tpu.memory_space<vmem>>, vector<1x8x128xf32>
    %21 = vector.shape_cast %20 : vector<1x8x128xf32> to vector<8x128xf32>
    %cst = arith.constant 0.000000e+00 : f32
    %22 = vector.broadcast %cst : f32 to vector<8x128xf32>
    %cst_22 = arith.constant 1.000000e+00 : f32
    %23 = vector.broadcast %cst_22 : f32 to vector<8x128xf32>
    %24 = arith.mulf %5, %5 : vector<8x128xf32>
    %25 = arith.mulf %11, %11 : vector<8x128xf32>
    %26 = arith.addf %24, %25 : vector<8x128xf32>
    %27 = arith.mulf %17, %17 : vector<8x128xf32>
    %28 = arith.addf %26, %27 : vector<8x128xf32>
    %29 = arith.mulf %5, %7 : vector<8x128xf32>
    %30 = arith.mulf %11, %13 : vector<8x128xf32>
    %31 = arith.addf %29, %30 : vector<8x128xf32>
    %32 = arith.mulf %17, %19 : vector<8x128xf32>
    %33 = arith.addf %31, %32 : vector<8x128xf32>
    %34 = arith.mulf %7, %7 : vector<8x128xf32>
    %35 = arith.mulf %13, %13 : vector<8x128xf32>
    %36 = arith.addf %34, %35 : vector<8x128xf32>
    %37 = arith.mulf %19, %19 : vector<8x128xf32>
    %38 = arith.addf %36, %37 : vector<8x128xf32>
    %39 = arith.mulf %9, %5 : vector<8x128xf32>
    %40 = arith.mulf %15, %11 : vector<8x128xf32>
    %41 = arith.addf %39, %40 : vector<8x128xf32>
    %42 = arith.mulf %21, %17 : vector<8x128xf32>
    %43 = arith.addf %41, %42 : vector<8x128xf32>
    %44 = arith.mulf %9, %7 : vector<8x128xf32>
    %45 = arith.mulf %15, %13 : vector<8x128xf32>
    %46 = arith.addf %44, %45 : vector<8x128xf32>
    %47 = arith.mulf %21, %19 : vector<8x128xf32>
    %48 = arith.addf %46, %47 : vector<8x128xf32>
    %49 = arith.mulf %9, %9 : vector<8x128xf32>
    %50 = arith.mulf %15, %15 : vector<8x128xf32>
    %51 = arith.addf %49, %50 : vector<8x128xf32>
    %52 = arith.mulf %21, %21 : vector<8x128xf32>
    %53 = arith.addf %51, %52 : vector<8x128xf32>
    %54 = math.absf %33 : vector<8x128xf32>
    %cst_23 = arith.constant 1.000000e-30 : f32
    %55 = vector.broadcast %cst_23 : f32 to vector<8x128xf32>
    %56 = arith.cmpf olt, %54, %55 : vector<8x128xf32>
    %57 = arith.select %56, %23, %33 : vector<8x128xi1>, vector<8x128xf32>
    %58 = arith.subf %38, %28 : vector<8x128xf32>
    %cst_24 = arith.constant 2.000000e+00 : f32
    %59 = vector.broadcast %cst_24 : f32 to vector<8x128xf32>
    %60 = arith.mulf %59, %57 : vector<8x128xf32>
    %61 = arith.divf %58, %60 : vector<8x128xf32>
    %cst_25 = arith.constant 0.000000e+00 : f32
    %62 = vector.broadcast %cst_25 : f32 to vector<8x128xf32>
    %63 = arith.cmpf oge, %61, %62 : vector<8x128xf32>
    %cst_26 = arith.constant 1.000000e+00 : f32
    %cst_27 = arith.constant -1.000000e+00 : f32
    %64 = vector.broadcast %cst_26 : f32 to vector<8x128xf32>
    %65 = vector.broadcast %cst_27 : f32 to vector<8x128xf32>
    %66 = arith.select %63, %64, %65 : vector<8x128xi1>, vector<8x128xf32>
    %67 = math.absf %61 : vector<8x128xf32>
    %68 = arith.mulf %61, %61 : vector<8x128xf32>
    %cst_28 = arith.constant 1.000000e+00 : f32
    %69 = vector.broadcast %cst_28 : f32 to vector<8x128xf32>
    %70 = arith.addf %68, %69 : vector<8x128xf32>
    %71 = math.sqrt %70 : vector<8x128xf32>
    %72 = arith.addf %67, %71 : vector<8x128xf32>
    %73 = arith.divf %66, %72 : vector<8x128xf32>
    %74 = arith.select %56, %22, %73 : vector<8x128xi1>, vector<8x128xf32>
    %75 = arith.mulf %74, %74 : vector<8x128xf32>
    %cst_29 = arith.constant 1.000000e+00 : f32
    %76 = vector.broadcast %cst_29 : f32 to vector<8x128xf32>
    %77 = arith.addf %75, %76 : vector<8x128xf32>
    %78 = math.rsqrt %77 : vector<8x128xf32>
    %79 = arith.mulf %74, %78 : vector<8x128xf32>
    %80 = arith.mulf %78, %78 : vector<8x128xf32>
    %81 = arith.mulf %79, %79 : vector<8x128xf32>
    %82 = arith.mulf %78, %79 : vector<8x128xf32>
    %83 = arith.mulf %80, %28 : vector<8x128xf32>
    %cst_30 = arith.constant 2.000000e+00 : f32
    %84 = vector.broadcast %cst_30 : f32 to vector<8x128xf32>
    %85 = arith.mulf %84, %82 : vector<8x128xf32>
    %86 = arith.mulf %85, %33 : vector<8x128xf32>
    %87 = arith.subf %83, %86 : vector<8x128xf32>
    %88 = arith.mulf %81, %38 : vector<8x128xf32>
    %89 = arith.addf %87, %88 : vector<8x128xf32>
    %90 = arith.mulf %81, %28 : vector<8x128xf32>
    %cst_31 = arith.constant 2.000000e+00 : f32
    %91 = vector.broadcast %cst_31 : f32 to vector<8x128xf32>
    %92 = arith.mulf %91, %82 : vector<8x128xf32>
    %93 = arith.mulf %92, %33 : vector<8x128xf32>
    %94 = arith.addf %90, %93 : vector<8x128xf32>
    %95 = arith.mulf %80, %38 : vector<8x128xf32>
    %96 = arith.addf %94, %95 : vector<8x128xf32>
    %97 = arith.mulf %78, %43 : vector<8x128xf32>
    %98 = arith.mulf %79, %48 : vector<8x128xf32>
    %99 = arith.subf %97, %98 : vector<8x128xf32>
    %100 = arith.mulf %79, %43 : vector<8x128xf32>
    %101 = arith.mulf %78, %48 : vector<8x128xf32>
    %102 = arith.addf %100, %101 : vector<8x128xf32>
    %103 = arith.mulf %78, %23 : vector<8x128xf32>
    %104 = arith.mulf %79, %22 : vector<8x128xf32>
    %105 = arith.subf %103, %104 : vector<8x128xf32>
    %106 = arith.mulf %79, %23 : vector<8x128xf32>
    %107 = arith.mulf %78, %22 : vector<8x128xf32>
    %108 = arith.addf %106, %107 : vector<8x128xf32>
    %109 = arith.mulf %78, %22 : vector<8x128xf32>
    %110 = arith.mulf %79, %23 : vector<8x128xf32>
    %111 = arith.subf %109, %110 : vector<8x128xf32>
    %112 = arith.mulf %79, %22 : vector<8x128xf32>
    %113 = arith.mulf %78, %23 : vector<8x128xf32>
    %114 = arith.addf %112, %113 : vector<8x128xf32>
    %115 = arith.mulf %78, %22 : vector<8x128xf32>
    %116 = arith.mulf %79, %22 : vector<8x128xf32>
    %117 = arith.subf %115, %116 : vector<8x128xf32>
    %118 = arith.mulf %79, %22 : vector<8x128xf32>
    %119 = arith.mulf %78, %22 : vector<8x128xf32>
    %120 = arith.addf %118, %119 : vector<8x128xf32>
    %121 = math.absf %99 : vector<8x128xf32>
    %cst_32 = arith.constant 1.000000e-30 : f32
    %122 = vector.broadcast %cst_32 : f32 to vector<8x128xf32>
    %123 = arith.cmpf olt, %121, %122 : vector<8x128xf32>
    %124 = arith.select %123, %23, %99 : vector<8x128xi1>, vector<8x128xf32>
    %125 = arith.subf %53, %89 : vector<8x128xf32>
    %cst_33 = arith.constant 2.000000e+00 : f32
    %126 = vector.broadcast %cst_33 : f32 to vector<8x128xf32>
    %127 = arith.mulf %126, %124 : vector<8x128xf32>
    %128 = arith.divf %125, %127 : vector<8x128xf32>
    %cst_34 = arith.constant 0.000000e+00 : f32
    %129 = vector.broadcast %cst_34 : f32 to vector<8x128xf32>
    %130 = arith.cmpf oge, %128, %129 : vector<8x128xf32>
    %cst_35 = arith.constant 1.000000e+00 : f32
    %cst_36 = arith.constant -1.000000e+00 : f32
    %131 = vector.broadcast %cst_35 : f32 to vector<8x128xf32>
    %132 = vector.broadcast %cst_36 : f32 to vector<8x128xf32>
    %133 = arith.select %130, %131, %132 : vector<8x128xi1>, vector<8x128xf32>
    %134 = math.absf %128 : vector<8x128xf32>
    %135 = arith.mulf %128, %128 : vector<8x128xf32>
    %cst_37 = arith.constant 1.000000e+00 : f32
    %136 = vector.broadcast %cst_37 : f32 to vector<8x128xf32>
    %137 = arith.addf %135, %136 : vector<8x128xf32>
    %138 = math.sqrt %137 : vector<8x128xf32>
    %139 = arith.addf %134, %138 : vector<8x128xf32>
    %140 = arith.divf %133, %139 : vector<8x128xf32>
    %141 = arith.select %123, %22, %140 : vector<8x128xi1>, vector<8x128xf32>
    %142 = arith.mulf %141, %141 : vector<8x128xf32>
    %cst_38 = arith.constant 1.000000e+00 : f32
    %143 = vector.broadcast %cst_38 : f32 to vector<8x128xf32>
    %144 = arith.addf %142, %143 : vector<8x128xf32>
    %145 = math.rsqrt %144 : vector<8x128xf32>
    %146 = arith.mulf %141, %145 : vector<8x128xf32>
    %147 = arith.mulf %145, %145 : vector<8x128xf32>
    %148 = arith.mulf %146, %146 : vector<8x128xf32>
    %149 = arith.mulf %145, %146 : vector<8x128xf32>
    %150 = arith.mulf %147, %89 : vector<8x128xf32>
    %cst_39 = arith.constant 2.000000e+00 : f32
    %151 = vector.broadcast %cst_39 : f32 to vector<8x128xf32>
    %152 = arith.mulf %151, %149 : vector<8x128xf32>
    %153 = arith.mulf %152, %99 : vector<8x128xf32>
    %154 = arith.subf %150, %153 : vector<8x128xf32>
    %155 = arith.mulf %148, %53 : vector<8x128xf32>
    %156 = arith.addf %154, %155 : vector<8x128xf32>
    %157 = arith.mulf %148, %89 : vector<8x128xf32>
    %cst_40 = arith.constant 2.000000e+00 : f32
    %158 = vector.broadcast %cst_40 : f32 to vector<8x128xf32>
    %159 = arith.mulf %158, %149 : vector<8x128xf32>
    %160 = arith.mulf %159, %99 : vector<8x128xf32>
    %161 = arith.addf %157, %160 : vector<8x128xf32>
    %162 = arith.mulf %147, %53 : vector<8x128xf32>
    %163 = arith.addf %161, %162 : vector<8x128xf32>
    %164 = arith.mulf %145, %22 : vector<8x128xf32>
    %165 = arith.mulf %146, %102 : vector<8x128xf32>
    %166 = arith.subf %164, %165 : vector<8x128xf32>
    %167 = arith.mulf %146, %22 : vector<8x128xf32>
    %168 = arith.mulf %145, %102 : vector<8x128xf32>
    %169 = arith.addf %167, %168 : vector<8x128xf32>
    %170 = arith.mulf %145, %105 : vector<8x128xf32>
    %171 = arith.mulf %146, %22 : vector<8x128xf32>
    %172 = arith.subf %170, %171 : vector<8x128xf32>
    %173 = arith.mulf %146, %105 : vector<8x128xf32>
    %174 = arith.mulf %145, %22 : vector<8x128xf32>
    %175 = arith.addf %173, %174 : vector<8x128xf32>
    %176 = arith.mulf %145, %111 : vector<8x128xf32>
    %177 = arith.mulf %146, %22 : vector<8x128xf32>
    %178 = arith.subf %176, %177 : vector<8x128xf32>
    %179 = arith.mulf %146, %111 : vector<8x128xf32>
    %180 = arith.mulf %145, %22 : vector<8x128xf32>
    %181 = arith.addf %179, %180 : vector<8x128xf32>
    %182 = arith.mulf %145, %117 : vector<8x128xf32>
    %183 = arith.mulf %146, %23 : vector<8x128xf32>
    %184 = arith.subf %182, %183 : vector<8x128xf32>
    %185 = arith.mulf %146, %117 : vector<8x128xf32>
    %186 = arith.mulf %145, %23 : vector<8x128xf32>
    %187 = arith.addf %185, %186 : vector<8x128xf32>
    %188 = math.absf %169 : vector<8x128xf32>
    %cst_41 = arith.constant 1.000000e-30 : f32
    %189 = vector.broadcast %cst_41 : f32 to vector<8x128xf32>
    %190 = arith.cmpf olt, %188, %189 : vector<8x128xf32>
    %191 = arith.select %190, %23, %169 : vector<8x128xi1>, vector<8x128xf32>
    %192 = arith.subf %163, %96 : vector<8x128xf32>
    %cst_42 = arith.constant 2.000000e+00 : f32
    %193 = vector.broadcast %cst_42 : f32 to vector<8x128xf32>
    %194 = arith.mulf %193, %191 : vector<8x128xf32>
    %195 = arith.divf %192, %194 : vector<8x128xf32>
    %cst_43 = arith.constant 0.000000e+00 : f32
    %196 = vector.broadcast %cst_43 : f32 to vector<8x128xf32>
    %197 = arith.cmpf oge, %195, %196 : vector<8x128xf32>
    %cst_44 = arith.constant 1.000000e+00 : f32
    %cst_45 = arith.constant -1.000000e+00 : f32
    %198 = vector.broadcast %cst_44 : f32 to vector<8x128xf32>
    %199 = vector.broadcast %cst_45 : f32 to vector<8x128xf32>
    %200 = arith.select %197, %198, %199 : vector<8x128xi1>, vector<8x128xf32>
    %201 = math.absf %195 : vector<8x128xf32>
    %202 = arith.mulf %195, %195 : vector<8x128xf32>
    %cst_46 = arith.constant 1.000000e+00 : f32
    %203 = vector.broadcast %cst_46 : f32 to vector<8x128xf32>
    %204 = arith.addf %202, %203 : vector<8x128xf32>
    %205 = math.sqrt %204 : vector<8x128xf32>
    %206 = arith.addf %201, %205 : vector<8x128xf32>
    %207 = arith.divf %200, %206 : vector<8x128xf32>
    %208 = arith.select %190, %22, %207 : vector<8x128xi1>, vector<8x128xf32>
    %209 = arith.mulf %208, %208 : vector<8x128xf32>
    %cst_47 = arith.constant 1.000000e+00 : f32
    %210 = vector.broadcast %cst_47 : f32 to vector<8x128xf32>
    %211 = arith.addf %209, %210 : vector<8x128xf32>
    %212 = math.rsqrt %211 : vector<8x128xf32>
    %213 = arith.mulf %208, %212 : vector<8x128xf32>
    %214 = arith.mulf %212, %212 : vector<8x128xf32>
    %215 = arith.mulf %213, %213 : vector<8x128xf32>
    %216 = arith.mulf %212, %213 : vector<8x128xf32>
    %217 = arith.mulf %214, %96 : vector<8x128xf32>
    %cst_48 = arith.constant 2.000000e+00 : f32
    %218 = vector.broadcast %cst_48 : f32 to vector<8x128xf32>
    %219 = arith.mulf %218, %216 : vector<8x128xf32>
    %220 = arith.mulf %219, %169 : vector<8x128xf32>
    %221 = arith.subf %217, %220 : vector<8x128xf32>
    %222 = arith.mulf %215, %163 : vector<8x128xf32>
    %223 = arith.addf %221, %222 : vector<8x128xf32>
    %224 = arith.mulf %215, %96 : vector<8x128xf32>
    %cst_49 = arith.constant 2.000000e+00 : f32
    %225 = vector.broadcast %cst_49 : f32 to vector<8x128xf32>
    %226 = arith.mulf %225, %216 : vector<8x128xf32>
    %227 = arith.mulf %226, %169 : vector<8x128xf32>
    %228 = arith.addf %224, %227 : vector<8x128xf32>
    %229 = arith.mulf %214, %163 : vector<8x128xf32>
    %230 = arith.addf %228, %229 : vector<8x128xf32>
    %231 = arith.mulf %212, %166 : vector<8x128xf32>
    %232 = arith.mulf %213, %22 : vector<8x128xf32>
    %233 = arith.subf %231, %232 : vector<8x128xf32>
    %234 = arith.mulf %213, %166 : vector<8x128xf32>
    %235 = arith.mulf %212, %22 : vector<8x128xf32>
    %236 = arith.addf %234, %235 : vector<8x128xf32>
    %237 = arith.mulf %212, %108 : vector<8x128xf32>
    %238 = arith.mulf %213, %175 : vector<8x128xf32>
    %239 = arith.subf %237, %238 : vector<8x128xf32>
    %240 = arith.mulf %213, %108 : vector<8x128xf32>
    %241 = arith.mulf %212, %175 : vector<8x128xf32>
    %242 = arith.addf %240, %241 : vector<8x128xf32>
    %243 = arith.mulf %212, %114 : vector<8x128xf32>
    %244 = arith.mulf %213, %181 : vector<8x128xf32>
    %245 = arith.subf %243, %244 : vector<8x128xf32>
    %246 = arith.mulf %213, %114 : vector<8x128xf32>
    %247 = arith.mulf %212, %181 : vector<8x128xf32>
    %248 = arith.addf %246, %247 : vector<8x128xf32>
    %249 = arith.mulf %212, %120 : vector<8x128xf32>
    %250 = arith.mulf %213, %187 : vector<8x128xf32>
    %251 = arith.subf %249, %250 : vector<8x128xf32>
    %252 = arith.mulf %213, %120 : vector<8x128xf32>
    %253 = arith.mulf %212, %187 : vector<8x128xf32>
    %254 = arith.addf %252, %253 : vector<8x128xf32>
    %255 = math.absf %233 : vector<8x128xf32>
    %cst_50 = arith.constant 1.000000e-30 : f32
    %256 = vector.broadcast %cst_50 : f32 to vector<8x128xf32>
    %257 = arith.cmpf olt, %255, %256 : vector<8x128xf32>
    %258 = arith.select %257, %23, %233 : vector<8x128xi1>, vector<8x128xf32>
    %259 = arith.subf %223, %156 : vector<8x128xf32>
    %cst_51 = arith.constant 2.000000e+00 : f32
    %260 = vector.broadcast %cst_51 : f32 to vector<8x128xf32>
    %261 = arith.mulf %260, %258 : vector<8x128xf32>
    %262 = arith.divf %259, %261 : vector<8x128xf32>
    %cst_52 = arith.constant 0.000000e+00 : f32
    %263 = vector.broadcast %cst_52 : f32 to vector<8x128xf32>
    %264 = arith.cmpf oge, %262, %263 : vector<8x128xf32>
    %cst_53 = arith.constant 1.000000e+00 : f32
    %cst_54 = arith.constant -1.000000e+00 : f32
    %265 = vector.broadcast %cst_53 : f32 to vector<8x128xf32>
    %266 = vector.broadcast %cst_54 : f32 to vector<8x128xf32>
    %267 = arith.select %264, %265, %266 : vector<8x128xi1>, vector<8x128xf32>
    %268 = math.absf %262 : vector<8x128xf32>
    %269 = arith.mulf %262, %262 : vector<8x128xf32>
    %cst_55 = arith.constant 1.000000e+00 : f32
    %270 = vector.broadcast %cst_55 : f32 to vector<8x128xf32>
    %271 = arith.addf %269, %270 : vector<8x128xf32>
    %272 = math.sqrt %271 : vector<8x128xf32>
    %273 = arith.addf %268, %272 : vector<8x128xf32>
    %274 = arith.divf %267, %273 : vector<8x128xf32>
    %275 = arith.select %257, %22, %274 : vector<8x128xi1>, vector<8x128xf32>
    %276 = arith.mulf %275, %275 : vector<8x128xf32>
    %cst_56 = arith.constant 1.000000e+00 : f32
    %277 = vector.broadcast %cst_56 : f32 to vector<8x128xf32>
    %278 = arith.addf %276, %277 : vector<8x128xf32>
    %279 = math.rsqrt %278 : vector<8x128xf32>
    %280 = arith.mulf %275, %279 : vector<8x128xf32>
    %281 = arith.mulf %279, %279 : vector<8x128xf32>
    %282 = arith.mulf %280, %280 : vector<8x128xf32>
    %283 = arith.mulf %279, %280 : vector<8x128xf32>
    %284 = arith.mulf %281, %156 : vector<8x128xf32>
    %cst_57 = arith.constant 2.000000e+00 : f32
    %285 = vector.broadcast %cst_57 : f32 to vector<8x128xf32>
    %286 = arith.mulf %285, %283 : vector<8x128xf32>
    %287 = arith.mulf %286, %233 : vector<8x128xf32>
    %288 = arith.subf %284, %287 : vector<8x128xf32>
    %289 = arith.mulf %282, %223 : vector<8x128xf32>
    %290 = arith.addf %288, %289 : vector<8x128xf32>
    %291 = arith.mulf %282, %156 : vector<8x128xf32>
    %cst_58 = arith.constant 2.000000e+00 : f32
    %292 = vector.broadcast %cst_58 : f32 to vector<8x128xf32>
    %293 = arith.mulf %292, %283 : vector<8x128xf32>
    %294 = arith.mulf %293, %233 : vector<8x128xf32>
    %295 = arith.addf %291, %294 : vector<8x128xf32>
    %296 = arith.mulf %281, %223 : vector<8x128xf32>
    %297 = arith.addf %295, %296 : vector<8x128xf32>
    %298 = arith.mulf %279, %236 : vector<8x128xf32>
    %299 = arith.mulf %280, %22 : vector<8x128xf32>
    %300 = arith.subf %298, %299 : vector<8x128xf32>
    %301 = arith.mulf %280, %236 : vector<8x128xf32>
    %302 = arith.mulf %279, %22 : vector<8x128xf32>
    %303 = arith.addf %301, %302 : vector<8x128xf32>
    %304 = arith.mulf %279, %172 : vector<8x128xf32>
    %305 = arith.mulf %280, %239 : vector<8x128xf32>
    %306 = arith.subf %304, %305 : vector<8x128xf32>
    %307 = arith.mulf %280, %172 : vector<8x128xf32>
    %308 = arith.mulf %279, %239 : vector<8x128xf32>
    %309 = arith.addf %307, %308 : vector<8x128xf32>
    %310 = arith.mulf %279, %178 : vector<8x128xf32>
    %311 = arith.mulf %280, %245 : vector<8x128xf32>
    %312 = arith.subf %310, %311 : vector<8x128xf32>
    %313 = arith.mulf %280, %178 : vector<8x128xf32>
    %314 = arith.mulf %279, %245 : vector<8x128xf32>
    %315 = arith.addf %313, %314 : vector<8x128xf32>
    %316 = arith.mulf %279, %184 : vector<8x128xf32>
    %317 = arith.mulf %280, %251 : vector<8x128xf32>
    %318 = arith.subf %316, %317 : vector<8x128xf32>
    %319 = arith.mulf %280, %184 : vector<8x128xf32>
    %320 = arith.mulf %279, %251 : vector<8x128xf32>
    %321 = arith.addf %319, %320 : vector<8x128xf32>
    %322 = math.absf %300 : vector<8x128xf32>
    %cst_59 = arith.constant 1.000000e-30 : f32
    %323 = vector.broadcast %cst_59 : f32 to vector<8x128xf32>
    %324 = arith.cmpf olt, %322, %323 : vector<8x128xf32>
    %325 = arith.select %324, %23, %300 : vector<8x128xi1>, vector<8x128xf32>
    %326 = arith.subf %230, %290 : vector<8x128xf32>
    %cst_60 = arith.constant 2.000000e+00 : f32
    %327 = vector.broadcast %cst_60 : f32 to vector<8x128xf32>
    %328 = arith.mulf %327, %325 : vector<8x128xf32>
    %329 = arith.divf %326, %328 : vector<8x128xf32>
    %cst_61 = arith.constant 0.000000e+00 : f32
    %330 = vector.broadcast %cst_61 : f32 to vector<8x128xf32>
    %331 = arith.cmpf oge, %329, %330 : vector<8x128xf32>
    %cst_62 = arith.constant 1.000000e+00 : f32
    %cst_63 = arith.constant -1.000000e+00 : f32
    %332 = vector.broadcast %cst_62 : f32 to vector<8x128xf32>
    %333 = vector.broadcast %cst_63 : f32 to vector<8x128xf32>
    %334 = arith.select %331, %332, %333 : vector<8x128xi1>, vector<8x128xf32>
    %335 = math.absf %329 : vector<8x128xf32>
    %336 = arith.mulf %329, %329 : vector<8x128xf32>
    %cst_64 = arith.constant 1.000000e+00 : f32
    %337 = vector.broadcast %cst_64 : f32 to vector<8x128xf32>
    %338 = arith.addf %336, %337 : vector<8x128xf32>
    %339 = math.sqrt %338 : vector<8x128xf32>
    %340 = arith.addf %335, %339 : vector<8x128xf32>
    %341 = arith.divf %334, %340 : vector<8x128xf32>
    %342 = arith.select %324, %22, %341 : vector<8x128xi1>, vector<8x128xf32>
    %343 = arith.mulf %342, %342 : vector<8x128xf32>
    %cst_65 = arith.constant 1.000000e+00 : f32
    %344 = vector.broadcast %cst_65 : f32 to vector<8x128xf32>
    %345 = arith.addf %343, %344 : vector<8x128xf32>
    %346 = math.rsqrt %345 : vector<8x128xf32>
    %347 = arith.mulf %342, %346 : vector<8x128xf32>
    %348 = arith.mulf %346, %346 : vector<8x128xf32>
    %349 = arith.mulf %347, %347 : vector<8x128xf32>
    %350 = arith.mulf %346, %347 : vector<8x128xf32>
    %351 = arith.mulf %348, %290 : vector<8x128xf32>
    %cst_66 = arith.constant 2.000000e+00 : f32
    %352 = vector.broadcast %cst_66 : f32 to vector<8x128xf32>
    %353 = arith.mulf %352, %350 : vector<8x128xf32>
    %354 = arith.mulf %353, %300 : vector<8x128xf32>
    %355 = arith.subf %351, %354 : vector<8x128xf32>
    %356 = arith.mulf %349, %230 : vector<8x128xf32>
    %357 = arith.addf %355, %356 : vector<8x128xf32>
    %358 = arith.mulf %349, %290 : vector<8x128xf32>
    %cst_67 = arith.constant 2.000000e+00 : f32
    %359 = vector.broadcast %cst_67 : f32 to vector<8x128xf32>
    %360 = arith.mulf %359, %350 : vector<8x128xf32>
    %361 = arith.mulf %360, %300 : vector<8x128xf32>
    %362 = arith.addf %358, %361 : vector<8x128xf32>
    %363 = arith.mulf %348, %230 : vector<8x128xf32>
    %364 = arith.addf %362, %363 : vector<8x128xf32>
    %365 = arith.mulf %346, %22 : vector<8x128xf32>
    %366 = arith.mulf %347, %303 : vector<8x128xf32>
    %367 = arith.subf %365, %366 : vector<8x128xf32>
    %368 = arith.mulf %347, %22 : vector<8x128xf32>
    %369 = arith.mulf %346, %303 : vector<8x128xf32>
    %370 = arith.addf %368, %369 : vector<8x128xf32>
    %371 = arith.mulf %346, %306 : vector<8x128xf32>
    %372 = arith.mulf %347, %242 : vector<8x128xf32>
    %373 = arith.subf %371, %372 : vector<8x128xf32>
    %374 = arith.mulf %347, %306 : vector<8x128xf32>
    %375 = arith.mulf %346, %242 : vector<8x128xf32>
    %376 = arith.addf %374, %375 : vector<8x128xf32>
    %377 = arith.mulf %346, %312 : vector<8x128xf32>
    %378 = arith.mulf %347, %248 : vector<8x128xf32>
    %379 = arith.subf %377, %378 : vector<8x128xf32>
    %380 = arith.mulf %347, %312 : vector<8x128xf32>
    %381 = arith.mulf %346, %248 : vector<8x128xf32>
    %382 = arith.addf %380, %381 : vector<8x128xf32>
    %383 = arith.mulf %346, %318 : vector<8x128xf32>
    %384 = arith.mulf %347, %254 : vector<8x128xf32>
    %385 = arith.subf %383, %384 : vector<8x128xf32>
    %386 = arith.mulf %347, %318 : vector<8x128xf32>
    %387 = arith.mulf %346, %254 : vector<8x128xf32>
    %388 = arith.addf %386, %387 : vector<8x128xf32>
    %389 = math.absf %370 : vector<8x128xf32>
    %cst_68 = arith.constant 1.000000e-30 : f32
    %390 = vector.broadcast %cst_68 : f32 to vector<8x128xf32>
    %391 = arith.cmpf olt, %389, %390 : vector<8x128xf32>
    %392 = arith.select %391, %23, %370 : vector<8x128xi1>, vector<8x128xf32>
    %393 = arith.subf %364, %297 : vector<8x128xf32>
    %cst_69 = arith.constant 2.000000e+00 : f32
    %394 = vector.broadcast %cst_69 : f32 to vector<8x128xf32>
    %395 = arith.mulf %394, %392 : vector<8x128xf32>
    %396 = arith.divf %393, %395 : vector<8x128xf32>
    %cst_70 = arith.constant 0.000000e+00 : f32
    %397 = vector.broadcast %cst_70 : f32 to vector<8x128xf32>
    %398 = arith.cmpf oge, %396, %397 : vector<8x128xf32>
    %cst_71 = arith.constant 1.000000e+00 : f32
    %cst_72 = arith.constant -1.000000e+00 : f32
    %399 = vector.broadcast %cst_71 : f32 to vector<8x128xf32>
    %400 = vector.broadcast %cst_72 : f32 to vector<8x128xf32>
    %401 = arith.select %398, %399, %400 : vector<8x128xi1>, vector<8x128xf32>
    %402 = math.absf %396 : vector<8x128xf32>
    %403 = arith.mulf %396, %396 : vector<8x128xf32>
    %cst_73 = arith.constant 1.000000e+00 : f32
    %404 = vector.broadcast %cst_73 : f32 to vector<8x128xf32>
    %405 = arith.addf %403, %404 : vector<8x128xf32>
    %406 = math.sqrt %405 : vector<8x128xf32>
    %407 = arith.addf %402, %406 : vector<8x128xf32>
    %408 = arith.divf %401, %407 : vector<8x128xf32>
    %409 = arith.select %391, %22, %408 : vector<8x128xi1>, vector<8x128xf32>
    %410 = arith.mulf %409, %409 : vector<8x128xf32>
    %cst_74 = arith.constant 1.000000e+00 : f32
    %411 = vector.broadcast %cst_74 : f32 to vector<8x128xf32>
    %412 = arith.addf %410, %411 : vector<8x128xf32>
    %413 = math.rsqrt %412 : vector<8x128xf32>
    %414 = arith.mulf %409, %413 : vector<8x128xf32>
    %415 = arith.mulf %413, %413 : vector<8x128xf32>
    %416 = arith.mulf %414, %414 : vector<8x128xf32>
    %417 = arith.mulf %413, %414 : vector<8x128xf32>
    %418 = arith.mulf %415, %297 : vector<8x128xf32>
    %cst_75 = arith.constant 2.000000e+00 : f32
    %419 = vector.broadcast %cst_75 : f32 to vector<8x128xf32>
    %420 = arith.mulf %419, %417 : vector<8x128xf32>
    %421 = arith.mulf %420, %370 : vector<8x128xf32>
    %422 = arith.subf %418, %421 : vector<8x128xf32>
    %423 = arith.mulf %416, %364 : vector<8x128xf32>
    %424 = arith.addf %422, %423 : vector<8x128xf32>
    %425 = arith.mulf %416, %297 : vector<8x128xf32>
    %cst_76 = arith.constant 2.000000e+00 : f32
    %426 = vector.broadcast %cst_76 : f32 to vector<8x128xf32>
    %427 = arith.mulf %426, %417 : vector<8x128xf32>
    %428 = arith.mulf %427, %370 : vector<8x128xf32>
    %429 = arith.addf %425, %428 : vector<8x128xf32>
    %430 = arith.mulf %415, %364 : vector<8x128xf32>
    %431 = arith.addf %429, %430 : vector<8x128xf32>
    %432 = arith.mulf %413, %367 : vector<8x128xf32>
    %433 = arith.mulf %414, %22 : vector<8x128xf32>
    %434 = arith.subf %432, %433 : vector<8x128xf32>
    %435 = arith.mulf %414, %367 : vector<8x128xf32>
    %436 = arith.mulf %413, %22 : vector<8x128xf32>
    %437 = arith.addf %435, %436 : vector<8x128xf32>
    %438 = arith.mulf %413, %309 : vector<8x128xf32>
    %439 = arith.mulf %414, %376 : vector<8x128xf32>
    %440 = arith.subf %438, %439 : vector<8x128xf32>
    %441 = arith.mulf %414, %309 : vector<8x128xf32>
    %442 = arith.mulf %413, %376 : vector<8x128xf32>
    %443 = arith.addf %441, %442 : vector<8x128xf32>
    %444 = arith.mulf %413, %315 : vector<8x128xf32>
    %445 = arith.mulf %414, %382 : vector<8x128xf32>
    %446 = arith.subf %444, %445 : vector<8x128xf32>
    %447 = arith.mulf %414, %315 : vector<8x128xf32>
    %448 = arith.mulf %413, %382 : vector<8x128xf32>
    %449 = arith.addf %447, %448 : vector<8x128xf32>
    %450 = arith.mulf %413, %321 : vector<8x128xf32>
    %451 = arith.mulf %414, %388 : vector<8x128xf32>
    %452 = arith.subf %450, %451 : vector<8x128xf32>
    %453 = arith.mulf %414, %321 : vector<8x128xf32>
    %454 = arith.mulf %413, %388 : vector<8x128xf32>
    %455 = arith.addf %453, %454 : vector<8x128xf32>
    %456 = math.absf %434 : vector<8x128xf32>
    %cst_77 = arith.constant 1.000000e-30 : f32
    %457 = vector.broadcast %cst_77 : f32 to vector<8x128xf32>
    %458 = arith.cmpf olt, %456, %457 : vector<8x128xf32>
    %459 = arith.select %458, %23, %434 : vector<8x128xi1>, vector<8x128xf32>
    %460 = arith.subf %424, %357 : vector<8x128xf32>
    %cst_78 = arith.constant 2.000000e+00 : f32
    %461 = vector.broadcast %cst_78 : f32 to vector<8x128xf32>
    %462 = arith.mulf %461, %459 : vector<8x128xf32>
    %463 = arith.divf %460, %462 : vector<8x128xf32>
    %cst_79 = arith.constant 0.000000e+00 : f32
    %464 = vector.broadcast %cst_79 : f32 to vector<8x128xf32>
    %465 = arith.cmpf oge, %463, %464 : vector<8x128xf32>
    %cst_80 = arith.constant 1.000000e+00 : f32
    %cst_81 = arith.constant -1.000000e+00 : f32
    %466 = vector.broadcast %cst_80 : f32 to vector<8x128xf32>
    %467 = vector.broadcast %cst_81 : f32 to vector<8x128xf32>
    %468 = arith.select %465, %466, %467 : vector<8x128xi1>, vector<8x128xf32>
    %469 = math.absf %463 : vector<8x128xf32>
    %470 = arith.mulf %463, %463 : vector<8x128xf32>
    %cst_82 = arith.constant 1.000000e+00 : f32
    %471 = vector.broadcast %cst_82 : f32 to vector<8x128xf32>
    %472 = arith.addf %470, %471 : vector<8x128xf32>
    %473 = math.sqrt %472 : vector<8x128xf32>
    %474 = arith.addf %469, %473 : vector<8x128xf32>
    %475 = arith.divf %468, %474 : vector<8x128xf32>
    %476 = arith.select %458, %22, %475 : vector<8x128xi1>, vector<8x128xf32>
    %477 = arith.mulf %476, %476 : vector<8x128xf32>
    %cst_83 = arith.constant 1.000000e+00 : f32
    %478 = vector.broadcast %cst_83 : f32 to vector<8x128xf32>
    %479 = arith.addf %477, %478 : vector<8x128xf32>
    %480 = math.rsqrt %479 : vector<8x128xf32>
    %481 = arith.mulf %476, %480 : vector<8x128xf32>
    %482 = arith.mulf %480, %480 : vector<8x128xf32>
    %483 = arith.mulf %481, %481 : vector<8x128xf32>
    %484 = arith.mulf %480, %481 : vector<8x128xf32>
    %485 = arith.mulf %482, %357 : vector<8x128xf32>
    %cst_84 = arith.constant 2.000000e+00 : f32
    %486 = vector.broadcast %cst_84 : f32 to vector<8x128xf32>
    %487 = arith.mulf %486, %484 : vector<8x128xf32>
    %488 = arith.mulf %487, %434 : vector<8x128xf32>
    %489 = arith.subf %485, %488 : vector<8x128xf32>
    %490 = arith.mulf %483, %424 : vector<8x128xf32>
    %491 = arith.addf %489, %490 : vector<8x128xf32>
    %492 = arith.mulf %483, %357 : vector<8x128xf32>
    %cst_85 = arith.constant 2.000000e+00 : f32
    %493 = vector.broadcast %cst_85 : f32 to vector<8x128xf32>
    %494 = arith.mulf %493, %484 : vector<8x128xf32>
    %495 = arith.mulf %494, %434 : vector<8x128xf32>
    %496 = arith.addf %492, %495 : vector<8x128xf32>
    %497 = arith.mulf %482, %424 : vector<8x128xf32>
    %498 = arith.addf %496, %497 : vector<8x128xf32>
    %499 = arith.mulf %480, %437 : vector<8x128xf32>
    %500 = arith.mulf %481, %22 : vector<8x128xf32>
    %501 = arith.subf %499, %500 : vector<8x128xf32>
    %502 = arith.mulf %481, %437 : vector<8x128xf32>
    %503 = arith.mulf %480, %22 : vector<8x128xf32>
    %504 = arith.addf %502, %503 : vector<8x128xf32>
    %505 = arith.mulf %480, %373 : vector<8x128xf32>
    %506 = arith.mulf %481, %440 : vector<8x128xf32>
    %507 = arith.subf %505, %506 : vector<8x128xf32>
    %508 = arith.mulf %481, %373 : vector<8x128xf32>
    %509 = arith.mulf %480, %440 : vector<8x128xf32>
    %510 = arith.addf %508, %509 : vector<8x128xf32>
    %511 = arith.mulf %480, %379 : vector<8x128xf32>
    %512 = arith.mulf %481, %446 : vector<8x128xf32>
    %513 = arith.subf %511, %512 : vector<8x128xf32>
    %514 = arith.mulf %481, %379 : vector<8x128xf32>
    %515 = arith.mulf %480, %446 : vector<8x128xf32>
    %516 = arith.addf %514, %515 : vector<8x128xf32>
    %517 = arith.mulf %480, %385 : vector<8x128xf32>
    %518 = arith.mulf %481, %452 : vector<8x128xf32>
    %519 = arith.subf %517, %518 : vector<8x128xf32>
    %520 = arith.mulf %481, %385 : vector<8x128xf32>
    %521 = arith.mulf %480, %452 : vector<8x128xf32>
    %522 = arith.addf %520, %521 : vector<8x128xf32>
    %523 = math.absf %501 : vector<8x128xf32>
    %cst_86 = arith.constant 1.000000e-30 : f32
    %524 = vector.broadcast %cst_86 : f32 to vector<8x128xf32>
    %525 = arith.cmpf olt, %523, %524 : vector<8x128xf32>
    %526 = arith.select %525, %23, %501 : vector<8x128xi1>, vector<8x128xf32>
    %527 = arith.subf %431, %491 : vector<8x128xf32>
    %cst_87 = arith.constant 2.000000e+00 : f32
    %528 = vector.broadcast %cst_87 : f32 to vector<8x128xf32>
    %529 = arith.mulf %528, %526 : vector<8x128xf32>
    %530 = arith.divf %527, %529 : vector<8x128xf32>
    %cst_88 = arith.constant 0.000000e+00 : f32
    %531 = vector.broadcast %cst_88 : f32 to vector<8x128xf32>
    %532 = arith.cmpf oge, %530, %531 : vector<8x128xf32>
    %cst_89 = arith.constant 1.000000e+00 : f32
    %cst_90 = arith.constant -1.000000e+00 : f32
    %533 = vector.broadcast %cst_89 : f32 to vector<8x128xf32>
    %534 = vector.broadcast %cst_90 : f32 to vector<8x128xf32>
    %535 = arith.select %532, %533, %534 : vector<8x128xi1>, vector<8x128xf32>
    %536 = math.absf %530 : vector<8x128xf32>
    %537 = arith.mulf %530, %530 : vector<8x128xf32>
    %cst_91 = arith.constant 1.000000e+00 : f32
    %538 = vector.broadcast %cst_91 : f32 to vector<8x128xf32>
    %539 = arith.addf %537, %538 : vector<8x128xf32>
    %540 = math.sqrt %539 : vector<8x128xf32>
    %541 = arith.addf %536, %540 : vector<8x128xf32>
    %542 = arith.divf %535, %541 : vector<8x128xf32>
    %543 = arith.select %525, %22, %542 : vector<8x128xi1>, vector<8x128xf32>
    %544 = arith.mulf %543, %543 : vector<8x128xf32>
    %cst_92 = arith.constant 1.000000e+00 : f32
    %545 = vector.broadcast %cst_92 : f32 to vector<8x128xf32>
    %546 = arith.addf %544, %545 : vector<8x128xf32>
    %547 = math.rsqrt %546 : vector<8x128xf32>
    %548 = arith.mulf %543, %547 : vector<8x128xf32>
    %549 = arith.mulf %547, %547 : vector<8x128xf32>
    %550 = arith.mulf %548, %548 : vector<8x128xf32>
    %551 = arith.mulf %547, %548 : vector<8x128xf32>
    %552 = arith.mulf %549, %491 : vector<8x128xf32>
    %cst_93 = arith.constant 2.000000e+00 : f32
    %553 = vector.broadcast %cst_93 : f32 to vector<8x128xf32>
    %554 = arith.mulf %553, %551 : vector<8x128xf32>
    %555 = arith.mulf %554, %501 : vector<8x128xf32>
    %556 = arith.subf %552, %555 : vector<8x128xf32>
    %557 = arith.mulf %550, %431 : vector<8x128xf32>
    %558 = arith.addf %556, %557 : vector<8x128xf32>
    %559 = arith.mulf %550, %491 : vector<8x128xf32>
    %cst_94 = arith.constant 2.000000e+00 : f32
    %560 = vector.broadcast %cst_94 : f32 to vector<8x128xf32>
    %561 = arith.mulf %560, %551 : vector<8x128xf32>
    %562 = arith.mulf %561, %501 : vector<8x128xf32>
    %563 = arith.addf %559, %562 : vector<8x128xf32>
    %564 = arith.mulf %549, %431 : vector<8x128xf32>
    %565 = arith.addf %563, %564 : vector<8x128xf32>
    %566 = arith.mulf %547, %22 : vector<8x128xf32>
    %567 = arith.mulf %548, %504 : vector<8x128xf32>
    %568 = arith.subf %566, %567 : vector<8x128xf32>
    %569 = arith.mulf %548, %22 : vector<8x128xf32>
    %570 = arith.mulf %547, %504 : vector<8x128xf32>
    %571 = arith.addf %569, %570 : vector<8x128xf32>
    %572 = arith.mulf %547, %507 : vector<8x128xf32>
    %573 = arith.mulf %548, %443 : vector<8x128xf32>
    %574 = arith.subf %572, %573 : vector<8x128xf32>
    %575 = arith.mulf %548, %507 : vector<8x128xf32>
    %576 = arith.mulf %547, %443 : vector<8x128xf32>
    %577 = arith.addf %575, %576 : vector<8x128xf32>
    %578 = arith.mulf %547, %513 : vector<8x128xf32>
    %579 = arith.mulf %548, %449 : vector<8x128xf32>
    %580 = arith.subf %578, %579 : vector<8x128xf32>
    %581 = arith.mulf %548, %513 : vector<8x128xf32>
    %582 = arith.mulf %547, %449 : vector<8x128xf32>
    %583 = arith.addf %581, %582 : vector<8x128xf32>
    %584 = arith.mulf %547, %519 : vector<8x128xf32>
    %585 = arith.mulf %548, %455 : vector<8x128xf32>
    %586 = arith.subf %584, %585 : vector<8x128xf32>
    %587 = arith.mulf %548, %519 : vector<8x128xf32>
    %588 = arith.mulf %547, %455 : vector<8x128xf32>
    %589 = arith.addf %587, %588 : vector<8x128xf32>
    %590 = math.absf %571 : vector<8x128xf32>
    %cst_95 = arith.constant 1.000000e-30 : f32
    %591 = vector.broadcast %cst_95 : f32 to vector<8x128xf32>
    %592 = arith.cmpf olt, %590, %591 : vector<8x128xf32>
    %593 = arith.select %592, %23, %571 : vector<8x128xi1>, vector<8x128xf32>
    %594 = arith.subf %565, %498 : vector<8x128xf32>
    %cst_96 = arith.constant 2.000000e+00 : f32
    %595 = vector.broadcast %cst_96 : f32 to vector<8x128xf32>
    %596 = arith.mulf %595, %593 : vector<8x128xf32>
    %597 = arith.divf %594, %596 : vector<8x128xf32>
    %cst_97 = arith.constant 0.000000e+00 : f32
    %598 = vector.broadcast %cst_97 : f32 to vector<8x128xf32>
    %599 = arith.cmpf oge, %597, %598 : vector<8x128xf32>
    %cst_98 = arith.constant 1.000000e+00 : f32
    %cst_99 = arith.constant -1.000000e+00 : f32
    %600 = vector.broadcast %cst_98 : f32 to vector<8x128xf32>
    %601 = vector.broadcast %cst_99 : f32 to vector<8x128xf32>
    %602 = arith.select %599, %600, %601 : vector<8x128xi1>, vector<8x128xf32>
    %603 = math.absf %597 : vector<8x128xf32>
    %604 = arith.mulf %597, %597 : vector<8x128xf32>
    %cst_100 = arith.constant 1.000000e+00 : f32
    %605 = vector.broadcast %cst_100 : f32 to vector<8x128xf32>
    %606 = arith.addf %604, %605 : vector<8x128xf32>
    %607 = math.sqrt %606 : vector<8x128xf32>
    %608 = arith.addf %603, %607 : vector<8x128xf32>
    %609 = arith.divf %602, %608 : vector<8x128xf32>
    %610 = arith.select %592, %22, %609 : vector<8x128xi1>, vector<8x128xf32>
    %611 = arith.mulf %610, %610 : vector<8x128xf32>
    %cst_101 = arith.constant 1.000000e+00 : f32
    %612 = vector.broadcast %cst_101 : f32 to vector<8x128xf32>
    %613 = arith.addf %611, %612 : vector<8x128xf32>
    %614 = math.rsqrt %613 : vector<8x128xf32>
    %615 = arith.mulf %610, %614 : vector<8x128xf32>
    %616 = arith.mulf %614, %614 : vector<8x128xf32>
    %617 = arith.mulf %615, %615 : vector<8x128xf32>
    %618 = arith.mulf %614, %615 : vector<8x128xf32>
    %619 = arith.mulf %616, %498 : vector<8x128xf32>
    %cst_102 = arith.constant 2.000000e+00 : f32
    %620 = vector.broadcast %cst_102 : f32 to vector<8x128xf32>
    %621 = arith.mulf %620, %618 : vector<8x128xf32>
    %622 = arith.mulf %621, %571 : vector<8x128xf32>
    %623 = arith.subf %619, %622 : vector<8x128xf32>
    %624 = arith.mulf %617, %565 : vector<8x128xf32>
    %625 = arith.addf %623, %624 : vector<8x128xf32>
    %626 = arith.mulf %617, %498 : vector<8x128xf32>
    %cst_103 = arith.constant 2.000000e+00 : f32
    %627 = vector.broadcast %cst_103 : f32 to vector<8x128xf32>
    %628 = arith.mulf %627, %618 : vector<8x128xf32>
    %629 = arith.mulf %628, %571 : vector<8x128xf32>
    %630 = arith.addf %626, %629 : vector<8x128xf32>
    %631 = arith.mulf %616, %565 : vector<8x128xf32>
    %632 = arith.addf %630, %631 : vector<8x128xf32>
    %633 = arith.mulf %614, %568 : vector<8x128xf32>
    %634 = arith.mulf %615, %22 : vector<8x128xf32>
    %635 = arith.subf %633, %634 : vector<8x128xf32>
    %636 = arith.mulf %615, %568 : vector<8x128xf32>
    %637 = arith.mulf %614, %22 : vector<8x128xf32>
    %638 = arith.addf %636, %637 : vector<8x128xf32>
    %639 = arith.mulf %614, %510 : vector<8x128xf32>
    %640 = arith.mulf %615, %577 : vector<8x128xf32>
    %641 = arith.subf %639, %640 : vector<8x128xf32>
    %642 = arith.mulf %615, %510 : vector<8x128xf32>
    %643 = arith.mulf %614, %577 : vector<8x128xf32>
    %644 = arith.addf %642, %643 : vector<8x128xf32>
    %645 = arith.mulf %614, %516 : vector<8x128xf32>
    %646 = arith.mulf %615, %583 : vector<8x128xf32>
    %647 = arith.subf %645, %646 : vector<8x128xf32>
    %648 = arith.mulf %615, %516 : vector<8x128xf32>
    %649 = arith.mulf %614, %583 : vector<8x128xf32>
    %650 = arith.addf %648, %649 : vector<8x128xf32>
    %651 = arith.mulf %614, %522 : vector<8x128xf32>
    %652 = arith.mulf %615, %589 : vector<8x128xf32>
    %653 = arith.subf %651, %652 : vector<8x128xf32>
    %654 = arith.mulf %615, %522 : vector<8x128xf32>
    %655 = arith.mulf %614, %589 : vector<8x128xf32>
    %656 = arith.addf %654, %655 : vector<8x128xf32>
    %657 = math.absf %635 : vector<8x128xf32>
    %cst_104 = arith.constant 1.000000e-30 : f32
    %658 = vector.broadcast %cst_104 : f32 to vector<8x128xf32>
    %659 = arith.cmpf olt, %657, %658 : vector<8x128xf32>
    %660 = arith.select %659, %23, %635 : vector<8x128xi1>, vector<8x128xf32>
    %661 = arith.subf %625, %558 : vector<8x128xf32>
    %cst_105 = arith.constant 2.000000e+00 : f32
    %662 = vector.broadcast %cst_105 : f32 to vector<8x128xf32>
    %663 = arith.mulf %662, %660 : vector<8x128xf32>
    %664 = arith.divf %661, %663 : vector<8x128xf32>
    %cst_106 = arith.constant 0.000000e+00 : f32
    %665 = vector.broadcast %cst_106 : f32 to vector<8x128xf32>
    %666 = arith.cmpf oge, %664, %665 : vector<8x128xf32>
    %cst_107 = arith.constant 1.000000e+00 : f32
    %cst_108 = arith.constant -1.000000e+00 : f32
    %667 = vector.broadcast %cst_107 : f32 to vector<8x128xf32>
    %668 = vector.broadcast %cst_108 : f32 to vector<8x128xf32>
    %669 = arith.select %666, %667, %668 : vector<8x128xi1>, vector<8x128xf32>
    %670 = math.absf %664 : vector<8x128xf32>
    %671 = arith.mulf %664, %664 : vector<8x128xf32>
    %cst_109 = arith.constant 1.000000e+00 : f32
    %672 = vector.broadcast %cst_109 : f32 to vector<8x128xf32>
    %673 = arith.addf %671, %672 : vector<8x128xf32>
    %674 = math.sqrt %673 : vector<8x128xf32>
    %675 = arith.addf %670, %674 : vector<8x128xf32>
    %676 = arith.divf %669, %675 : vector<8x128xf32>
    %677 = arith.select %659, %22, %676 : vector<8x128xi1>, vector<8x128xf32>
    %678 = arith.mulf %677, %677 : vector<8x128xf32>
    %cst_110 = arith.constant 1.000000e+00 : f32
    %679 = vector.broadcast %cst_110 : f32 to vector<8x128xf32>
    %680 = arith.addf %678, %679 : vector<8x128xf32>
    %681 = math.rsqrt %680 : vector<8x128xf32>
    %682 = arith.mulf %677, %681 : vector<8x128xf32>
    %683 = arith.mulf %681, %681 : vector<8x128xf32>
    %684 = arith.mulf %682, %682 : vector<8x128xf32>
    %685 = arith.mulf %681, %682 : vector<8x128xf32>
    %686 = arith.mulf %683, %558 : vector<8x128xf32>
    %cst_111 = arith.constant 2.000000e+00 : f32
    %687 = vector.broadcast %cst_111 : f32 to vector<8x128xf32>
    %688 = arith.mulf %687, %685 : vector<8x128xf32>
    %689 = arith.mulf %688, %635 : vector<8x128xf32>
    %690 = arith.subf %686, %689 : vector<8x128xf32>
    %691 = arith.mulf %684, %625 : vector<8x128xf32>
    %692 = arith.addf %690, %691 : vector<8x128xf32>
    %693 = arith.mulf %684, %558 : vector<8x128xf32>
    %cst_112 = arith.constant 2.000000e+00 : f32
    %694 = vector.broadcast %cst_112 : f32 to vector<8x128xf32>
    %695 = arith.mulf %694, %685 : vector<8x128xf32>
    %696 = arith.mulf %695, %635 : vector<8x128xf32>
    %697 = arith.addf %693, %696 : vector<8x128xf32>
    %698 = arith.mulf %683, %625 : vector<8x128xf32>
    %699 = arith.addf %697, %698 : vector<8x128xf32>
    %700 = arith.mulf %681, %638 : vector<8x128xf32>
    %701 = arith.mulf %682, %22 : vector<8x128xf32>
    %702 = arith.subf %700, %701 : vector<8x128xf32>
    %703 = arith.mulf %682, %638 : vector<8x128xf32>
    %704 = arith.mulf %681, %22 : vector<8x128xf32>
    %705 = arith.addf %703, %704 : vector<8x128xf32>
    %706 = arith.mulf %681, %574 : vector<8x128xf32>
    %707 = arith.mulf %682, %641 : vector<8x128xf32>
    %708 = arith.subf %706, %707 : vector<8x128xf32>
    %709 = arith.mulf %682, %574 : vector<8x128xf32>
    %710 = arith.mulf %681, %641 : vector<8x128xf32>
    %711 = arith.addf %709, %710 : vector<8x128xf32>
    %712 = arith.mulf %681, %580 : vector<8x128xf32>
    %713 = arith.mulf %682, %647 : vector<8x128xf32>
    %714 = arith.subf %712, %713 : vector<8x128xf32>
    %715 = arith.mulf %682, %580 : vector<8x128xf32>
    %716 = arith.mulf %681, %647 : vector<8x128xf32>
    %717 = arith.addf %715, %716 : vector<8x128xf32>
    %718 = arith.mulf %681, %586 : vector<8x128xf32>
    %719 = arith.mulf %682, %653 : vector<8x128xf32>
    %720 = arith.subf %718, %719 : vector<8x128xf32>
    %721 = arith.mulf %682, %586 : vector<8x128xf32>
    %722 = arith.mulf %681, %653 : vector<8x128xf32>
    %723 = arith.addf %721, %722 : vector<8x128xf32>
    %724 = math.absf %702 : vector<8x128xf32>
    %cst_113 = arith.constant 1.000000e-30 : f32
    %725 = vector.broadcast %cst_113 : f32 to vector<8x128xf32>
    %726 = arith.cmpf olt, %724, %725 : vector<8x128xf32>
    %727 = arith.select %726, %23, %702 : vector<8x128xi1>, vector<8x128xf32>
    %728 = arith.subf %632, %692 : vector<8x128xf32>
    %cst_114 = arith.constant 2.000000e+00 : f32
    %729 = vector.broadcast %cst_114 : f32 to vector<8x128xf32>
    %730 = arith.mulf %729, %727 : vector<8x128xf32>
    %731 = arith.divf %728, %730 : vector<8x128xf32>
    %cst_115 = arith.constant 0.000000e+00 : f32
    %732 = vector.broadcast %cst_115 : f32 to vector<8x128xf32>
    %733 = arith.cmpf oge, %731, %732 : vector<8x128xf32>
    %cst_116 = arith.constant 1.000000e+00 : f32
    %cst_117 = arith.constant -1.000000e+00 : f32
    %734 = vector.broadcast %cst_116 : f32 to vector<8x128xf32>
    %735 = vector.broadcast %cst_117 : f32 to vector<8x128xf32>
    %736 = arith.select %733, %734, %735 : vector<8x128xi1>, vector<8x128xf32>
    %737 = math.absf %731 : vector<8x128xf32>
    %738 = arith.mulf %731, %731 : vector<8x128xf32>
    %cst_118 = arith.constant 1.000000e+00 : f32
    %739 = vector.broadcast %cst_118 : f32 to vector<8x128xf32>
    %740 = arith.addf %738, %739 : vector<8x128xf32>
    %741 = math.sqrt %740 : vector<8x128xf32>
    %742 = arith.addf %737, %741 : vector<8x128xf32>
    %743 = arith.divf %736, %742 : vector<8x128xf32>
    %744 = arith.select %726, %22, %743 : vector<8x128xi1>, vector<8x128xf32>
    %745 = arith.mulf %744, %744 : vector<8x128xf32>
    %cst_119 = arith.constant 1.000000e+00 : f32
    %746 = vector.broadcast %cst_119 : f32 to vector<8x128xf32>
    %747 = arith.addf %745, %746 : vector<8x128xf32>
    %748 = math.rsqrt %747 : vector<8x128xf32>
    %749 = arith.mulf %744, %748 : vector<8x128xf32>
    %750 = arith.mulf %748, %748 : vector<8x128xf32>
    %751 = arith.mulf %749, %749 : vector<8x128xf32>
    %752 = arith.mulf %748, %749 : vector<8x128xf32>
    %753 = arith.mulf %750, %692 : vector<8x128xf32>
    %cst_120 = arith.constant 2.000000e+00 : f32
    %754 = vector.broadcast %cst_120 : f32 to vector<8x128xf32>
    %755 = arith.mulf %754, %752 : vector<8x128xf32>
    %756 = arith.mulf %755, %702 : vector<8x128xf32>
    %757 = arith.subf %753, %756 : vector<8x128xf32>
    %758 = arith.mulf %751, %632 : vector<8x128xf32>
    %759 = arith.addf %757, %758 : vector<8x128xf32>
    %760 = arith.mulf %751, %692 : vector<8x128xf32>
    %cst_121 = arith.constant 2.000000e+00 : f32
    %761 = vector.broadcast %cst_121 : f32 to vector<8x128xf32>
    %762 = arith.mulf %761, %752 : vector<8x128xf32>
    %763 = arith.mulf %762, %702 : vector<8x128xf32>
    %764 = arith.addf %760, %763 : vector<8x128xf32>
    %765 = arith.mulf %750, %632 : vector<8x128xf32>
    %766 = arith.addf %764, %765 : vector<8x128xf32>
    %767 = arith.mulf %749, %22 : vector<8x128xf32>
    %768 = arith.mulf %748, %705 : vector<8x128xf32>
    %769 = arith.addf %767, %768 : vector<8x128xf32>
    %770 = arith.mulf %748, %708 : vector<8x128xf32>
    %771 = arith.mulf %749, %644 : vector<8x128xf32>
    %772 = arith.subf %770, %771 : vector<8x128xf32>
    %773 = arith.mulf %749, %708 : vector<8x128xf32>
    %774 = arith.mulf %748, %644 : vector<8x128xf32>
    %775 = arith.addf %773, %774 : vector<8x128xf32>
    %776 = arith.mulf %748, %714 : vector<8x128xf32>
    %777 = arith.mulf %749, %650 : vector<8x128xf32>
    %778 = arith.subf %776, %777 : vector<8x128xf32>
    %779 = arith.mulf %749, %714 : vector<8x128xf32>
    %780 = arith.mulf %748, %650 : vector<8x128xf32>
    %781 = arith.addf %779, %780 : vector<8x128xf32>
    %782 = arith.mulf %748, %720 : vector<8x128xf32>
    %783 = arith.mulf %749, %656 : vector<8x128xf32>
    %784 = arith.subf %782, %783 : vector<8x128xf32>
    %785 = arith.mulf %749, %720 : vector<8x128xf32>
    %786 = arith.mulf %748, %656 : vector<8x128xf32>
    %787 = arith.addf %785, %786 : vector<8x128xf32>
    %788 = math.absf %769 : vector<8x128xf32>
    %cst_122 = arith.constant 1.000000e-30 : f32
    %789 = vector.broadcast %cst_122 : f32 to vector<8x128xf32>
    %790 = arith.cmpf olt, %788, %789 : vector<8x128xf32>
    %791 = arith.select %790, %23, %769 : vector<8x128xi1>, vector<8x128xf32>
    %792 = arith.subf %766, %699 : vector<8x128xf32>
    %cst_123 = arith.constant 2.000000e+00 : f32
    %793 = vector.broadcast %cst_123 : f32 to vector<8x128xf32>
    %794 = arith.mulf %793, %791 : vector<8x128xf32>
    %795 = arith.divf %792, %794 : vector<8x128xf32>
    %cst_124 = arith.constant 0.000000e+00 : f32
    %796 = vector.broadcast %cst_124 : f32 to vector<8x128xf32>
    %797 = arith.cmpf oge, %795, %796 : vector<8x128xf32>
    %cst_125 = arith.constant 1.000000e+00 : f32
    %cst_126 = arith.constant -1.000000e+00 : f32
    %798 = vector.broadcast %cst_125 : f32 to vector<8x128xf32>
    %799 = vector.broadcast %cst_126 : f32 to vector<8x128xf32>
    %800 = arith.select %797, %798, %799 : vector<8x128xi1>, vector<8x128xf32>
    %801 = math.absf %795 : vector<8x128xf32>
    %802 = arith.mulf %795, %795 : vector<8x128xf32>
    %cst_127 = arith.constant 1.000000e+00 : f32
    %803 = vector.broadcast %cst_127 : f32 to vector<8x128xf32>
    %804 = arith.addf %802, %803 : vector<8x128xf32>
    %805 = math.sqrt %804 : vector<8x128xf32>
    %806 = arith.addf %801, %805 : vector<8x128xf32>
    %807 = arith.divf %800, %806 : vector<8x128xf32>
    %808 = arith.select %790, %22, %807 : vector<8x128xi1>, vector<8x128xf32>
    %809 = arith.mulf %808, %808 : vector<8x128xf32>
    %cst_128 = arith.constant 1.000000e+00 : f32
    %810 = vector.broadcast %cst_128 : f32 to vector<8x128xf32>
    %811 = arith.addf %809, %810 : vector<8x128xf32>
    %812 = math.rsqrt %811 : vector<8x128xf32>
    %813 = arith.mulf %808, %812 : vector<8x128xf32>
    %814 = arith.mulf %812, %812 : vector<8x128xf32>
    %815 = arith.mulf %813, %813 : vector<8x128xf32>
    %816 = arith.mulf %812, %813 : vector<8x128xf32>
    %817 = arith.mulf %814, %699 : vector<8x128xf32>
    %cst_129 = arith.constant 2.000000e+00 : f32
    %818 = vector.broadcast %cst_129 : f32 to vector<8x128xf32>
    %819 = arith.mulf %818, %816 : vector<8x128xf32>
    %820 = arith.mulf %819, %769 : vector<8x128xf32>
    %821 = arith.subf %817, %820 : vector<8x128xf32>
    %822 = arith.mulf %815, %766 : vector<8x128xf32>
    %823 = arith.addf %821, %822 : vector<8x128xf32>
    %824 = arith.mulf %815, %699 : vector<8x128xf32>
    %cst_130 = arith.constant 2.000000e+00 : f32
    %825 = vector.broadcast %cst_130 : f32 to vector<8x128xf32>
    %826 = arith.mulf %825, %816 : vector<8x128xf32>
    %827 = arith.mulf %826, %769 : vector<8x128xf32>
    %828 = arith.addf %824, %827 : vector<8x128xf32>
    %829 = arith.mulf %814, %766 : vector<8x128xf32>
    %830 = arith.addf %828, %829 : vector<8x128xf32>
    %831 = arith.mulf %812, %711 : vector<8x128xf32>
    %832 = arith.mulf %813, %775 : vector<8x128xf32>
    %833 = arith.subf %831, %832 : vector<8x128xf32>
    %834 = arith.mulf %813, %711 : vector<8x128xf32>
    %835 = arith.mulf %812, %775 : vector<8x128xf32>
    %836 = arith.addf %834, %835 : vector<8x128xf32>
    %837 = arith.mulf %812, %717 : vector<8x128xf32>
    %838 = arith.mulf %813, %781 : vector<8x128xf32>
    %839 = arith.subf %837, %838 : vector<8x128xf32>
    %840 = arith.mulf %813, %717 : vector<8x128xf32>
    %841 = arith.mulf %812, %781 : vector<8x128xf32>
    %842 = arith.addf %840, %841 : vector<8x128xf32>
    %843 = arith.mulf %812, %723 : vector<8x128xf32>
    %844 = arith.mulf %813, %787 : vector<8x128xf32>
    %845 = arith.subf %843, %844 : vector<8x128xf32>
    %846 = arith.mulf %813, %723 : vector<8x128xf32>
    %847 = arith.mulf %812, %787 : vector<8x128xf32>
    %848 = arith.addf %846, %847 : vector<8x128xf32>
    %cst_131 = arith.constant 0.000000e+00 : f32
    %849 = vector.broadcast %cst_131 : f32 to vector<8x128xf32>
    %850 = arith.maximumf %759, %849 : vector<8x128xf32>
    %cst_132 = arith.constant 0.000000e+00 : f32
    %851 = vector.broadcast %cst_132 : f32 to vector<8x128xf32>
    %852 = arith.maximumf %823, %851 : vector<8x128xf32>
    %cst_133 = arith.constant 0.000000e+00 : f32
    %853 = vector.broadcast %cst_133 : f32 to vector<8x128xf32>
    %854 = arith.maximumf %830, %853 : vector<8x128xf32>
    %cst_134 = arith.constant 1.000000e-30 : f32
    %855 = vector.broadcast %cst_134 : f32 to vector<8x128xf32>
    %856 = arith.maximumf %850, %855 : vector<8x128xf32>
    %857 = math.rsqrt %856 : vector<8x128xf32>
    %cst_135 = arith.constant 1.000000e-30 : f32
    %858 = vector.broadcast %cst_135 : f32 to vector<8x128xf32>
    %859 = arith.maximumf %852, %858 : vector<8x128xf32>
    %860 = math.rsqrt %859 : vector<8x128xf32>
    %cst_136 = arith.constant 1.000000e-30 : f32
    %861 = vector.broadcast %cst_136 : f32 to vector<8x128xf32>
    %862 = arith.maximumf %854, %861 : vector<8x128xf32>
    %863 = math.rsqrt %862 : vector<8x128xf32>
    %864 = arith.mulf %850, %857 : vector<8x128xf32>
    %865 = arith.mulf %852, %860 : vector<8x128xf32>
    %866 = arith.mulf %854, %863 : vector<8x128xf32>
    %867 = arith.mulf %5, %772 : vector<8x128xf32>
    %868 = arith.mulf %7, %778 : vector<8x128xf32>
    %869 = arith.addf %867, %868 : vector<8x128xf32>
    %870 = arith.mulf %9, %784 : vector<8x128xf32>
    %871 = arith.addf %869, %870 : vector<8x128xf32>
    %872 = arith.mulf %871, %857 : vector<8x128xf32>
    %873 = arith.mulf %5, %833 : vector<8x128xf32>
    %874 = arith.mulf %7, %839 : vector<8x128xf32>
    %875 = arith.addf %873, %874 : vector<8x128xf32>
    %876 = arith.mulf %9, %845 : vector<8x128xf32>
    %877 = arith.addf %875, %876 : vector<8x128xf32>
    %878 = arith.mulf %877, %860 : vector<8x128xf32>
    %879 = arith.mulf %5, %836 : vector<8x128xf32>
    %880 = arith.mulf %7, %842 : vector<8x128xf32>
    %881 = arith.addf %879, %880 : vector<8x128xf32>
    %882 = arith.mulf %9, %848 : vector<8x128xf32>
    %883 = arith.addf %881, %882 : vector<8x128xf32>
    %884 = arith.mulf %883, %863 : vector<8x128xf32>
    %885 = arith.mulf %11, %772 : vector<8x128xf32>
    %886 = arith.mulf %13, %778 : vector<8x128xf32>
    %887 = arith.addf %885, %886 : vector<8x128xf32>
    %888 = arith.mulf %15, %784 : vector<8x128xf32>
    %889 = arith.addf %887, %888 : vector<8x128xf32>
    %890 = arith.mulf %889, %857 : vector<8x128xf32>
    %891 = arith.mulf %11, %833 : vector<8x128xf32>
    %892 = arith.mulf %13, %839 : vector<8x128xf32>
    %893 = arith.addf %891, %892 : vector<8x128xf32>
    %894 = arith.mulf %15, %845 : vector<8x128xf32>
    %895 = arith.addf %893, %894 : vector<8x128xf32>
    %896 = arith.mulf %895, %860 : vector<8x128xf32>
    %897 = arith.mulf %11, %836 : vector<8x128xf32>
    %898 = arith.mulf %13, %842 : vector<8x128xf32>
    %899 = arith.addf %897, %898 : vector<8x128xf32>
    %900 = arith.mulf %15, %848 : vector<8x128xf32>
    %901 = arith.addf %899, %900 : vector<8x128xf32>
    %902 = arith.mulf %901, %863 : vector<8x128xf32>
    %903 = arith.mulf %17, %772 : vector<8x128xf32>
    %904 = arith.mulf %19, %778 : vector<8x128xf32>
    %905 = arith.addf %903, %904 : vector<8x128xf32>
    %906 = arith.mulf %21, %784 : vector<8x128xf32>
    %907 = arith.addf %905, %906 : vector<8x128xf32>
    %908 = arith.mulf %907, %857 : vector<8x128xf32>
    %909 = arith.mulf %17, %833 : vector<8x128xf32>
    %910 = arith.mulf %19, %839 : vector<8x128xf32>
    %911 = arith.addf %909, %910 : vector<8x128xf32>
    %912 = arith.mulf %21, %845 : vector<8x128xf32>
    %913 = arith.addf %911, %912 : vector<8x128xf32>
    %914 = arith.mulf %913, %860 : vector<8x128xf32>
    %915 = arith.mulf %17, %836 : vector<8x128xf32>
    %916 = arith.mulf %19, %842 : vector<8x128xf32>
    %917 = arith.addf %915, %916 : vector<8x128xf32>
    %918 = arith.mulf %21, %848 : vector<8x128xf32>
    %919 = arith.addf %917, %918 : vector<8x128xf32>
    %920 = arith.mulf %919, %863 : vector<8x128xf32>
    %cst_137 = arith.constant 0.00999999977 : f32
    %921 = vector.broadcast %cst_137 : f32 to vector<8x128xf32>
    %922 = arith.maximumf %864, %921 : vector<8x128xf32>
    %cst_138 = arith.constant 0.00999999977 : f32
    %923 = vector.broadcast %cst_138 : f32 to vector<8x128xf32>
    %924 = arith.maximumf %865, %923 : vector<8x128xf32>
    %cst_139 = arith.constant 0.00999999977 : f32
    %925 = vector.broadcast %cst_139 : f32 to vector<8x128xf32>
    %926 = arith.maximumf %866, %925 : vector<8x128xf32>
    %927 = math.log %922 : vector<8x128xf32>
    %928 = math.log %924 : vector<8x128xf32>
    %929 = math.log %926 : vector<8x128xf32>
    %930 = arith.addf %927, %928 : vector<8x128xf32>
    %931 = arith.addf %930, %929 : vector<8x128xf32>
    %cst_140 = arith.constant 0.333333343 : f32
    %932 = vector.broadcast %cst_140 : f32 to vector<8x128xf32>
    %933 = arith.mulf %931, %932 : vector<8x128xf32>
    %934 = arith.subf %927, %933 : vector<8x128xf32>
    %935 = arith.subf %928, %933 : vector<8x128xf32>
    %936 = arith.subf %929, %933 : vector<8x128xf32>
    %937 = arith.mulf %934, %934 : vector<8x128xf32>
    %938 = arith.mulf %935, %935 : vector<8x128xf32>
    %939 = arith.addf %937, %938 : vector<8x128xf32>
    %940 = arith.mulf %936, %936 : vector<8x128xf32>
    %941 = arith.addf %939, %940 : vector<8x128xf32>
    %942 = math.sqrt %941 : vector<8x128xf32>
    %cst_141 = arith.constant 9.99999974E-6 : f32
    %943 = vector.broadcast %cst_141 : f32 to vector<8x128xf32>
    %944 = arith.addf %942, %943 : vector<8x128xf32>
    %945 = vector.broadcast %0 : f32 to vector<8x128xf32>
    %946 = arith.subf %944, %945 : vector<8x128xf32>
    %947 = arith.divf %946, %944 : vector<8x128xf32>
    %cst_142 = arith.constant 0.000000e+00 : f32
    %948 = vector.broadcast %cst_142 : f32 to vector<8x128xf32>
    %949 = arith.cmpf ogt, %946, %948 : vector<8x128xf32>
    %950 = arith.mulf %947, %934 : vector<8x128xf32>
    %951 = arith.subf %927, %950 : vector<8x128xf32>
    %952 = math.exp %951 : vector<8x128xf32>
    %953 = arith.select %949, %952, %922 : vector<8x128xi1>, vector<8x128xf32>
    %954 = arith.mulf %947, %935 : vector<8x128xf32>
    %955 = arith.subf %928, %954 : vector<8x128xf32>
    %956 = math.exp %955 : vector<8x128xf32>
    %957 = arith.select %949, %956, %924 : vector<8x128xi1>, vector<8x128xf32>
    %958 = arith.mulf %947, %936 : vector<8x128xf32>
    %959 = arith.subf %929, %958 : vector<8x128xf32>
    %960 = math.exp %959 : vector<8x128xf32>
    %961 = arith.select %949, %960, %926 : vector<8x128xi1>, vector<8x128xf32>
    %cst_143 = arith.constant -2.99573231 : f32
    %962 = vector.broadcast %cst_143 : f32 to vector<8x128xf32>
    %963 = arith.maximumf %927, %962 : vector<8x128xf32>
    %cst_144 = arith.constant -2.99573231 : f32
    %964 = vector.broadcast %cst_144 : f32 to vector<8x128xf32>
    %965 = arith.maximumf %928, %964 : vector<8x128xf32>
    %cst_145 = arith.constant -2.99573231 : f32
    %966 = vector.broadcast %cst_145 : f32 to vector<8x128xf32>
    %967 = arith.maximumf %929, %966 : vector<8x128xf32>
    %968 = arith.addf %963, %965 : vector<8x128xf32>
    %969 = arith.addf %968, %967 : vector<8x128xf32>
    %cst_146 = arith.constant 0.333333343 : f32
    %970 = vector.broadcast %cst_146 : f32 to vector<8x128xf32>
    %971 = arith.mulf %969, %970 : vector<8x128xf32>
    %972 = arith.subf %963, %971 : vector<8x128xf32>
    %973 = arith.subf %965, %971 : vector<8x128xf32>
    %974 = arith.subf %967, %971 : vector<8x128xf32>
    %975 = arith.mulf %972, %972 : vector<8x128xf32>
    %976 = arith.mulf %973, %973 : vector<8x128xf32>
    %977 = arith.addf %975, %976 : vector<8x128xf32>
    %978 = arith.mulf %974, %974 : vector<8x128xf32>
    %979 = arith.addf %977, %978 : vector<8x128xf32>
    %980 = math.rsqrt %979 : vector<8x128xf32>
    %981 = arith.mulf %979, %980 : vector<8x128xf32>
    %982 = vector.broadcast %3 : f32 to vector<8x128xf32>
    %983 = arith.subf %969, %982 : vector<8x128xf32>
    %984 = vector.broadcast %1 : f32 to vector<8x128xf32>
    %985 = arith.mulf %984, %983 : vector<8x128xf32>
    %986 = arith.addf %981, %985 : vector<8x128xf32>
    %cst_147 = arith.constant 0.000000e+00 : f32
    %987 = vector.broadcast %cst_147 : f32 to vector<8x128xf32>
    %988 = arith.maximumf %986, %987 : vector<8x128xf32>
    %989 = arith.mulf %988, %980 : vector<8x128xf32>
    %cst_148 = arith.constant 0.000000e+00 : f32
    %990 = vector.broadcast %cst_148 : f32 to vector<8x128xf32>
    %991 = arith.cmpf olt, %983, %990 : vector<8x128xf32>
    %992 = arith.mulf %989, %972 : vector<8x128xf32>
    %993 = arith.subf %963, %992 : vector<8x128xf32>
    %994 = vector.broadcast %2 : f32 to vector<8x128xf32>
    %995 = arith.select %991, %993, %994 : vector<8x128xi1>, vector<8x128xf32>
    %996 = math.exp %995 : vector<8x128xf32>
    %997 = arith.mulf %989, %973 : vector<8x128xf32>
    %998 = arith.subf %965, %997 : vector<8x128xf32>
    %999 = vector.broadcast %2 : f32 to vector<8x128xf32>
    %1000 = arith.select %991, %998, %999 : vector<8x128xi1>, vector<8x128xf32>
    %1001 = math.exp %1000 : vector<8x128xf32>
    %1002 = arith.mulf %989, %974 : vector<8x128xf32>
    %1003 = arith.subf %967, %1002 : vector<8x128xf32>
    %1004 = vector.broadcast %2 : f32 to vector<8x128xf32>
    %1005 = arith.select %991, %1003, %1004 : vector<8x128xi1>, vector<8x128xf32>
    %1006 = math.exp %1005 : vector<8x128xf32>
    %1007 = arith.mulf %872, %953 : vector<8x128xf32>
    %1008 = arith.mulf %878, %957 : vector<8x128xf32>
    %1009 = arith.mulf %884, %961 : vector<8x128xf32>
    %1010 = arith.mulf %890, %953 : vector<8x128xf32>
    %1011 = arith.mulf %896, %957 : vector<8x128xf32>
    %1012 = arith.mulf %902, %961 : vector<8x128xf32>
    %1013 = arith.mulf %908, %953 : vector<8x128xf32>
    %1014 = arith.mulf %914, %957 : vector<8x128xf32>
    %1015 = arith.mulf %920, %961 : vector<8x128xf32>
    %1016 = arith.mulf %1007, %772 : vector<8x128xf32>
    %1017 = arith.mulf %1008, %833 : vector<8x128xf32>
    %1018 = arith.addf %1016, %1017 : vector<8x128xf32>
    %1019 = arith.mulf %1009, %836 : vector<8x128xf32>
    %1020 = arith.addf %1018, %1019 : vector<8x128xf32>
    %1021 = arith.mulf %1007, %778 : vector<8x128xf32>
    %1022 = arith.mulf %1008, %839 : vector<8x128xf32>
    %1023 = arith.addf %1021, %1022 : vector<8x128xf32>
    %1024 = arith.mulf %1009, %842 : vector<8x128xf32>
    %1025 = arith.addf %1023, %1024 : vector<8x128xf32>
    %1026 = arith.mulf %1007, %784 : vector<8x128xf32>
    %1027 = arith.mulf %1008, %845 : vector<8x128xf32>
    %1028 = arith.addf %1026, %1027 : vector<8x128xf32>
    %1029 = arith.mulf %1009, %848 : vector<8x128xf32>
    %1030 = arith.addf %1028, %1029 : vector<8x128xf32>
    %1031 = arith.mulf %1010, %772 : vector<8x128xf32>
    %1032 = arith.mulf %1011, %833 : vector<8x128xf32>
    %1033 = arith.addf %1031, %1032 : vector<8x128xf32>
    %1034 = arith.mulf %1012, %836 : vector<8x128xf32>
    %1035 = arith.addf %1033, %1034 : vector<8x128xf32>
    %1036 = arith.mulf %1010, %778 : vector<8x128xf32>
    %1037 = arith.mulf %1011, %839 : vector<8x128xf32>
    %1038 = arith.addf %1036, %1037 : vector<8x128xf32>
    %1039 = arith.mulf %1012, %842 : vector<8x128xf32>
    %1040 = arith.addf %1038, %1039 : vector<8x128xf32>
    %1041 = arith.mulf %1010, %784 : vector<8x128xf32>
    %1042 = arith.mulf %1011, %845 : vector<8x128xf32>
    %1043 = arith.addf %1041, %1042 : vector<8x128xf32>
    %1044 = arith.mulf %1012, %848 : vector<8x128xf32>
    %1045 = arith.addf %1043, %1044 : vector<8x128xf32>
    %1046 = arith.mulf %1013, %772 : vector<8x128xf32>
    %1047 = arith.mulf %1014, %833 : vector<8x128xf32>
    %1048 = arith.addf %1046, %1047 : vector<8x128xf32>
    %1049 = arith.mulf %1015, %836 : vector<8x128xf32>
    %1050 = arith.addf %1048, %1049 : vector<8x128xf32>
    %1051 = arith.mulf %1013, %778 : vector<8x128xf32>
    %1052 = arith.mulf %1014, %839 : vector<8x128xf32>
    %1053 = arith.addf %1051, %1052 : vector<8x128xf32>
    %1054 = arith.mulf %1015, %842 : vector<8x128xf32>
    %1055 = arith.addf %1053, %1054 : vector<8x128xf32>
    %1056 = arith.mulf %1013, %784 : vector<8x128xf32>
    %1057 = arith.mulf %1014, %845 : vector<8x128xf32>
    %1058 = arith.addf %1056, %1057 : vector<8x128xf32>
    %1059 = arith.mulf %1015, %848 : vector<8x128xf32>
    %1060 = arith.addf %1058, %1059 : vector<8x128xf32>
    %1061 = arith.mulf %872, %996 : vector<8x128xf32>
    %1062 = arith.mulf %878, %1001 : vector<8x128xf32>
    %1063 = arith.mulf %884, %1006 : vector<8x128xf32>
    %1064 = arith.mulf %890, %996 : vector<8x128xf32>
    %1065 = arith.mulf %896, %1001 : vector<8x128xf32>
    %1066 = arith.mulf %902, %1006 : vector<8x128xf32>
    %1067 = arith.mulf %908, %996 : vector<8x128xf32>
    %1068 = arith.mulf %914, %1001 : vector<8x128xf32>
    %1069 = arith.mulf %920, %1006 : vector<8x128xf32>
    %1070 = arith.mulf %1061, %772 : vector<8x128xf32>
    %1071 = arith.mulf %1062, %833 : vector<8x128xf32>
    %1072 = arith.addf %1070, %1071 : vector<8x128xf32>
    %1073 = arith.mulf %1063, %836 : vector<8x128xf32>
    %1074 = arith.addf %1072, %1073 : vector<8x128xf32>
    %1075 = arith.mulf %1061, %778 : vector<8x128xf32>
    %1076 = arith.mulf %1062, %839 : vector<8x128xf32>
    %1077 = arith.addf %1075, %1076 : vector<8x128xf32>
    %1078 = arith.mulf %1063, %842 : vector<8x128xf32>
    %1079 = arith.addf %1077, %1078 : vector<8x128xf32>
    %1080 = arith.mulf %1061, %784 : vector<8x128xf32>
    %1081 = arith.mulf %1062, %845 : vector<8x128xf32>
    %1082 = arith.addf %1080, %1081 : vector<8x128xf32>
    %1083 = arith.mulf %1063, %848 : vector<8x128xf32>
    %1084 = arith.addf %1082, %1083 : vector<8x128xf32>
    %1085 = arith.mulf %1064, %772 : vector<8x128xf32>
    %1086 = arith.mulf %1065, %833 : vector<8x128xf32>
    %1087 = arith.addf %1085, %1086 : vector<8x128xf32>
    %1088 = arith.mulf %1066, %836 : vector<8x128xf32>
    %1089 = arith.addf %1087, %1088 : vector<8x128xf32>
    %1090 = arith.mulf %1064, %778 : vector<8x128xf32>
    %1091 = arith.mulf %1065, %839 : vector<8x128xf32>
    %1092 = arith.addf %1090, %1091 : vector<8x128xf32>
    %1093 = arith.mulf %1066, %842 : vector<8x128xf32>
    %1094 = arith.addf %1092, %1093 : vector<8x128xf32>
    %1095 = arith.mulf %1064, %784 : vector<8x128xf32>
    %1096 = arith.mulf %1065, %845 : vector<8x128xf32>
    %1097 = arith.addf %1095, %1096 : vector<8x128xf32>
    %1098 = arith.mulf %1066, %848 : vector<8x128xf32>
    %1099 = arith.addf %1097, %1098 : vector<8x128xf32>
    %1100 = arith.mulf %1067, %772 : vector<8x128xf32>
    %1101 = arith.mulf %1068, %833 : vector<8x128xf32>
    %1102 = arith.addf %1100, %1101 : vector<8x128xf32>
    %1103 = arith.mulf %1069, %836 : vector<8x128xf32>
    %1104 = arith.addf %1102, %1103 : vector<8x128xf32>
    %1105 = arith.mulf %1067, %778 : vector<8x128xf32>
    %1106 = arith.mulf %1068, %839 : vector<8x128xf32>
    %1107 = arith.addf %1105, %1106 : vector<8x128xf32>
    %1108 = arith.mulf %1069, %842 : vector<8x128xf32>
    %1109 = arith.addf %1107, %1108 : vector<8x128xf32>
    %1110 = arith.mulf %1067, %784 : vector<8x128xf32>
    %1111 = arith.mulf %1068, %845 : vector<8x128xf32>
    %1112 = arith.addf %1110, %1111 : vector<8x128xf32>
    %1113 = arith.mulf %1069, %848 : vector<8x128xf32>
    %1114 = arith.addf %1112, %1113 : vector<8x128xf32>
    %1115 = arith.mulf %13, %21 : vector<8x128xf32>
    %1116 = arith.mulf %15, %19 : vector<8x128xf32>
    %1117 = arith.subf %1115, %1116 : vector<8x128xf32>
    %1118 = arith.mulf %5, %1117 : vector<8x128xf32>
    %1119 = arith.mulf %11, %21 : vector<8x128xf32>
    %1120 = arith.mulf %15, %17 : vector<8x128xf32>
    %1121 = arith.subf %1119, %1120 : vector<8x128xf32>
    %1122 = arith.mulf %7, %1121 : vector<8x128xf32>
    %1123 = arith.subf %1118, %1122 : vector<8x128xf32>
    %1124 = arith.mulf %11, %19 : vector<8x128xf32>
    %1125 = arith.mulf %13, %17 : vector<8x128xf32>
    %1126 = arith.subf %1124, %1125 : vector<8x128xf32>
    %1127 = arith.mulf %9, %1126 : vector<8x128xf32>
    %1128 = arith.addf %1123, %1127 : vector<8x128xf32>
    %1129 = math.log %1128 : vector<8x128xf32>
    %cst_149 = arith.constant 0.333333343 : f32
    %1130 = vector.broadcast %cst_149 : f32 to vector<8x128xf32>
    %1131 = arith.mulf %1129, %1130 : vector<8x128xf32>
    %1132 = math.exp %1131 : vector<8x128xf32>
    %cst_150 = arith.constant 5.000000e-01 : f32
    %1133 = vector.broadcast %cst_150 : f32 to vector<8x128xf32>
    %1134 = arith.mulf %1133, %1020 : vector<8x128xf32>
    %cst_151 = arith.constant 3.000000e-01 : f32
    %1135 = vector.broadcast %cst_151 : f32 to vector<8x128xf32>
    %1136 = arith.mulf %1135, %1074 : vector<8x128xf32>
    %1137 = arith.addf %1134, %1136 : vector<8x128xf32>
    %cst_152 = arith.constant 2.000000e-01 : f32
    %1138 = vector.broadcast %cst_152 : f32 to vector<8x128xf32>
    %1139 = arith.mulf %1138, %1132 : vector<8x128xf32>
    %1140 = arith.addf %1137, %1139 : vector<8x128xf32>
    %c0_153 = arith.constant 0 : index
    %c0_154 = arith.constant 0 : index
    %c0_155 = arith.constant 0 : index
    %1141 = vector.load %arg3[%c0_153, %c0_154, %c0_155] : memref<9x8x128xf32, #tpu.memory_space<vmem>>, vector<1x8x128xf32>
    %1142 = vector.shape_cast %1141 : vector<1x8x128xf32> to vector<8x128xf32>
    %1143 = vector.shape_cast %1140 : vector<8x128xf32> to vector<1x8x128xf32>
    tpu.vector_store %arg3[%c0_153, %c0_154, %c0_155], %1143 {strides = array<i32>} : memref<9x8x128xf32, #tpu.memory_space<vmem>>, vector<1x8x128xf32>,
    %cst_156 = arith.constant 5.000000e-01 : f32
    %1144 = vector.broadcast %cst_156 : f32 to vector<8x128xf32>
    %1145 = arith.mulf %1144, %1025 : vector<8x128xf32>
    %cst_157 = arith.constant 3.000000e-01 : f32
    %1146 = vector.broadcast %cst_157 : f32 to vector<8x128xf32>
    %1147 = arith.mulf %1146, %1079 : vector<8x128xf32>
    %1148 = arith.addf %1145, %1147 : vector<8x128xf32>
    %c1_158 = arith.constant 1 : index
    %c0_159 = arith.constant 0 : index
    %c0_160 = arith.constant 0 : index
    %1149 = vector.load %arg3[%c1_158, %c0_159, %c0_160] : memref<9x8x128xf32, #tpu.memory_space<vmem>>, vector<1x8x128xf32>
    %1150 = vector.shape_cast %1149 : vector<1x8x128xf32> to vector<8x128xf32>
    %1151 = vector.shape_cast %1148 : vector<8x128xf32> to vector<1x8x128xf32>
    tpu.vector_store %arg3[%c1_158, %c0_159, %c0_160], %1151 {strides = array<i32>} : memref<9x8x128xf32, #tpu.memory_space<vmem>>, vector<1x8x128xf32>,
    %cst_161 = arith.constant 5.000000e-01 : f32
    %1152 = vector.broadcast %cst_161 : f32 to vector<8x128xf32>
    %1153 = arith.mulf %1152, %1030 : vector<8x128xf32>
    %cst_162 = arith.constant 3.000000e-01 : f32
    %1154 = vector.broadcast %cst_162 : f32 to vector<8x128xf32>
    %1155 = arith.mulf %1154, %1084 : vector<8x128xf32>
    %1156 = arith.addf %1153, %1155 : vector<8x128xf32>
    %c2_163 = arith.constant 2 : index
    %c0_164 = arith.constant 0 : index
    %c0_165 = arith.constant 0 : index
    %1157 = vector.load %arg3[%c2_163, %c0_164, %c0_165] : memref<9x8x128xf32, #tpu.memory_space<vmem>>, vector<1x8x128xf32>
    %1158 = vector.shape_cast %1157 : vector<1x8x128xf32> to vector<8x128xf32>
    %1159 = vector.shape_cast %1156 : vector<8x128xf32> to vector<1x8x128xf32>
    tpu.vector_store %arg3[%c2_163, %c0_164, %c0_165], %1159 {strides = array<i32>} : memref<9x8x128xf32, #tpu.memory_space<vmem>>, vector<1x8x128xf32>,
    %cst_166 = arith.constant 5.000000e-01 : f32
    %1160 = vector.broadcast %cst_166 : f32 to vector<8x128xf32>
    %1161 = arith.mulf %1160, %1035 : vector<8x128xf32>
    %cst_167 = arith.constant 3.000000e-01 : f32
    %1162 = vector.broadcast %cst_167 : f32 to vector<8x128xf32>
    %1163 = arith.mulf %1162, %1089 : vector<8x128xf32>
    %1164 = arith.addf %1161, %1163 : vector<8x128xf32>
    %c3_168 = arith.constant 3 : index
    %c0_169 = arith.constant 0 : index
    %c0_170 = arith.constant 0 : index
    %1165 = vector.load %arg3[%c3_168, %c0_169, %c0_170] : memref<9x8x128xf32, #tpu.memory_space<vmem>>, vector<1x8x128xf32>
    %1166 = vector.shape_cast %1165 : vector<1x8x128xf32> to vector<8x128xf32>
    %1167 = vector.shape_cast %1164 : vector<8x128xf32> to vector<1x8x128xf32>
    tpu.vector_store %arg3[%c3_168, %c0_169, %c0_170], %1167 {strides = array<i32>} : memref<9x8x128xf32, #tpu.memory_space<vmem>>, vector<1x8x128xf32>,
    %cst_171 = arith.constant 5.000000e-01 : f32
    %1168 = vector.broadcast %cst_171 : f32 to vector<8x128xf32>
    %1169 = arith.mulf %1168, %1040 : vector<8x128xf32>
    %cst_172 = arith.constant 3.000000e-01 : f32
    %1170 = vector.broadcast %cst_172 : f32 to vector<8x128xf32>
    %1171 = arith.mulf %1170, %1094 : vector<8x128xf32>
    %1172 = arith.addf %1169, %1171 : vector<8x128xf32>
    %cst_173 = arith.constant 2.000000e-01 : f32
    %1173 = vector.broadcast %cst_173 : f32 to vector<8x128xf32>
    %1174 = arith.mulf %1173, %1132 : vector<8x128xf32>
    %1175 = arith.addf %1172, %1174 : vector<8x128xf32>
    %c4_174 = arith.constant 4 : index
    %c0_175 = arith.constant 0 : index
    %c0_176 = arith.constant 0 : index
    %1176 = vector.load %arg3[%c4_174, %c0_175, %c0_176] : memref<9x8x128xf32, #tpu.memory_space<vmem>>, vector<1x8x128xf32>
    %1177 = vector.shape_cast %1176 : vector<1x8x128xf32> to vector<8x128xf32>
    %1178 = vector.shape_cast %1175 : vector<8x128xf32> to vector<1x8x128xf32>
    tpu.vector_store %arg3[%c4_174, %c0_175, %c0_176], %1178 {strides = array<i32>} : memref<9x8x128xf32, #tpu.memory_space<vmem>>, vector<1x8x128xf32>,
    %cst_177 = arith.constant 5.000000e-01 : f32
    %1179 = vector.broadcast %cst_177 : f32 to vector<8x128xf32>
    %1180 = arith.mulf %1179, %1045 : vector<8x128xf32>
    %cst_178 = arith.constant 3.000000e-01 : f32
    %1181 = vector.broadcast %cst_178 : f32 to vector<8x128xf32>
    %1182 = arith.mulf %1181, %1099 : vector<8x128xf32>
    %1183 = arith.addf %1180, %1182 : vector<8x128xf32>
    %c5_179 = arith.constant 5 : index
    %c0_180 = arith.constant 0 : index
    %c0_181 = arith.constant 0 : index
    %1184 = vector.load %arg3[%c5_179, %c0_180, %c0_181] : memref<9x8x128xf32, #tpu.memory_space<vmem>>, vector<1x8x128xf32>
    %1185 = vector.shape_cast %1184 : vector<1x8x128xf32> to vector<8x128xf32>
    %1186 = vector.shape_cast %1183 : vector<8x128xf32> to vector<1x8x128xf32>
    tpu.vector_store %arg3[%c5_179, %c0_180, %c0_181], %1186 {strides = array<i32>} : memref<9x8x128xf32, #tpu.memory_space<vmem>>, vector<1x8x128xf32>,
    %cst_182 = arith.constant 5.000000e-01 : f32
    %1187 = vector.broadcast %cst_182 : f32 to vector<8x128xf32>
    %1188 = arith.mulf %1187, %1050 : vector<8x128xf32>
    %cst_183 = arith.constant 3.000000e-01 : f32
    %1189 = vector.broadcast %cst_183 : f32 to vector<8x128xf32>
    %1190 = arith.mulf %1189, %1104 : vector<8x128xf32>
    %1191 = arith.addf %1188, %1190 : vector<8x128xf32>
    %c6_184 = arith.constant 6 : index
    %c0_185 = arith.constant 0 : index
    %c0_186 = arith.constant 0 : index
    %1192 = vector.load %arg3[%c6_184, %c0_185, %c0_186] : memref<9x8x128xf32, #tpu.memory_space<vmem>>, vector<1x8x128xf32>
    %1193 = vector.shape_cast %1192 : vector<1x8x128xf32> to vector<8x128xf32>
    %1194 = vector.shape_cast %1191 : vector<8x128xf32> to vector<1x8x128xf32>
    tpu.vector_store %arg3[%c6_184, %c0_185, %c0_186], %1194 {strides = array<i32>} : memref<9x8x128xf32, #tpu.memory_space<vmem>>, vector<1x8x128xf32>,
    %cst_187 = arith.constant 5.000000e-01 : f32
    %1195 = vector.broadcast %cst_187 : f32 to vector<8x128xf32>
    %1196 = arith.mulf %1195, %1055 : vector<8x128xf32>
    %cst_188 = arith.constant 3.000000e-01 : f32
    %1197 = vector.broadcast %cst_188 : f32 to vector<8x128xf32>
    %1198 = arith.mulf %1197, %1109 : vector<8x128xf32>
    %1199 = arith.addf %1196, %1198 : vector<8x128xf32>
    %c7_189 = arith.constant 7 : index
    %c0_190 = arith.constant 0 : index
    %c0_191 = arith.constant 0 : index
    %1200 = vector.load %arg3[%c7_189, %c0_190, %c0_191] : memref<9x8x128xf32, #tpu.memory_space<vmem>>, vector<1x8x128xf32>
    %1201 = vector.shape_cast %1200 : vector<1x8x128xf32> to vector<8x128xf32>
    %1202 = vector.shape_cast %1199 : vector<8x128xf32> to vector<1x8x128xf32>
    tpu.vector_store %arg3[%c7_189, %c0_190, %c0_191], %1202 {strides = array<i32>} : memref<9x8x128xf32, #tpu.memory_space<vmem>>, vector<1x8x128xf32>,
    %cst_192 = arith.constant 5.000000e-01 : f32
    %1203 = vector.broadcast %cst_192 : f32 to vector<8x128xf32>
    %1204 = arith.mulf %1203, %1060 : vector<8x128xf32>
    %cst_193 = arith.constant 3.000000e-01 : f32
    %1205 = vector.broadcast %cst_193 : f32 to vector<8x128xf32>
    %1206 = arith.mulf %1205, %1114 : vector<8x128xf32>
    %1207 = arith.addf %1204, %1206 : vector<8x128xf32>
    %cst_194 = arith.constant 2.000000e-01 : f32
    %1208 = vector.broadcast %cst_194 : f32 to vector<8x128xf32>
    %1209 = arith.mulf %1208, %1132 : vector<8x128xf32>
    %1210 = arith.addf %1207, %1209 : vector<8x128xf32>
    %c8_195 = arith.constant 8 : index
    %c0_196 = arith.constant 0 : index
    %c0_197 = arith.constant 0 : index
    %1211 = vector.load %arg3[%c8_195, %c0_196, %c0_197] : memref<9x8x128xf32, #tpu.memory_space<vmem>>, vector<1x8x128xf32>
    %1212 = vector.shape_cast %1211 : vector<1x8x128xf32> to vector<8x128xf32>
    %1213 = vector.shape_cast %1210 : vector<8x128xf32> to vector<1x8x128xf32>
    tpu.vector_store %arg3[%c8_195, %c0_196, %c0_197], %1213 {strides = array<i32>} : memref<9x8x128xf32, #tpu.memory_space<vmem>>, vector<1x8x128xf32>,
    return
  }
  func.func @transform_0(%arg0: i32) -> i32 {
    %c0_i32 = arith.constant 0 : i32
    %c0_i32_0 = arith.constant 0 : i32
    return %c0_i32 : i32
  }
  func.func @transform_1(%arg0: i32) -> (i32, i32, i32) {
    %c0_i32 = arith.constant 0 : i32
    %c0_i32_0 = arith.constant 0 : i32
    %c0_i32_1 = arith.constant 0 : i32
    return %c0_i32, %arg0, %c0_i32_0 : i32, i32, i32
  }
  func.func @transform_2(%arg0: i32) -> (i32, i32, i32) {
    %c0_i32 = arith.constant 0 : i32
    %c0_i32_0 = arith.constant 0 : i32
    %c0_i32_1 = arith.constant 0 : i32
    return %c0_i32, %arg0, %c0_i32_0 : i32, i32, i32
  }
}

</mosaic_0001>

<bundles_post_ra>
// kernel: tpu_custom_call.1
= control target key start
LH: loop header
LB: loop body
LE: loop exit
PB: predicated region body
PF: predicated region fallthrough
CT: control target
= control target key end

     0   :  { %7 = vsyncpa [#allocation5], 0  ;;  %s2731_s0 = inlined_call_operand.hbm [shape: f32[4], index: 0, kind: input, shape index: {}]   ;;  %s2732_s1 = inlined_call_operand.hbm [shape: f32[9,24,128], index: 1, kind: input, shape index: {}]   ;;  %s2733_s2 = inlined_call_operand.hbm [shape: f32[9,24,128], index: 2, kind: output, shape index: {}]  }
   0x1   :  { %8 = vsyncpa [#allocation3], 0 }
   0x2   :  { %10 = vsyncpa [#allocation3 + $0x1], 0 }
   0x3   :  { %11 = vsyncpa [#allocation4], 0 }
   0x4   :  { %13 = vsyncpa [#allocation4 + $0x1], 0  ;;  %s1768_s9 = smov 0   ;;  %s1770_s10 = smov 0  }
   0x5   :  { %s1772_s11 = smov 0   ;;  %s1774_s12 = smov 0  }
   0x6 LB: > { %s1789_s13 = sadd.s32 4294967295, %s1741_s12   ;;  %s1394_s14 = sadd.s32 4294967294, %s1741_s12   ;;  %s1741_s12 = sphi %s1774_s12, %s2775_s12   ;;  %s1737_s11 = sphi %s1772_s11, %s2774_s11   ;;  %s1733_s10 = sphi %s1770_s10, %s2773_s10   ;;  %s1729_s9 = sphi %s1768_s9, %s2772_s9  }
   0x7   : > { %s1793_s15 = sadd.s32 1, %s1741_s12   ;;  %s47_s16 = sadd.s32 1, %s1737_s11 }
   0x8   : > { %s44_s17 = ssub.s32 %s1741_s12, %s1793_s15  ;;  %p54_p0 = scmp.ne.s32.totalorder %s1737_s11, %s1733_s10 }
   0x9   : > { %p45_p1 = scmp.eq.s32.totalorder %s44_s17, 0  ;;  %p55_p2 = scmp.eq.s32.totalorder %s1741_s12, 0 }
   0xa   : > { %p60_p3 = scmp.ne.s32.totalorder %s1733_s10, %s1729_s9  ;;  %p2735_p4 = scmp.eq.s32.totalorder %s1789_s13, 0 }
   0xb   : > { %s1805_s18 = scalar_select %p45_p1, %s1737_s11, %s47_s16  }
   0xc   : > { %p1807_p5 = por %p55_p2, %p54_p0  ;;  %p1813_p6 = por %p2735_p4, %p60_p3 }
   0xd   : > { %p84_p7 = scmp.eq.s32.totalorder %s1789_s13, 2  ;;  %p90_p8 = scmp.eq.s32.totalorder %s1394_s14, 2 }
   0xe   : > { %s2738_s20 = scalar_select %p1813_p6, 1, 0 }
   0xf   : > { %p1395_p9 = scmp.ge.s32.totalorder %s1741_s12, 1  ;;  %p97_p10 = scmp.lt.s32.totalorder %s1741_s12, 4 }
  0x10   : > { %p1820_p11 = por %p84_p7, %p54_p0  ;;  %p1824_p12 = por %p90_p8, %p60_p3 }
  0x11   : > { %p1828_p13 = pnand %p1395_p9, %p97_p10  ;;  %p1446_p2 = scmp.lt.s32.totalorder %s1741_s12, 3 }
  0x12   : > { %s2739_s21 = scalar_select %p1820_p11, 1, 0 }
  0x13   : > { %s2740_s22 = scalar_select %p1824_p12, 1, 0 }
  0x14   : > { %p1433_p1 = pneg %p1828_p13  ;;  %s119_s24 = sand.u32 1, %s1737_s11  }
  0x15   : > { %s1398_s25 = sshll.u32 %s1741_s12, 7  ;;  %p1841_p0 = pnand %p1446_p2, %p1807_p5 }
  0x16   : > { %p1434_p6 = pnand %p1433_p1, %p2735_p4  ;;  %s1423_s27 = smul.u32 72, %s119_s24 }
  0x17   : > { %s1628_s30 = scalar_lea.hbm %s2731_s0, 16 }
  0x18   : > { %p1629_p3 = scmp.ne.s32.totalorder %s2731_s0, %s1628_s30  ;;  %p1630_p7 = pneg %p1434_p6 }
  0x19   : > { %p1635_p10 = scmp.lt.u32.totalorder %s1628_s30, %s2731_s0 }
  0x1a   : > { %p1631_p8 = pnand %p1630_p7, %p1629_p3 }
  0x1c   : > { %p1632_p9 = pneg %p1631_p8 }
  0x1e   : > { %p1637_p5 = pnand %p1635_p10, %p1632_p9 }
  0x20   : > { %1640 = shalt.err (!%p1637_p5)
}
  0x21   : > { %s1743_s7 = smov [#allocation2]   ;;  %s1860_s19 = scalar_lea.hbm %s2732_s1, %s1398_s25 }
  0x22   : > { %1436 = dma.hbm_to_smem (!%p1434_p6), %s2731_s0, 16, %s1743_s7, [#allocation5]  }
  0x23   : > { %s123_s28 = scalar_lea.vmem [#allocation6], %s1423_s27  ;;  %s1864_s30 = scalar_lea.sflag [#allocation3], %s119_s24 }
  0x24   : > { %s129_s29 = sshll.u32 %s123_s28, 4  ;;  %s1641_s3 = scalar_lea.hbm %s1860_s19, 1152  ;;  %s1862_s29 = int_to_ptr.vmem [resolvable:$true] %s129_s29 }
  0x25   : > { %p1642_p1 = scmp.ne.s32.totalorder %s1860_s19, %s1641_s3  ;;  %p1643_p2 = pneg %p1841_p0 }
  0x26   : > { %s1646_s5 = scalar_lea.hbm %s2732_s1, 3456  ;;  %p1647_p7 = scmp.lt.u32.totalorder %s1860_s19, %s2732_s1 }
  0x27   : > { %p1644_p6 = pnand %p1643_p2, %p1642_p1  ;;  %p1648_p8 = scmp.lt.u32.totalorder %s1646_s5, %s1641_s3 }
  0x28   : > { %p1650_p10 = scmp.lt.u32.totalorder %s1641_s3, %s1860_s19 }
  0x29   : > { %p1645_p3 = pneg %p1644_p6  ;;  %p1649_p9 = por %p1648_p8, %p1647_p7 }
  0x2b   : > { %p1651_p5 = por %p1650_p10, %p1649_p9 }
  0x2d   : > { %p1652_p4 = pnand %p1651_p5, %p1645_p3 }
  0x2f   : > { %1655 = shalt.err (!%p1652_p4)
}
  0x30   : > { %s1656_s24 = scalar_lea.vmem %s1862_s29, 1152  ;;  %s1744_s27 = smov [#allocation6]  }
  0x31   : > { %p1657_p1 = scmp.ne.s32.totalorder %s1862_s29, %s1656_s24  ;;  %s1661_s8 = sshll.u32 %s1744_s27, 4  ;;  %s1662_s8 = int_to_ptr.vmem [resolvable:$false] %s1661_s8 }
  0x32   : > { %s1663_s14 = scalar_lea.vmem %s1662_s8, 2304  ;;  %p1664_p11 = scmp.lt.s32.totalorder %s1862_s29, %s1662_s8 }
  0x33   : > { %p1659_p6 = pnand %p1657_p1, %p1643_p2  ;;  %p1665_p7 = scmp.lt.s32.totalorder %s1663_s14, %s1656_s24 }
  0x35   : > { %p1660_p12 = pneg %p1659_p6  ;;  %p1666_p8 = por %p1665_p7, %p1664_p11 }
  0x37   : > { %p1667_p9 = pnand %p1666_p8, %p1660_p12 }
  0x39   : > { %1670 = shalt.err (!%p1667_p9)
}
  0x3a   : > { %s1745_s16 = smov 384   ;;  %s1746_s17 = smov 128  }
  0x3b   : > { %s1747_s28 = smov 8   ;;  %141 = sbr.rel (%p1828_p13) target bundleno = 1138 (0x472), region = 28 }
  0x3c   : > { %1440 = dma.hbm_to_vmem [thread:$0]  (!%p1841_p0), %s1860_s19, 1152, %s1862_s29, %s1864_s30, %s1745_s16, %s1746_s17, %s1747_s28  }
  0x3d   : > { %p2743_p4 = scmp.eq.s32.totalorder (!%p1828_p13), %s1789_s13, 0 }
  0x42   : > { %1716 = dma.done.wait (%p2743_p4), [#allocation5], 16   ;;  %p2744_p2 = pmov %p2743_p4 }
  0x43   : > { %s1899_s3 = sand.u32 1, %s1733_s10   ;;  %p2745_p11 = scmp.ne.s32.totalorder %s2738_s20, 0 }
  0x44   : > { %1718 = vsyncadd (%p2744_p2), [#allocation5], 4294967280  ;;  %s1424_s25 = smul.u32 72, %s1899_s3  ;;  %s148_s4 = scalar_lea.sflag [#allocation3], %s1899_s3 }
  0x46   : > { %s1905_s26 = scalar_lea.vmem [#allocation6], %s1424_s25 }
  0x47   : > { %1720 = dma.done.wait (%p2745_p11), %s148_s4, 1152  }
  0x48   : > { %1722 = vsyncadd (%p2745_p11), %s148_s4, 4294966144 }
  0x49   : > { %156 = sfence }
  0x4a   : > { %v177_v0 = vld [vmem:[%s1905_s26] sm:$0xff]  ;;  %v1404_v1 = vld [vmem:[%s1905_s26 + $0x8] sm:$0xff]  ;;  %v1406_v2 = vld [vmem:[%s1905_s26 + $0x18] sm:$0xff]  ;;  %v1748_v37 = vmov -1.0   ;;  %s1403_s20 = sld [smem:[#allocation2 + $0x3]]  ;;  %s1401_s23 = sld [smem:[#allocation2 + $0x1]] }
  0x4b   : > { %v1407_v3 = vld [vmem:[%s1905_s26 + $0x20] sm:$0xff]  ;;  %v199_v4 = vmul.f32 %v1404_v1, %v177_v0  ;;  %v1409_v5 = vld [vmem:[%s1905_s26 + $0x30] sm:$0xff]  ;;  %v1410_v6 = vld [vmem:[%s1905_s26 + $0x38] sm:$0xff]  ;;  %v194_v12 = vmul.f32 %v177_v0, %v177_v0  ;;  %v195_v13 = vmul.f32 %v1406_v2, %v1406_v2  ;;  %v204_v14 = vmul.f32 %v1404_v1, %v1404_v1  ;;  %s173_s19 = sld [smem:[#allocation2]]  ;;  %s1402_s29 = sld [smem:[#allocation2 + $0x2]] }
  0x4c   : > { %v200_v7 = vmul.f32 %v1407_v3, %v1406_v2  ;;  %v202_v8 = vmul.f32 %v1410_v6, %v1409_v5  ;;  %v205_v15 = vmul.f32 %v1407_v3, %v1407_v3  ;;  %v197_v20 = vmul.f32 %v1409_v5, %v1409_v5  ;;  %v1405_v43 = vld [vmem:[%s1905_s26 + $0x10] sm:$0xff]  ;;  %v1408_v44 = vld [vmem:[%s1905_s26 + $0x28] sm:$0xff]  ;;  %v1411_v48 = vld [vmem:[%s1905_s26 + $0x40] sm:$0xff]  ;;  %s172_s30 = scalar_lea.vmem [#allocation7], %s1424_s25  ;;  %s1420_s5 = sshll.u32 %s1789_s13, 7 }
  0x4d   : > { %v196_v19 = vadd.f32 %v195_v13, %v194_v12  ;;  %v207_v22 = vmul.f32 %v1410_v6, %v1410_v6  ;;  %v209_v46 = vmul.f32 %v1405_v43, %v177_v0  ;;  %v210_v47 = vmul.f32 %v1408_v44, %v1406_v2  ;;  %s1309_s6 = sshll.u32 %s172_s30, 4  ;;  %s2685_s27 = scalar_lea.hbm %s2733_s2, %s1420_s5  ;;  %s2687_s6 = int_to_ptr.vmem [resolvable:$true] %s1309_s6 }
  0x4e   : > { %v201_v9 = vadd.f32 %v200_v7, %v199_v4  ;;  %v206_v21 = vadd.f32 %v205_v15, %v204_v14  ;;  %v214_v49 = vmul.f32 %v1405_v43, %v1404_v1  ;;  %v215_v50 = vmul.f32 %v1408_v44, %v1407_v3  ;;  %s1297_s13 = scalar_lea.sflag [#allocation4], %s1899_s3  ;;  %s1671_s8 = scalar_lea.vmem %s2687_s6, 1152 }
  0x4f   : > { %v1927_v23 = vadd.f32 %v197_v20, %v196_v19  ;;  %v211_v51 = vadd.f32 %v210_v47, %v209_v46  ;;  %v212_v52 = vmul.f32 %v1411_v48, %v1409_v5  ;;  %v217_v54 = vmul.f32 %v1411_v48, %v1410_v6  ;;  %p1672_p12 = scmp.ne.s32.totalorder %s2687_s6, %s1671_s8  ;;  %p2770_p13 = scmp.ne.s32.totalorder %s2739_s21, 0 }
  0x50   : > { %v1917_v10 = vadd.f32 %v202_v8, %v201_v9  ;;  %v1929_v24 = vadd.f32 %v207_v22, %v206_v21  ;;  %v216_v53 = vadd.f32 %v215_v50, %v214_v49  ;;  %v220_v19 = vmul.f32 %v1408_v44, %v1408_v44  ;;  %s1749_s14 = smov [#allocation7]  }
  0x51   : > { %v213_v55 = vadd.f32 %v212_v52, %v211_v51  ;;  %p1673_p0 = pnand %p1672_p12, %p2770_p13  ;;  %s1675_s16 = sshll.u32 %s1749_s14, 4  ;;  %s1676_s16 = int_to_ptr.vmem [resolvable:$false] %s1675_s16 }
  0x52   : > { %v224_v11 = vand.u32 2147483647, %v1917_v10  ;;  %v227_v25 = vsub.f32 %v1929_v24, %v1927_v23  ;;  %v218_v56 = vadd.f32 %v217_v54, %v216_v53  ;;  %s1677_s17 = scalar_lea.vmem %s1676_s16, 2304  ;;  %p1678_p10 = scmp.lt.s32.totalorder %s2687_s6, %s1676_s16 }
  0x53   : > { %p1674_p3 = pneg %p1673_p0  ;;  %p1679_p5 = scmp.lt.s32.totalorder %s1677_s17, %s1671_s8 }
  0x54   : > { %vm1920_vm0 = vcmp.lt.f32.partialorder %v224_v11, 1e-30 }
  0x55   : > { %v226_v17 = vsel %vm1920_vm0, 1.0, %v1917_v10  ;;  %p1680_p1 = por %p1679_p5, %p1678_p10 }
  0x56   : > { %v228_v18 = vmul.f32 2.0, %v226_v17 }
  0x57   : > { %p1681_p6 = pnand %p1680_p1, %p1674_p3 }
  0x58   : > { %1489 = vrcp.f32 %v228_v18  ;;  %v219_v18 = vmul.f32 %v1405_v43, %v1405_v43 }
  0x62   : > { %v1490_v26 = vpop.eup %1489 }
  0x63   : > { %v230_v27 = vmul.f32 %v1490_v26, %v227_v25 }
  0x65   : > { %v234_v28 = vmul.f32 %v230_v27, %v230_v27  ;;  %v233_v32 = vand.u32 2147483647, %v230_v27  ;;  %vm231_vm3 = vcmp.ge.f32.partialorder %v230_v27, 0.0  ;;  %v221_v27 = vadd.f32 %v220_v19, %v219_v18 }
  0x66   : > { %v232_v38 = vsel %vm231_vm3, 1.0, %v1748_v37 }
  0x67   : > { %v235_v29 = vadd.f32 1.0, %v234_v28  ;;  %v222_v28 = vmul.f32 %v1411_v48, %v1411_v48 }
  0x69   : > { %1491 = vrsqrt.f32 %v235_v29  ;;  %vm238_vm1 = vcmp.eq.f32.partialorder %v235_v29, inf  ;;  %v241_v31 = vand.u32 2147483648, %v235_v29  ;;  %vm240_vm2 = vcmp.eq.f32.partialorder %v235_v29, 0.0 }
  0x73   : > { %v1492_v30 = vpop.eup %1491 }
  0x74   : > { %v237_v33 = vmul.f32 %v1492_v30, %v235_v29 }
  0x76   : > { %v239_v34 = vsel %vm238_vm1, %v235_v29, %v237_v33 }
  0x77   : > { %v242_v35 = vsel %vm240_vm2, %v241_v31, %v239_v34  ;;  %v223_v31 = vadd.f32 %v222_v28, %v221_v27 }
  0x78   : > { %v243_v36 = vadd.f32 %v242_v35, %v233_v32 }
  0x7a   : > { %1493 = vrcp.f32 %v243_v36 }
  0x84   : > { %v1494_v39 = vpop.eup %1493 }
  0x85   : > { %v245_v40 = vmul.f32 %v1494_v39, %v232_v38 }
  0x87   : > { %v246_v41 = vsel %vm1920_vm0, 0.0, %v245_v40 }
  0x88   : > { %v247_v42 = vmul.f32 %v246_v41, %v246_v41 }
  0x8a   : > { %v248_v45 = vadd.f32 1.0, %v247_v42 }
  0x8c   : > { %1495 = vrsqrt.f32 %v248_v45 }
  0x96   : > { %v1496_v57 = vpop.eup %1495 }
  0x97   : > { %v250_v58 = vmul.f32 %v1496_v57, %v246_v41  ;;  %v268_v59 = vmul.f32 %v1496_v57, %v218_v56  ;;  %v264_v60 = vmul.f32 %v1496_v57, %v213_v55  ;;  %v272_v61 = vmul.f32 0.0, %v1496_v57 }
  0x98   : > { %v251_v1 = vmul.f32 %v1496_v57, %v1496_v57 }
  0x99   : > { %v252_v62 = vmul.f32 %v250_v58, %v250_v58  ;;  %v253_v63 = vmul.f32 %v1496_v57, %v250_v58  ;;  %v265_v4 = vmul.f32 %v250_v58, %v218_v56  ;;  %v267_v0 = vmul.f32 %v250_v58, %v213_v55 }
  0x9a   : > { %v270_v2 = vmul.f32 0.0, %v250_v58  ;;  %v1939_v7 = vadd.f32 %v272_v61, %v250_v58  ;;  %v274_v8 = vsub.f32 %v272_v61, %v250_v58  ;;  %v262_v14 = vmul.f32 %v251_v1, %v1929_v24 }
  0x9b   : > { %v255_v3 = vmul.f32 2.0, %v253_v63  ;;  %v260_v5 = vmul.f32 %v252_v62, %v1927_v23  ;;  %v1942_v6 = vsub.f32 %v264_v60, %v265_v4  ;;  %v269_v9 = vadd.f32 %v268_v59, %v267_v0 }
  0x9c   : > { %v271_v11 = vsub.f32 %v1496_v57, %v270_v2  ;;  %v1944_v12 = vadd.f32 %v1496_v57, %v270_v2  ;;  %v1948_v15 = vsub.f32 %v272_v61, %v270_v2  ;;  %v1950_v16 = vadd.f32 %v272_v61, %v270_v2 }
  0x9d   : > { %v256_v13 = vmul.f32 %v255_v3, %v1917_v10  ;;  %v278_v17 = vand.u32 2147483647, %v1942_v6  ;;  %v254_v20 = vmul.f32 %v251_v1, %v1927_v23  ;;  %v258_v30 = vmul.f32 %v252_v62, %v1929_v24 }
  0x9f   : > { %v261_v21 = vadd.f32 %v260_v5, %v256_v13  ;;  %vm1954_vm4 = vcmp.lt.f32.partialorder %v278_v17, 1e-30  ;;  %v257_v29 = vsub.f32 %v254_v20, %v256_v13 }
  0xa0   : > { %v280_v10 = vsel %vm1954_vm4, 1.0, %v1942_v6 }
  0xa1   : > { %v1958_v25 = vadd.f32 %v262_v14, %v261_v21  ;;  %v282_v26 = vmul.f32 2.0, %v280_v10  ;;  %v259_v23 = vadd.f32 %v258_v30, %v257_v29 }
  0xa3   : > { %1497 = vrcp.f32 %v282_v26  ;;  %v281_v32 = vsub.f32 %v223_v31, %v259_v23 }
  0xad   : > { %v1498_v33 = vpop.eup %1497 }
  0xae   : > { %v284_v34 = vmul.f32 %v1498_v33, %v281_v32 }
  0xb0   : > { %v288_v35 = vmul.f32 %v284_v34, %v284_v34  ;;  %v287_v40 = vand.u32 2147483647, %v284_v34  ;;  %vm285_vm7 = vcmp.ge.f32.partialorder %v284_v34, 0.0 }
  0xb1   : > { %v286_v24 = vsel %vm285_vm7, 1.0, %v1748_v37 }
  0xb2   : > { %v289_v36 = vadd.f32 1.0, %v288_v35 }
  0xb4   : > { %1499 = vrsqrt.f32 %v289_v36  ;;  %vm292_vm5 = vcmp.eq.f32.partialorder %v289_v36, inf  ;;  %v295_v39 = vand.u32 2147483648, %v289_v36  ;;  %vm294_vm6 = vcmp.eq.f32.partialorder %v289_v36, 0.0 }
  0xbe   : > { %v1500_v38 = vpop.eup %1499 }
  0xbf   : > { %v291_v41 = vmul.f32 %v1500_v38, %v289_v36 }
  0xc1   : > { %v293_v42 = vsel %vm292_vm5, %v289_v36, %v291_v41 }
  0xc2   : > { %v296_v43 = vsel %vm294_vm6, %v295_v39, %v293_v42 }
  0xc3   : > { %v297_v44 = vadd.f32 %v296_v43, %v287_v40 }
  0xc5   : > { %1501 = vrcp.f32 %v297_v44 }
  0xcf   : > { %v1502_v45 = vpop.eup %1501 }
  0xd0   : > { %v299_v46 = vmul.f32 %v1502_v45, %v286_v24 }
  0xd2   : > { %v300_v47 = vsel %vm1954_vm4, 0.0, %v299_v46 }
  0xd3   : > { %v301_v48 = vmul.f32 %v300_v47, %v300_v47 }
  0xd5   : > { %v302_v49 = vadd.f32 1.0, %v301_v48 }
  0xd7   : > { %1503 = vrsqrt.f32 %v302_v49 }
  0xe1   : > { %v1504_v50 = vpop.eup %1503 }
  0xe2   : > { %v304_v51 = vmul.f32 %v1504_v50, %v300_v47  ;;  %v318_v52 = vmul.f32 0.0, %v1504_v50  ;;  %v322_v53 = vmul.f32 %v1504_v50, %v269_v9  ;;  %v324_v54 = vmul.f32 %v1504_v50, %v271_v11 }
  0xe3   : > { %v328_v55 = vmul.f32 %v1504_v50, %v274_v8  ;;  %v332_v56 = vmul.f32 %v1504_v50, %v1948_v15  ;;  %v305_v57 = vmul.f32 %v1504_v50, %v1504_v50 }
  0xe4   : > { %v306_v58 = vmul.f32 %v304_v51, %v304_v51  ;;  %v307_v59 = vmul.f32 %v1504_v50, %v304_v51  ;;  %v319_v60 = vmul.f32 %v304_v51, %v269_v9  ;;  %v321_v61 = vmul.f32 0.0, %v304_v51 }
  0xe5   : > { %v326_v62 = vmul.f32 %v304_v51, %v271_v11  ;;  %v330_v63 = vmul.f32 %v304_v51, %v274_v8  ;;  %v308_v4 = vmul.f32 %v305_v57, %v259_v23  ;;  %v1968_v1 = vsub.f32 %v332_v56, %v304_v51 }
  0xe6   : > { %v309_v0 = vmul.f32 2.0, %v307_v59  ;;  %v312_v2 = vmul.f32 %v306_v58, %v223_v31  ;;  %v320_v3 = vsub.f32 %v318_v52, %v319_v60  ;;  %v1970_v5 = vadd.f32 %v322_v53, %v321_v61 }
  0xe7   : > { %v1972_v13 = vsub.f32 %v324_v54, %v321_v61  ;;  %v327_v14 = vadd.f32 %v326_v62, %v318_v52  ;;  %v1975_v18 = vsub.f32 %v328_v55, %v321_v61  ;;  %v331_v19 = vadd.f32 %v330_v63, %v318_v52 }
  0xe8   : > { %v310_v17 = vmul.f32 %v309_v0, %v1942_v6  ;;  %v334_v9 = vmul.f32 %v304_v51, %v1948_v15  ;;  %v336_v8 = vand.u32 2147483647, %v1970_v5  ;;  %v314_v20 = vmul.f32 %v306_v58, %v259_v23 }
  0xe9   : > { %v316_v28 = vmul.f32 %v305_v57, %v223_v31 }
  0xea   : > { %v311_v11 = vsub.f32 %v308_v4, %v310_v17  ;;  %v335_v21 = vadd.f32 %v1504_v50, %v334_v9  ;;  %vm1979_vm8 = vcmp.lt.f32.partialorder %v336_v8, 1e-30  ;;  %v315_v27 = vadd.f32 %v314_v20, %v310_v17 }
  0xeb   : > { %v338_v6 = vsel %vm1979_vm8, 1.0, %v1970_v5 }
  0xec   : > { %v1983_v10 = vadd.f32 %v312_v2, %v311_v11  ;;  %v340_v26 = vmul.f32 2.0, %v338_v6  ;;  %v1988_v15 = vadd.f32 %v316_v28, %v315_v27 }
  0xee   : > { %1505 = vrcp.f32 %v340_v26  ;;  %v339_v29 = vsub.f32 %v1988_v15, %v1958_v25 }
  0xf8   : > { %v1506_v30 = vpop.eup %1505 }
  0xf9   : > { %v342_v23 = vmul.f32 %v1506_v30, %v339_v29 }
  0xfb   : > { %v346_v32 = vmul.f32 %v342_v23, %v342_v23  ;;  %v345_v36 = vand.u32 2147483647, %v342_v23  ;;  %vm343_vm11 = vcmp.ge.f32.partialorder %v342_v23, 0.0 }
  0xfc   : > { %v344_v41 = vsel %vm343_vm11, 1.0, %v1748_v37 }
  0xfd   : > { %v347_v33 = vadd.f32 1.0, %v346_v32 }
  0xff   : > { %1507 = vrsqrt.f32 %v347_v33  ;;  %vm350_vm9 = vcmp.eq.f32.partialorder %v347_v33, inf  ;;  %v353_v35 = vand.u32 2147483648, %v347_v33  ;;  %vm352_vm10 = vcmp.eq.f32.partialorder %v347_v33, 0.0 }
 0x109   : > { %v1508_v34 = vpop.eup %1507 }
 0x10a   : > { %v349_v38 = vmul.f32 %v1508_v34, %v347_v33 }
 0x10c   : > { %v351_v39 = vsel %vm350_vm9, %v347_v33, %v349_v38 }
 0x10d   : > { %v354_v40 = vsel %vm352_vm10, %v353_v35, %v351_v39 }
 0x10e   : > { %v355_v31 = vadd.f32 %v354_v40, %v345_v36 }
 0x110   : > { %1509 = vrcp.f32 %v355_v31 }
 0x11a   : > { %v1510_v42 = vpop.eup %1509 }
 0x11b   : > { %v357_v43 = vmul.f32 %v1510_v42, %v344_v41 }
 0x11d   : > { %v358_v44 = vsel %vm1979_vm8, 0.0, %v357_v43 }
 0x11e   : > { %v359_v24 = vmul.f32 %v358_v44, %v358_v44 }
 0x120   : > { %v360_v45 = vadd.f32 1.0, %v359_v24 }
 0x122   : > { %1511 = vrsqrt.f32 %v360_v45 }
 0x12c   : > { %v1512_v46 = vpop.eup %1511 }
 0x12d   : > { %v362_v47 = vmul.f32 %v1512_v46, %v358_v44  ;;  %v376_v48 = vmul.f32 %v1512_v46, %v320_v3  ;;  %v380_v49 = vmul.f32 0.0, %v1512_v46  ;;  %v382_v50 = vmul.f32 %v1512_v46, %v1939_v7 }
 0x12e   : > { %v386_v51 = vmul.f32 %v1512_v46, %v327_v14  ;;  %v388_v52 = vmul.f32 %v1512_v46, %v1944_v12  ;;  %v392_v53 = vmul.f32 %v1512_v46, %v331_v19  ;;  %v363_v54 = vmul.f32 %v1512_v46, %v1512_v46 }
 0x12f   : > { %v364_v55 = vmul.f32 %v362_v47, %v362_v47  ;;  %v365_v56 = vmul.f32 %v1512_v46, %v362_v47  ;;  %v377_v57 = vmul.f32 0.0, %v362_v47  ;;  %v379_v58 = vmul.f32 %v362_v47, %v320_v3 }
 0x130   : > { %v383_v59 = vmul.f32 %v362_v47, %v327_v14  ;;  %v385_v60 = vmul.f32 %v362_v47, %v1939_v7  ;;  %v374_v63 = vmul.f32 %v363_v54, %v1988_v15  ;;  %v389_v4 = vmul.f32 %v362_v47, %v331_v19 }
 0x131   : > { %v367_v61 = vmul.f32 2.0, %v365_v56  ;;  %v372_v62 = vmul.f32 %v364_v55, %v1958_v25  ;;  %v2000_v0 = vsub.f32 %v376_v48, %v377_v57  ;;  %v381_v2 = vadd.f32 %v380_v49, %v379_v58 }
 0x132   : > { %v384_v17 = vsub.f32 %v382_v50, %v383_v59  ;;  %v2002_v9 = vadd.f32 %v386_v51, %v385_v60  ;;  %v390_v11 = vsub.f32 %v388_v52, %v389_v4  ;;  %v391_v3 = vmul.f32 %v362_v47, %v1944_v12 }
 0x133   : > { %v368_v8 = vmul.f32 %v367_v61, %v1970_v5  ;;  %v394_v14 = vmul.f32 %v1512_v46, %v1950_v16  ;;  %v395_v7 = vmul.f32 %v362_v47, %v335_v21  ;;  %v397_v20 = vmul.f32 %v362_v47, %v1950_v16 }
 0x134   : > { %v398_v22 = vmul.f32 %v1512_v46, %v335_v21  ;;  %v400_v6 = vand.u32 2147483647, %v2000_v0  ;;  %v366_v19 = vmul.f32 %v363_v54, %v1958_v25  ;;  %v2010_v27 = vadd.f32 %v392_v53, %v391_v3 }
 0x135   : > { %v373_v26 = vadd.f32 %v372_v62, %v368_v8  ;;  %v2012_v28 = vsub.f32 %v394_v14, %v395_v7  ;;  %v370_v25 = vmul.f32 %v364_v55, %v1988_v15 }
 0x136   : > { %v2014_v29 = vadd.f32 %v398_v22, %v397_v20  ;;  %vm2016_vm12 = vcmp.lt.f32.partialorder %v400_v6, 1e-30  ;;  %v369_v30 = vsub.f32 %v366_v19, %v368_v8 }
 0x137   : > { %v2020_v12 = vadd.f32 %v374_v63, %v373_v26  ;;  %v402_v16 = vsel %vm2016_vm12, 1.0, %v2000_v0 }
 0x138   : > { %v404_v21 = vmul.f32 2.0, %v402_v16  ;;  %v2026_v23 = vadd.f32 %v370_v25, %v369_v30 }
 0x13a   : > { %1513 = vrcp.f32 %v404_v21  ;;  %v403_v32 = vsub.f32 %v2026_v23, %v1983_v10 }
 0x144   : > { %v1514_v33 = vpop.eup %1513 }
 0x145   : > { %v406_v34 = vmul.f32 %v1514_v33, %v403_v32 }
 0x147   : > { %v410_v35 = vmul.f32 %v406_v34, %v406_v34  ;;  %v409_v40 = vand.u32 2147483647, %v406_v34  ;;  %vm407_vm15 = vcmp.ge.f32.partialorder %v406_v34, 0.0 }
 0x148   : > { %v408_v43 = vsel %vm407_vm15, 1.0, %v1748_v37 }
 0x149   : > { %v411_v36 = vadd.f32 1.0, %v410_v35 }
 0x14b   : > { %1515 = vrsqrt.f32 %v411_v36  ;;  %vm414_vm13 = vcmp.eq.f32.partialorder %v411_v36, inf  ;;  %v417_v39 = vand.u32 2147483648, %v411_v36  ;;  %vm416_vm14 = vcmp.eq.f32.partialorder %v411_v36, 0.0 }
 0x155   : > { %v1516_v38 = vpop.eup %1515 }
 0x156   : > { %v413_v31 = vmul.f32 %v1516_v38, %v411_v36 }
 0x158   : > { %v415_v41 = vsel %vm414_vm13, %v411_v36, %v413_v31 }
 0x159   : > { %v418_v42 = vsel %vm416_vm14, %v417_v39, %v415_v41 }
 0x15a   : > { %v419_v15 = vadd.f32 %v418_v42, %v409_v40 }
 0x15c   : > { %1517 = vrcp.f32 %v419_v15 }
 0x166   : > { %v1518_v44 = vpop.eup %1517 }
 0x167   : > { %v421_v24 = vmul.f32 %v1518_v44, %v408_v43 }
 0x169   : > { %v422_v45 = vsel %vm2016_vm12, 0.0, %v421_v24 }
 0x16a   : > { %v423_v46 = vmul.f32 %v422_v45, %v422_v45 }
 0x16c   : > { %v424_v47 = vadd.f32 1.0, %v423_v46 }
 0x16e   : > { %1519 = vrsqrt.f32 %v424_v47 }
 0x178   : > { %v1520_v48 = vpop.eup %1519 }
 0x179   : > { %v426_v49 = vmul.f32 %v1520_v48, %v422_v45  ;;  %v440_v50 = vmul.f32 %v1520_v48, %v381_v2  ;;  %v444_v51 = vmul.f32 0.0, %v1520_v48  ;;  %v446_v52 = vmul.f32 %v1520_v48, %v1972_v13 }
 0x17a   : > { %v450_v53 = vmul.f32 %v1520_v48, %v384_v17  ;;  %v452_v54 = vmul.f32 %v1520_v48, %v1975_v18  ;;  %v456_v55 = vmul.f32 %v1520_v48, %v390_v11  ;;  %v427_v56 = vmul.f32 %v1520_v48, %v1520_v48 }
 0x17b   : > { %v428_v57 = vmul.f32 %v426_v49, %v426_v49  ;;  %v429_v58 = vmul.f32 %v1520_v48, %v426_v49  ;;  %v441_v59 = vmul.f32 0.0, %v426_v49  ;;  %v443_v60 = vmul.f32 %v426_v49, %v381_v2 }
 0x17c   : > { %v447_v61 = vmul.f32 %v426_v49, %v384_v17  ;;  %v449_v62 = vmul.f32 %v426_v49, %v1972_v13  ;;  %v438_v8 = vmul.f32 %v427_v56, %v2026_v23  ;;  %v453_v3 = vmul.f32 %v426_v49, %v390_v11 }
 0x17d   : > { %v431_v63 = vmul.f32 2.0, %v429_v58  ;;  %v436_v4 = vmul.f32 %v428_v57, %v1983_v10  ;;  %v2038_v14 = vsub.f32 %v440_v50, %v441_v59  ;;  %v445_v7 = vadd.f32 %v444_v51, %v443_v60 }
 0x17e   : > { %v448_v20 = vsub.f32 %v446_v52, %v447_v61  ;;  %v2040_v22 = vadd.f32 %v450_v53, %v449_v62  ;;  %v2043_v19 = vsub.f32 %v452_v54, %v453_v3  ;;  %v455_v2 = vmul.f32 %v426_v49, %v1975_v18 }
 0x17f   : > { %v432_v6 = vmul.f32 %v431_v63, %v2000_v0  ;;  %v458_v13 = vmul.f32 %v1520_v48, %v1968_v1  ;;  %v459_v17 = vmul.f32 %v426_v49, %v2012_v28  ;;  %v461_v26 = vmul.f32 %v426_v49, %v1968_v1 }
 0x180   : > { %v462_v11 = vmul.f32 %v1520_v48, %v2012_v28  ;;  %v464_v5 = vand.u32 2147483647, %v2038_v14  ;;  %v430_v16 = vmul.f32 %v427_v56, %v1983_v10  ;;  %v2052_v30 = vadd.f32 %v456_v55, %v455_v2 }
 0x181   : > { %v437_v21 = vadd.f32 %v436_v4, %v432_v6  ;;  %v460_v0 = vsub.f32 %v458_v13, %v459_v17  ;;  %v434_v10 = vmul.f32 %v428_v57, %v2026_v23 }
 0x182   : > { %v2054_v25 = vadd.f32 %v462_v11, %v461_v26  ;;  %vm2056_vm0 = vcmp.lt.f32.partialorder %v464_v5, 1e-30  ;;  %v433_v33 = vsub.f32 %v430_v16, %v432_v6 }
 0x183   : > { %v2060_v32 = vadd.f32 %v438_v8, %v437_v21  ;;  %v466_v1 = vsel %vm2056_vm0, 1.0, %v2038_v14 }
 0x184   : > { %v468_v28 = vmul.f32 2.0, %v466_v1  ;;  %v435_v34 = vadd.f32 %v434_v10, %v433_v33 }
 0x186   : > { %1521 = vrcp.f32 %v468_v28  ;;  %v467_v35 = vsub.f32 %v2020_v12, %v435_v34 }
 0x190   : > { %v1522_v36 = vpop.eup %1521 }
 0x191   : > { %v470_v38 = vmul.f32 %v1522_v36, %v467_v35 }
 0x193   : > { %v474_v39 = vmul.f32 %v470_v38, %v470_v38  ;;  %v473_v42 = vand.u32 2147483647, %v470_v38  ;;  %vm471_vm3 = vcmp.ge.f32.partialorder %v470_v38, 0.0 }
 0x194   : > { %v472_v23 = vsel %vm471_vm3, 1.0, %v1748_v37 }
 0x195   : > { %v475_v40 = vadd.f32 1.0, %v474_v39 }
 0x197   : > { %1523 = vrsqrt.f32 %v475_v40  ;;  %vm478_vm1 = vcmp.eq.f32.partialorder %v475_v40, inf  ;;  %v481_v41 = vand.u32 2147483648, %v475_v40  ;;  %vm480_vm2 = vcmp.eq.f32.partialorder %v475_v40, 0.0 }
 0x1a1   : > { %v1524_v31 = vpop.eup %1523 }
 0x1a2   : > { %v477_v15 = vmul.f32 %v1524_v31, %v475_v40 }
 0x1a4   : > { %v479_v43 = vsel %vm478_vm1, %v475_v40, %v477_v15 }
 0x1a5   : > { %v482_v44 = vsel %vm480_vm2, %v481_v41, %v479_v43 }
 0x1a6   : > { %v483_v24 = vadd.f32 %v482_v44, %v473_v42 }
 0x1a8   : > { %1525 = vrcp.f32 %v483_v24 }
 0x1b2   : > { %v1526_v45 = vpop.eup %1525 }
 0x1b3   : > { %v485_v46 = vmul.f32 %v1526_v45, %v472_v23 }
 0x1b5   : > { %v486_v47 = vsel %vm2056_vm0, 0.0, %v485_v46 }
 0x1b6   : > { %v487_v48 = vmul.f32 %v486_v47, %v486_v47 }
 0x1b8   : > { %v488_v49 = vadd.f32 1.0, %v487_v48 }
 0x1ba   : > { %1527 = vrsqrt.f32 %v488_v49 }
 0x1c4   : > { %v1528_v50 = vpop.eup %1527 }
 0x1c5   : > { %v490_v51 = vmul.f32 %v1528_v50, %v486_v47  ;;  %v504_v52 = vmul.f32 0.0, %v1528_v50  ;;  %v508_v53 = vmul.f32 %v1528_v50, %v445_v7  ;;  %v510_v54 = vmul.f32 %v1528_v50, %v448_v20 }
 0x1c6   : > { %v514_v55 = vmul.f32 %v1528_v50, %v2002_v9  ;;  %v516_v56 = vmul.f32 %v1528_v50, %v2043_v19  ;;  %v520_v57 = vmul.f32 %v1528_v50, %v2010_v27  ;;  %v491_v58 = vmul.f32 %v1528_v50, %v1528_v50 }
 0x1c7   : > { %v492_v59 = vmul.f32 %v490_v51, %v490_v51  ;;  %v493_v60 = vmul.f32 %v1528_v50, %v490_v51  ;;  %v505_v61 = vmul.f32 %v490_v51, %v445_v7  ;;  %v507_v62 = vmul.f32 0.0, %v490_v51 }
 0x1c8   : > { %v511_v63 = vmul.f32 %v490_v51, %v2002_v9  ;;  %v513_v4 = vmul.f32 %v490_v51, %v448_v20  ;;  %v494_v8 = vmul.f32 %v491_v58, %v435_v34  ;;  %v517_v2 = vmul.f32 %v490_v51, %v2010_v27 }
 0x1c9   : > { %v495_v3 = vmul.f32 2.0, %v493_v60  ;;  %v498_v6 = vmul.f32 %v492_v59, %v2020_v12  ;;  %v506_v13 = vsub.f32 %v504_v52, %v505_v61  ;;  %v2076_v17 = vadd.f32 %v508_v53, %v507_v62 }
 0x1ca   : > { %v2078_v26 = vsub.f32 %v510_v54, %v511_v63  ;;  %v515_v11 = vadd.f32 %v514_v55, %v513_v4  ;;  %v2081_v16 = vsub.f32 %v516_v56, %v517_v2  ;;  %v519_v7 = vmul.f32 %v490_v51, %v2043_v19 }
 0x1cb   : > { %v496_v5 = vmul.f32 %v495_v3, %v2038_v14  ;;  %v522_v9 = vmul.f32 %v1528_v50, %v460_v0  ;;  %v523_v20 = vmul.f32 %v490_v51, %v2014_v29  ;;  %v525_v21 = vmul.f32 %v490_v51, %v460_v0 }
 0x1cc   : > { %v526_v18 = vmul.f32 %v1528_v50, %v2014_v29  ;;  %v528_v27 = vand.u32 2147483647, %v2076_v17  ;;  %v500_v28 = vmul.f32 %v492_v59, %v435_v34  ;;  %v521_v33 = vadd.f32 %v520_v57, %v519_v7 }
 0x1cd   : > { %v497_v1 = vsub.f32 %v494_v8, %v496_v5  ;;  %v2087_v10 = vsub.f32 %v522_v9, %v523_v20  ;;  %v502_v38 = vmul.f32 %v491_v58, %v2020_v12 }
 0x1ce   : > { %v527_v35 = vadd.f32 %v526_v18, %v525_v21  ;;  %vm2089_vm4 = vcmp.lt.f32.partialorder %v528_v27, 1e-30  ;;  %v501_v29 = vadd.f32 %v500_v28, %v496_v5 }
 0x1cf   : > { %v2093_v36 = vadd.f32 %v498_v6, %v497_v1  ;;  %v530_v19 = vsel %vm2089_vm4, 1.0, %v2076_v17 }
 0x1d0   : > { %v532_v0 = vmul.f32 2.0, %v530_v19  ;;  %v2099_v34 = vadd.f32 %v502_v38, %v501_v29 }
 0x1d2   : > { %1529 = vrcp.f32 %v532_v0  ;;  %v531_v39 = vsub.f32 %v2099_v34, %v2060_v32 }
 0x1dc   : > { %v1530_v40 = vpop.eup %1529 }
 0x1dd   : > { %v534_v31 = vmul.f32 %v1530_v40, %v531_v39 }
 0x1df   : > { %v538_v41 = vmul.f32 %v534_v31, %v534_v31  ;;  %v537_v44 = vand.u32 2147483647, %v534_v31  ;;  %vm535_vm7 = vcmp.ge.f32.partialorder %v534_v31, 0.0 }
 0x1e0   : > { %v536_v46 = vsel %vm535_vm7, 1.0, %v1748_v37 }
 0x1e1   : > { %v539_v42 = vadd.f32 1.0, %v538_v41 }
 0x1e3   : > { %1531 = vrsqrt.f32 %v539_v42  ;;  %vm542_vm5 = vcmp.eq.f32.partialorder %v539_v42, inf  ;;  %v545_v43 = vand.u32 2147483648, %v539_v42  ;;  %vm544_vm6 = vcmp.eq.f32.partialorder %v539_v42, 0.0 }
 0x1ed   : > { %v1532_v15 = vpop.eup %1531 }
 0x1ee   : > { %v541_v24 = vmul.f32 %v1532_v15, %v539_v42 }
 0x1f0   : > { %v543_v23 = vsel %vm542_vm5, %v539_v42, %v541_v24 }
 0x1f1   : > { %v546_v45 = vsel %vm544_vm6, %v545_v43, %v543_v23 }
 0x1f2   : > { %v547_v12 = vadd.f32 %v546_v45, %v537_v44 }
 0x1f4   : > { %1533 = vrcp.f32 %v547_v12 }
 0x1fe   : > { %v1534_v47 = vpop.eup %1533 }
 0x1ff   : > { %v549_v48 = vmul.f32 %v1534_v47, %v536_v46 }
 0x201   : > { %v550_v49 = vsel %vm2089_vm4, 0.0, %v549_v48 }
 0x202   : > { %v551_v50 = vmul.f32 %v550_v49, %v550_v49 }
 0x204   : > { %v552_v51 = vadd.f32 1.0, %v551_v50 }
 0x206   : > { %1535 = vrsqrt.f32 %v552_v51 }
 0x210   : > { %v1536_v52 = vpop.eup %1535 }
 0x211   : > { %v554_v53 = vmul.f32 %v1536_v52, %v550_v49  ;;  %v568_v54 = vmul.f32 %v1536_v52, %v506_v13  ;;  %v572_v55 = vmul.f32 0.0, %v1536_v52  ;;  %v574_v56 = vmul.f32 %v1536_v52, %v2040_v22 }
 0x212   : > { %v578_v57 = vmul.f32 %v1536_v52, %v515_v11  ;;  %v580_v58 = vmul.f32 %v1536_v52, %v2052_v30  ;;  %v584_v59 = vmul.f32 %v1536_v52, %v521_v33  ;;  %v555_v60 = vmul.f32 %v1536_v52, %v1536_v52 }
 0x213   : > { %v556_v61 = vmul.f32 %v554_v53, %v554_v53  ;;  %v557_v62 = vmul.f32 %v1536_v52, %v554_v53  ;;  %v569_v63 = vmul.f32 0.0, %v554_v53  ;;  %v571_v4 = vmul.f32 %v554_v53, %v506_v13 }
 0x214   : > { %v575_v8 = vmul.f32 %v554_v53, %v515_v11  ;;  %v577_v3 = vmul.f32 %v554_v53, %v2040_v22  ;;  %v566_v5 = vmul.f32 %v555_v60, %v2099_v34  ;;  %v581_v7 = vmul.f32 %v554_v53, %v521_v33 }
 0x215   : > { %v559_v6 = vmul.f32 2.0, %v557_v62  ;;  %v564_v2 = vmul.f32 %v556_v61, %v2060_v32  ;;  %v2111_v9 = vsub.f32 %v568_v54, %v569_v63  ;;  %v573_v20 = vadd.f32 %v572_v55, %v571_v4 }
 0x216   : > { %v576_v21 = vsub.f32 %v574_v56, %v575_v8  ;;  %v2113_v18 = vadd.f32 %v578_v57, %v577_v3  ;;  %v582_v1 = vsub.f32 %v580_v58, %v581_v7  ;;  %v583_v13 = vmul.f32 %v554_v53, %v2052_v30 }
 0x217   : > { %v560_v27 = vmul.f32 %v559_v6, %v2076_v17  ;;  %v586_v11 = vmul.f32 %v1536_v52, %v2054_v25  ;;  %v587_v22 = vmul.f32 %v554_v53, %v527_v35  ;;  %v589_v28 = vmul.f32 %v554_v53, %v2054_v25 }
 0x218   : > { %v590_v14 = vmul.f32 %v1536_v52, %v527_v35  ;;  %v592_v19 = vand.u32 2147483647, %v2111_v9  ;;  %v558_v33 = vmul.f32 %v555_v60, %v2060_v32  ;;  %v2121_v29 = vadd.f32 %v584_v59, %v583_v13 }
 0x219   : > { %v565_v0 = vadd.f32 %v564_v2, %v560_v27  ;;  %v2123_v38 = vsub.f32 %v586_v11, %v587_v22  ;;  %v562_v32 = vmul.f32 %v556_v61, %v2099_v34 }
 0x21a   : > { %v2125_v39 = vadd.f32 %v590_v14, %v589_v28  ;;  %vm2127_vm8 = vcmp.lt.f32.partialorder %v592_v19, 1e-30  ;;  %v561_v40 = vsub.f32 %v558_v33, %v560_v27 }
 0x21b   : > { %v2131_v30 = vadd.f32 %v566_v5, %v565_v0  ;;  %v594_v25 = vsel %vm2127_vm8, 1.0, %v2111_v9 }
 0x21c   : > { %v596_v35 = vmul.f32 2.0, %v594_v25  ;;  %v2137_v31 = vadd.f32 %v562_v32, %v561_v40 }
 0x21e   : > { %1537 = vrcp.f32 %v596_v35  ;;  %v595_v41 = vsub.f32 %v2137_v31, %v2093_v36 }
 0x228   : > { %v1538_v42 = vpop.eup %1537 }
 0x229   : > { %v598_v15 = vmul.f32 %v1538_v42, %v595_v41 }
 0x22b   : > { %v602_v43 = vmul.f32 %v598_v15, %v598_v15  ;;  %v601_v45 = vand.u32 2147483647, %v598_v15  ;;  %vm599_vm11 = vcmp.ge.f32.partialorder %v598_v15, 0.0 }
 0x22c   : > { %v600_v48 = vsel %vm599_vm11, 1.0, %v1748_v37 }
 0x22d   : > { %v603_v44 = vadd.f32 1.0, %v602_v43 }
 0x22f   : > { %1539 = vrsqrt.f32 %v603_v44  ;;  %vm606_vm9 = vcmp.eq.f32.partialorder %v603_v44, inf  ;;  %v609_v23 = vand.u32 2147483648, %v603_v44  ;;  %vm608_vm10 = vcmp.eq.f32.partialorder %v603_v44, 0.0 }
 0x239   : > { %v1540_v24 = vpop.eup %1539 }
 0x23a   : > { %v605_v12 = vmul.f32 %v1540_v24, %v603_v44 }
 0x23c   : > { %v607_v46 = vsel %vm606_vm9, %v603_v44, %v605_v12 }
 0x23d   : > { %v610_v47 = vsel %vm608_vm10, %v609_v23, %v607_v46 }
 0x23e   : > { %v611_v34 = vadd.f32 %v610_v47, %v601_v45 }
 0x240   : > { %1541 = vrcp.f32 %v611_v34 }
 0x24a   : > { %v1542_v49 = vpop.eup %1541 }
 0x24b   : > { %v613_v50 = vmul.f32 %v1542_v49, %v600_v48 }
 0x24d   : > { %v614_v51 = vsel %vm2127_vm8, 0.0, %v613_v50 }
 0x24e   : > { %v615_v52 = vmul.f32 %v614_v51, %v614_v51 }
 0x250   : > { %v616_v53 = vadd.f32 1.0, %v615_v52 }
 0x252   : > { %1543 = vrsqrt.f32 %v616_v53 }
 0x25c   : > { %v1544_v54 = vpop.eup %1543 }
 0x25d   : > { %v618_v55 = vmul.f32 %v1544_v54, %v614_v51  ;;  %v632_v56 = vmul.f32 %v1544_v54, %v573_v20  ;;  %v636_v57 = vmul.f32 0.0, %v1544_v54  ;;  %v638_v58 = vmul.f32 %v1544_v54, %v2078_v26 }
 0x25e   : > { %v642_v59 = vmul.f32 %v1544_v54, %v576_v21  ;;  %v644_v60 = vmul.f32 %v1544_v54, %v2081_v16  ;;  %v648_v61 = vmul.f32 %v1544_v54, %v582_v1  ;;  %v619_v62 = vmul.f32 %v1544_v54, %v1544_v54 }
 0x25f   : > { %v620_v63 = vmul.f32 %v618_v55, %v618_v55  ;;  %v621_v4 = vmul.f32 %v1544_v54, %v618_v55  ;;  %v633_v8 = vmul.f32 0.0, %v618_v55  ;;  %v635_v3 = vmul.f32 %v618_v55, %v573_v20 }
 0x260   : > { %v639_v6 = vmul.f32 %v618_v55, %v576_v21  ;;  %v641_v2 = vmul.f32 %v618_v55, %v2078_v26  ;;  %v630_v27 = vmul.f32 %v619_v62, %v2137_v31  ;;  %v645_v13 = vmul.f32 %v618_v55, %v582_v1 }
 0x261   : > { %v623_v5 = vmul.f32 2.0, %v621_v4  ;;  %v628_v7 = vmul.f32 %v620_v63, %v2093_v36  ;;  %v2149_v11 = vsub.f32 %v632_v56, %v633_v8  ;;  %v637_v22 = vadd.f32 %v636_v57, %v635_v3 }
 0x262   : > { %v640_v28 = vsub.f32 %v638_v58, %v639_v6  ;;  %v2151_v14 = vadd.f32 %v642_v59, %v641_v2  ;;  %v2154_v33 = vsub.f32 %v644_v60, %v645_v13  ;;  %v647_v20 = vmul.f32 %v618_v55, %v2081_v16 }
 0x263   : > { %v624_v19 = vmul.f32 %v623_v5, %v2111_v9  ;;  %v650_v26 = vmul.f32 %v1544_v54, %v2087_v10  ;;  %v651_v21 = vmul.f32 %v618_v55, %v2123_v38  ;;  %v653_v0 = vmul.f32 %v618_v55, %v2087_v10 }
 0x264   : > { %v654_v1 = vmul.f32 %v1544_v54, %v2123_v38  ;;  %v656_v17 = vand.u32 2147483647, %v2149_v11  ;;  %v622_v25 = vmul.f32 %v619_v62, %v2093_v36  ;;  %v2163_v40 = vadd.f32 %v648_v61, %v647_v20 }
 0x265   : > { %v629_v35 = vadd.f32 %v628_v7, %v624_v19  ;;  %v652_v9 = vsub.f32 %v650_v26, %v651_v21  ;;  %v626_v36 = vmul.f32 %v620_v63, %v2137_v31 }
 0x266   : > { %v2165_v32 = vadd.f32 %v654_v1, %v653_v0  ;;  %vm2167_vm12 = vcmp.lt.f32.partialorder %v656_v17, 1e-30  ;;  %v625_v42 = vsub.f32 %v622_v25, %v624_v19 }
 0x267   : > { %v2171_v41 = vadd.f32 %v630_v27, %v629_v35  ;;  %v658_v10 = vsel %vm2167_vm12, 1.0, %v2149_v11 }
 0x268   : > { %v660_v38 = vmul.f32 2.0, %v658_v10  ;;  %v627_v15 = vadd.f32 %v626_v36, %v625_v42 }
 0x26a   : > { %1545 = vrcp.f32 %v660_v38  ;;  %v659_v43 = vsub.f32 %v2131_v30, %v627_v15 }
 0x274   : > { %v1546_v44 = vpop.eup %1545 }
 0x275   : > { %v662_v24 = vmul.f32 %v1546_v44, %v659_v43 }
 0x277   : > { %v666_v23 = vmul.f32 %v662_v24, %v662_v24  ;;  %v665_v47 = vand.u32 2147483647, %v662_v24  ;;  %vm663_vm15 = vcmp.ge.f32.partialorder %v662_v24, 0.0 }
 0x278   : > { %v664_v31 = vsel %vm663_vm15, 1.0, %v1748_v37 }
 0x279   : > { %v667_v45 = vadd.f32 1.0, %v666_v23 }
 0x27b   : > { %1547 = vrsqrt.f32 %v667_v45  ;;  %vm670_vm13 = vcmp.eq.f32.partialorder %v667_v45, inf  ;;  %v673_v46 = vand.u32 2147483648, %v667_v45  ;;  %vm672_vm14 = vcmp.eq.f32.partialorder %v667_v45, 0.0 }
 0x285   : > { %v1548_v12 = vpop.eup %1547 }
 0x286   : > { %v669_v34 = vmul.f32 %v1548_v12, %v667_v45 }
 0x288   : > { %v671_v48 = vsel %vm670_vm13, %v667_v45, %v669_v34 }
 0x289   : > { %v674_v49 = vsel %vm672_vm14, %v673_v46, %v671_v48 }
 0x28a   : > { %v675_v50 = vadd.f32 %v674_v49, %v665_v47 }
 0x28c   : > { %1549 = vrcp.f32 %v675_v50 }
 0x296   : > { %v1550_v51 = vpop.eup %1549 }
 0x297   : > { %v677_v52 = vmul.f32 %v1550_v51, %v664_v31 }
 0x299   : > { %v678_v53 = vsel %vm2167_vm12, 0.0, %v677_v52 }
 0x29a   : > { %v679_v54 = vmul.f32 %v678_v53, %v678_v53 }
 0x29c   : > { %v680_v55 = vadd.f32 1.0, %v679_v54 }
 0x29e   : > { %1551 = vrsqrt.f32 %v680_v55 }
 0x2a8   : > { %v1552_v56 = vpop.eup %1551 }
 0x2a9   : > { %v682_v57 = vmul.f32 %v1552_v56, %v678_v53  ;;  %v696_v58 = vmul.f32 0.0, %v1552_v56  ;;  %v700_v59 = vmul.f32 %v1552_v56, %v637_v22  ;;  %v702_v60 = vmul.f32 %v1552_v56, %v640_v28 }
 0x2aa   : > { %v706_v61 = vmul.f32 %v1552_v56, %v2113_v18  ;;  %v708_v62 = vmul.f32 %v1552_v56, %v2154_v33  ;;  %v712_v63 = vmul.f32 %v1552_v56, %v2121_v29  ;;  %v683_v4 = vmul.f32 %v1552_v56, %v1552_v56 }
 0x2ab   : > { %v684_v8 = vmul.f32 %v682_v57, %v682_v57  ;;  %v685_v3 = vmul.f32 %v1552_v56, %v682_v57  ;;  %v697_v6 = vmul.f32 %v682_v57, %v637_v22  ;;  %v699_v2 = vmul.f32 0.0, %v682_v57 }
 0x2ac   : > { %v703_v5 = vmul.f32 %v682_v57, %v2113_v18  ;;  %v705_v7 = vmul.f32 %v682_v57, %v640_v28  ;;  %v686_v27 = vmul.f32 %v683_v4, %v627_v15  ;;  %v709_v20 = vmul.f32 %v682_v57, %v2121_v29 }
 0x2ad   : > { %v687_v13 = vmul.f32 2.0, %v685_v3  ;;  %v690_v19 = vmul.f32 %v684_v8, %v2131_v30  ;;  %v698_v26 = vsub.f32 %v696_v58, %v697_v6  ;;  %v2187_v21 = vadd.f32 %v700_v59, %v699_v2 }
 0x2ae   : > { %v2189_v0 = vsub.f32 %v702_v60, %v703_v5  ;;  %v707_v1 = vadd.f32 %v706_v61, %v705_v7  ;;  %v2192_v25 = vsub.f32 %v708_v62, %v709_v20  ;;  %v711_v22 = vmul.f32 %v682_v57, %v2154_v33 }
 0x2af   : > { %v688_v17 = vmul.f32 %v687_v13, %v2149_v11  ;;  %v714_v18 = vmul.f32 %v1552_v56, %v652_v9  ;;  %v715_v28 = vmul.f32 %v682_v57, %v2125_v39  ;;  %v717_v35 = vmul.f32 %v682_v57, %v652_v9 }
 0x2b0   : > { %v718_v16 = vmul.f32 %v1552_v56, %v2125_v39  ;;  %v720_v29 = vand.u32 2147483647, %v2187_v21  ;;  %v692_v38 = vmul.f32 %v684_v8, %v627_v15  ;;  %v713_v42 = vadd.f32 %v712_v63, %v711_v22 }
 0x2b1   : > { %v689_v10 = vsub.f32 %v686_v27, %v688_v17  ;;  %v2198_v36 = vsub.f32 %v714_v18, %v715_v28  ;;  %v694_v24 = vmul.f32 %v683_v4, %v2131_v30 }
 0x2b2   : > { %v719_v43 = vadd.f32 %v718_v16, %v717_v35  ;;  %vm2200_vm0 = vcmp.lt.f32.partialorder %v720_v29, 1e-30  ;;  %v693_v39 = vadd.f32 %v692_v38, %v688_v17 }
 0x2b3   : > { %v2204_v44 = vadd.f32 %v690_v19, %v689_v10  ;;  %v722_v33 = vsel %vm2200_vm0, 1.0, %v2187_v21 }
 0x2b4   : > { %v724_v9 = vmul.f32 2.0, %v722_v33  ;;  %v2210_v15 = vadd.f32 %v694_v24, %v693_v39 }
 0x2b6   : > { %1553 = vrcp.f32 %v724_v9  ;;  %v723_v23 = vsub.f32 %v2210_v15, %v2171_v41 }
 0x2c0   : > { %v1554_v45 = vpop.eup %1553 }
 0x2c1   : > { %v726_v12 = vmul.f32 %v1554_v45, %v723_v23 }
 0x2c3   : > { %v730_v46 = vmul.f32 %v726_v12, %v726_v12  ;;  %v729_v49 = vand.u32 2147483647, %v726_v12  ;;  %vm727_vm3 = vcmp.ge.f32.partialorder %v726_v12, 0.0 }
 0x2c4   : > { %v728_v52 = vsel %vm727_vm3, 1.0, %v1748_v37 }
 0x2c5   : > { %v731_v47 = vadd.f32 1.0, %v730_v46 }
 0x2c7   : > { %1555 = vrsqrt.f32 %v731_v47  ;;  %vm734_vm1 = vcmp.eq.f32.partialorder %v731_v47, inf  ;;  %v737_v48 = vand.u32 2147483648, %v731_v47  ;;  %vm736_vm2 = vcmp.eq.f32.partialorder %v731_v47, 0.0 }
 0x2d1   : > { %v1556_v34 = vpop.eup %1555 }
 0x2d2   : > { %v733_v50 = vmul.f32 %v1556_v34, %v731_v47 }
 0x2d4   : > { %v735_v31 = vsel %vm734_vm1, %v731_v47, %v733_v50 }
 0x2d5   : > { %v738_v51 = vsel %vm736_vm2, %v737_v48, %v735_v31 }
 0x2d6   : > { %v739_v30 = vadd.f32 %v738_v51, %v729_v49 }
 0x2d8   : > { %1557 = vrcp.f32 %v739_v30 }
 0x2e2   : > { %v1558_v53 = vpop.eup %1557 }
 0x2e3   : > { %v741_v54 = vmul.f32 %v1558_v53, %v728_v52 }
 0x2e5   : > { %v742_v55 = vsel %vm2200_vm0, 0.0, %v741_v54 }
 0x2e6   : > { %v743_v56 = vmul.f32 %v742_v55, %v742_v55 }
 0x2e8   : > { %v744_v57 = vadd.f32 1.0, %v743_v56 }
 0x2ea   : > { %1559 = vrsqrt.f32 %v744_v57 }
 0x2f4   : > { %v1560_v58 = vpop.eup %1559 }
 0x2f5   : > { %v746_v59 = vmul.f32 %v1560_v58, %v742_v55  ;;  %v760_v60 = vmul.f32 %v1560_v58, %v698_v26  ;;  %v764_v61 = vmul.f32 0.0, %v1560_v58  ;;  %v766_v62 = vmul.f32 %v1560_v58, %v2151_v14 }
 0x2f6   : > { %v770_v63 = vmul.f32 %v1560_v58, %v707_v1  ;;  %v772_v4 = vmul.f32 %v1560_v58, %v2163_v40  ;;  %v776_v8 = vmul.f32 %v1560_v58, %v713_v42  ;;  %v747_v3 = vmul.f32 %v1560_v58, %v1560_v58 }
 0x2f7   : > { %v748_v6 = vmul.f32 %v746_v59, %v746_v59  ;;  %v749_v2 = vmul.f32 %v1560_v58, %v746_v59  ;;  %v761_v5 = vmul.f32 0.0, %v746_v59  ;;  %v763_v7 = vmul.f32 %v746_v59, %v698_v26 }
 0x2f8   : > { %v767_v27 = vmul.f32 %v746_v59, %v707_v1  ;;  %v769_v13 = vmul.f32 %v746_v59, %v2151_v14  ;;  %v758_v17 = vmul.f32 %v747_v3, %v2210_v15  ;;  %v773_v22 = vmul.f32 %v746_v59, %v713_v42 }
 0x2f9   : > { %v751_v19 = vmul.f32 2.0, %v749_v2  ;;  %v756_v20 = vmul.f32 %v748_v6, %v2171_v41  ;;  %v2222_v18 = vsub.f32 %v760_v60, %v761_v5  ;;  %v765_v28 = vadd.f32 %v764_v61, %v763_v7 }
 0x2fa   : > { %v768_v35 = vsub.f32 %v766_v62, %v767_v27  ;;  %v2224_v16 = vadd.f32 %v770_v63, %v769_v13  ;;  %v774_v10 = vsub.f32 %v772_v4, %v773_v22  ;;  %v775_v26 = vmul.f32 %v746_v59, %v2163_v40 }
 0x2fb   : > { %v752_v29 = vmul.f32 %v751_v19, %v2187_v21  ;;  %v778_v1 = vmul.f32 %v1560_v58, %v2165_v32  ;;  %v779_v14 = vmul.f32 %v746_v59, %v719_v43  ;;  %v781_v38 = vmul.f32 %v746_v59, %v2165_v32 }
 0x2fc   : > { %v782_v11 = vmul.f32 %v1560_v58, %v719_v43  ;;  %v784_v33 = vand.u32 2147483647, %v2222_v18  ;;  %v750_v42 = vmul.f32 %v747_v3, %v2171_v41  ;;  %v2232_v39 = vadd.f32 %v776_v8, %v775_v26 }
 0x2fd   : > { %v757_v9 = vadd.f32 %v756_v20, %v752_v29  ;;  %v2234_v24 = vsub.f32 %v778_v1, %v779_v14  ;;  %v754_v41 = vmul.f32 %v748_v6, %v2210_v15 }
 0x2fe   : > { %v2236_v23 = vadd.f32 %v782_v11, %v781_v38  ;;  %vm2238_vm4 = vcmp.lt.f32.partialorder %v784_v33, 1e-30  ;;  %v753_v45 = vsub.f32 %v750_v42, %v752_v29 }
 0x2ff   : > { %v2242_v40 = vadd.f32 %v758_v17, %v757_v9  ;;  %v786_v32 = vsel %vm2238_vm4, 1.0, %v2222_v18 }
 0x300   : > { %v788_v43 = vmul.f32 2.0, %v786_v32  ;;  %v2248_v12 = vadd.f32 %v754_v41, %v753_v45 }
 0x302   : > { %1561 = vrcp.f32 %v788_v43  ;;  %v787_v46 = vsub.f32 %v2248_v12, %v2204_v44 }
 0x30c   : > { %v1562_v47 = vpop.eup %1561 }
 0x30d   : > { %v790_v34 = vmul.f32 %v1562_v47, %v787_v46 }
 0x30f   : > { %v794_v48 = vmul.f32 %v790_v34, %v790_v34  ;;  %v793_v51 = vand.u32 2147483647, %v790_v34  ;;  %vm791_vm7 = vcmp.ge.f32.partialorder %v790_v34, 0.0 }
 0x310   : > { %v792_v54 = vsel %vm791_vm7, 1.0, %v1748_v37 }
 0x311   : > { %v795_v49 = vadd.f32 1.0, %v794_v48 }
 0x313   : > { %1563 = vrsqrt.f32 %v795_v49  ;;  %vm798_vm5 = vcmp.eq.f32.partialorder %v795_v49, inf  ;;  %v801_v31 = vand.u32 2147483648, %v795_v49  ;;  %vm800_vm6 = vcmp.eq.f32.partialorder %v795_v49, 0.0 }
 0x31d   : > { %v1564_v50 = vpop.eup %1563 }
 0x31e   : > { %v797_v30 = vmul.f32 %v1564_v50, %v795_v49 }
 0x320   : > { %v799_v52 = vsel %vm798_vm5, %v795_v49, %v797_v30 }
 0x321   : > { %v802_v53 = vsel %vm800_vm6, %v801_v31, %v799_v52 }
 0x322   : > { %v803_v15 = vadd.f32 %v802_v53, %v793_v51 }
 0x324   : > { %1565 = vrcp.f32 %v803_v15 }
 0x32e   : > { %v1566_v55 = vpop.eup %1565 }
 0x32f   : > { %v805_v56 = vmul.f32 %v1566_v55, %v792_v54 }
 0x331   : > { %v806_v57 = vsel %vm2238_vm4, 0.0, %v805_v56 }
 0x332   : > { %v807_v58 = vmul.f32 %v806_v57, %v806_v57 }
 0x334   : > { %v808_v59 = vadd.f32 1.0, %v807_v58 }
 0x336   : > { %1567 = vrsqrt.f32 %v808_v59 }
 0x340   : > { %v1568_v60 = vpop.eup %1567 }
 0x341   : > { %v810_v61 = vmul.f32 %v1568_v60, %v806_v57  ;;  %v824_v62 = vmul.f32 %v1568_v60, %v765_v28  ;;  %v828_v63 = vmul.f32 0.0, %v1568_v60  ;;  %v830_v4 = vmul.f32 %v1568_v60, %v2189_v0 }
 0x342   : > { %v834_v8 = vmul.f32 %v1568_v60, %v768_v35  ;;  %v836_v3 = vmul.f32 %v1568_v60, %v2192_v25  ;;  %v840_v6 = vmul.f32 %v1568_v60, %v774_v10  ;;  %v811_v2 = vmul.f32 %v1568_v60, %v1568_v60 }
 0x343   : > { %v812_v5 = vmul.f32 %v810_v61, %v810_v61  ;;  %v813_v7 = vmul.f32 %v1568_v60, %v810_v61  ;;  %v825_v27 = vmul.f32 0.0, %v810_v61  ;;  %v827_v13 = vmul.f32 %v810_v61, %v765_v28 }
 0x344   : > { %v831_v19 = vmul.f32 %v810_v61, %v768_v35  ;;  %v833_v20 = vmul.f32 %v810_v61, %v2189_v0  ;;  %v822_v29 = vmul.f32 %v811_v2, %v2248_v12  ;;  %v837_v26 = vmul.f32 %v810_v61, %v774_v10 }
 0x345   : > { %v815_v17 = vmul.f32 2.0, %v813_v7  ;;  %v820_v22 = vmul.f32 %v812_v5, %v2204_v44  ;;  %v2260_v1 = vsub.f32 %v824_v62, %v825_v27  ;;  %v829_v14 = vadd.f32 %v828_v63, %v827_v13 }
 0x346   : > { %v832_v38 = vsub.f32 %v830_v4, %v831_v19  ;;  %v2262_v11 = vadd.f32 %v834_v8, %v833_v20  ;;  %v838_v42 = vsub.f32 %v836_v3, %v837_v26  ;;  %v839_v28 = vmul.f32 %v810_v61, %v2192_v25  ;;  %v2315_v25 = vld [vmem:[%s1905_s26 + $0x8] sm:$0xff] }
 0x347   : > { %v816_v33 = vmul.f32 %v815_v17, %v2222_v18  ;;  %v842_v35 = vmul.f32 %v1568_v60, %v2198_v36  ;;  %v843_v0 = vmul.f32 %v810_v61, %v2234_v24  ;;  %v845_v9 = vmul.f32 %v810_v61, %v2198_v36 }
 0x348   : > { %v846_v21 = vmul.f32 %v1568_v60, %v2234_v24  ;;  %v848_v10 = vand.u32 2147483647, %v2260_v1  ;;  %v814_v32 = vmul.f32 %v811_v2, %v2204_v44  ;;  %v2272_v45 = vadd.f32 %v840_v6, %v839_v28 }
 0x349   : > { %v821_v43 = vadd.f32 %v820_v22, %v816_v33  ;;  %v844_v41 = vsub.f32 %v842_v35, %v843_v0  ;;  %v818_v44 = vmul.f32 %v812_v5, %v2248_v12 }
 0x34a   : > { %v2274_v18 = vadd.f32 %v846_v21, %v845_v9  ;;  %vm2276_vm8 = vcmp.lt.f32.partialorder %v848_v10, 1e-30  ;;  %v817_v47 = vsub.f32 %v814_v32, %v816_v33  ;;  %v2310_v32 = vld [vmem:[%s1905_s26] sm:$0xff] }
 0x34b   : > { %v2280_v46 = vadd.f32 %v822_v29, %v821_v43  ;;  %v850_v36 = vsel %vm2276_vm8, 1.0, %v2260_v1 }
 0x34c   : > { %v852_v24 = vmul.f32 2.0, %v850_v36  ;;  %v819_v34 = vadd.f32 %v818_v44, %v817_v47 }
 0x34e   : > { %1569 = vrcp.f32 %v852_v24  ;;  %v851_v48 = vsub.f32 %v2242_v40, %v819_v34 }
 0x358   : > { %v1570_v49 = vpop.eup %1569 }
 0x359   : > { %v854_v50 = vmul.f32 %v1570_v49, %v851_v48 }
 0x35b   : > { %v858_v31 = vmul.f32 %v854_v50, %v854_v50  ;;  %v857_v53 = vand.u32 2147483647, %v854_v50  ;;  %vm855_vm11 = vcmp.ge.f32.partialorder %v854_v50, 0.0  ;;  %v2333_v50 = vld [vmem:[%s1905_s26 + $0x20] sm:$0xff] }
 0x35c   : > { %v856_v12 = vsel %vm855_vm11, 1.0, %v1748_v37 }
 0x35d   : > { %v859_v51 = vadd.f32 1.0, %v858_v31 }
 0x35f   : > { %1571 = vrsqrt.f32 %v859_v51  ;;  %vm862_vm9 = vcmp.eq.f32.partialorder %v859_v51, inf  ;;  %v865_v52 = vand.u32 2147483648, %v859_v51  ;;  %vm864_vm10 = vcmp.eq.f32.partialorder %v859_v51, 0.0 }
 0x369   : > { %v1572_v30 = vpop.eup %1571 }
 0x36a   : > { %v861_v15 = vmul.f32 %v1572_v30, %v859_v51 }
 0x36c   : > { %v863_v54 = vsel %vm862_vm9, %v859_v51, %v861_v15 }
 0x36d   : > { %v866_v55 = vsel %vm864_vm10, %v865_v52, %v863_v54  ;;  %v2344_v52 = vld [vmem:[%s1905_s26 + $0x10] sm:$0xff] }
 0x36e   : > { %v867_v56 = vadd.f32 %v866_v55, %v857_v53  ;;  %v2349_v55 = vld [vmem:[%s1905_s26 + $0x28] sm:$0xff] }
 0x370   : > { %1573 = vrcp.f32 %v867_v56 }
 0x37a   : > { %v1574_v57 = vpop.eup %1573 }
 0x37b   : > { %v869_v58 = vmul.f32 %v1574_v57, %v856_v12  ;;  %v2354_v12 = vld [vmem:[%s1905_s26 + $0x30] sm:$0xff] }
 0x37d   : > { %v870_v59 = vsel %vm2276_vm8, 0.0, %v869_v58 }
 0x37e   : > { %v871_v60 = vmul.f32 %v870_v59, %v870_v59 }
 0x380   : > { %v872_v61 = vadd.f32 1.0, %v871_v60  ;;  %v2360_v60 = vld [vmem:[%s1905_s26 + $0x38] sm:$0xff] }
 0x382   : > { %1575 = vrsqrt.f32 %v872_v61 }
 0x38c   : > { %v1576_v62 = vpop.eup %1575 }
 0x38d   : > { %v874_v63 = vmul.f32 %v1576_v62, %v870_v59  ;;  %v889_v4 = vmul.f32 %v1576_v62, %v829_v14  ;;  %v891_v8 = vmul.f32 %v1576_v62, %v832_v38  ;;  %v895_v3 = vmul.f32 %v1576_v62, %v2224_v16 }
 0x38e   : > { %v897_v6 = vmul.f32 %v1576_v62, %v838_v42  ;;  %v901_v2 = vmul.f32 %v1576_v62, %v2232_v39  ;;  %v903_v5 = vmul.f32 %v1576_v62, %v844_v41  ;;  %v875_v7 = vmul.f32 %v1576_v62, %v1576_v62 }
 0x38f   : > { %v876_v27 = vmul.f32 %v874_v63, %v874_v63  ;;  %v877_v13 = vmul.f32 %v1576_v62, %v874_v63  ;;  %v888_v19 = vmul.f32 0.0, %v874_v63  ;;  %v892_v20 = vmul.f32 %v874_v63, %v2224_v16 }
 0x390   : > { %v894_v17 = vmul.f32 %v874_v63, %v832_v38  ;;  %v898_v22 = vmul.f32 %v874_v63, %v2232_v39  ;;  %v878_v29 = vmul.f32 %v875_v7, %v819_v34  ;;  %v900_v33 = vmul.f32 %v874_v63, %v838_v42 }
 0x391   : > { %v879_v26 = vmul.f32 2.0, %v877_v13  ;;  %v882_v14 = vmul.f32 %v876_v27, %v2242_v40  ;;  %v2295_v28 = vadd.f32 %v889_v4, %v888_v19  ;;  %v2297_v35 = vsub.f32 %v891_v8, %v892_v20 }
 0x392   : > { %v2299_v0 = vadd.f32 %v895_v3, %v894_v17  ;;  %v2301_v9 = vsub.f32 %v897_v6, %v898_v22  ;;  %v2304_v38 = vadd.f32 %v901_v2, %v900_v33  ;;  %v904_v39 = vmul.f32 %v874_v63, %v2236_v23 }
 0x393   : > { %v880_v16 = vmul.f32 %v879_v26, %v2260_v1  ;;  %v906_v21 = vmul.f32 %v874_v63, %v844_v41  ;;  %v907_v10 = vmul.f32 %v1576_v62, %v2236_v23  ;;  %v909_v42 = vand.u32 2147483647, %v2295_v28  ;;  %v2322_v41 = vld [vmem:[%s1905_s26 + $0x18] sm:$0xff]  ;;  %v2365_v63 = vld [vmem:[%s1905_s26 + $0x40] sm:$0xff] }
 0x394   : > { %v979_v43 = vmul.f32 %v2310_v32, %v2297_v35  ;;  %v980_v1 = vmul.f32 %v2315_v25, %v2301_v9  ;;  %v884_v24 = vmul.f32 %v876_v27, %v819_v34  ;;  %v2319_v47 = vsub.f32 %v903_v5, %v904_v39 }
 0x395   : > { %v881_v36 = vsub.f32 %v878_v29, %v880_v16  ;;  %v997_v23 = vmul.f32 %v2322_v41, %v2297_v35  ;;  %v2326_v44 = vadd.f32 %v907_v10, %v906_v21  ;;  %vm2328_vm12 = vcmp.lt.f32.partialorder %v909_v42, 1e-30 }
 0x396   : > { %v981_v49 = vadd.f32 %v980_v1, %v979_v43  ;;  %v998_v34 = vmul.f32 %v2333_v50, %v2301_v9  ;;  %v886_v51 = vmul.f32 %v875_v7, %v2242_v40  ;;  %v911_v30 = vsel %vm2328_vm12, 1.0, %v2295_v28 }
 0x397   : > { %v2337_v31 = vadd.f32 %v882_v14, %v881_v36  ;;  %v982_v53 = vmul.f32 %v2344_v52, %v2319_v47  ;;  %v913_v15 = vmul.f32 2.0, %v911_v30  ;;  %v1000_v56 = vmul.f32 %v2349_v55, %v2319_v47 }
 0x398   : > { %v999_v54 = vadd.f32 %v998_v34, %v997_v23  ;;  %v1015_v40 = vmul.f32 %v2354_v12, %v2297_v35  ;;  %v885_v57 = vadd.f32 %v884_v24, %v880_v16  ;;  %v1016_v61 = vmul.f32 %v2360_v60, %v2301_v9 }
 0x399   : > { %v967_v58 = vmax.f32 %v2337_v31, 0.0  ;;  %v983_v59 = vadd.f32 %v982_v53, %v981_v49  ;;  %1577 = vrcp.f32 %v913_v15  ;;  %v1018_v4 = vmul.f32 %v2365_v63, %v2319_v47 }
 0x39a   : > { %v1001_v62 = vadd.f32 %v1000_v56, %v999_v54  ;;  %v1017_v3 = vadd.f32 %v1016_v61, %v1015_v40  ;;  %v887_v6 = vadd.f32 %v886_v51, %v885_v57 }
 0x39b   : > { %v970_v8 = vmax.f32 %v967_v58, 1e-30 }
 0x39c   : > { %v1019_v2 = vadd.f32 %v1018_v4, %v1017_v3  ;;  %v912_v5 = vsub.f32 %v887_v6, %v2280_v46 }
 0x39d   : > { %1579 = vrsqrt.f32 %v970_v8 }
 0x3a3   : > { %v1578_v7 = vpop.eup %1577 }
 0x3a4   : > { %v915_v27 = vmul.f32 %v1578_v7, %v912_v5 }
 0x3a6   : > { %v919_v19 = vmul.f32 %v915_v27, %v915_v27  ;;  %v918_v33 = vand.u32 2147483647, %v915_v27  ;;  %vm916_vm15 = vcmp.ge.f32.partialorder %v915_v27, 0.0 }
 0x3a7   : > { %v2372_v13 = vpop.eup %1579  ;;  %v917_v42 = vsel %vm916_vm15, 1.0, %v1748_v37 }
 0x3a8   : > { %v2375_v20 = vmul.f32 %v2372_v13, %v983_v59  ;;  %v2378_v17 = vmul.f32 %v2372_v13, %v1001_v62  ;;  %v920_v22 = vadd.f32 1.0, %v919_v19  ;;  %v2381_v29 = vmul.f32 %v2372_v13, %v1019_v2 }
 0x3aa   : > { %1581 = vrsqrt.f32 %v920_v22  ;;  %vm923_vm13 = vcmp.eq.f32.partialorder %v920_v22, inf  ;;  %v926_v14 = vand.u32 2147483648, %v920_v22  ;;  %vm925_vm14 = vcmp.eq.f32.partialorder %v920_v22, 0.0 }
 0x3b4   : > { %v1582_v26 = vpop.eup %1581 }
 0x3b5   : > { %v922_v16 = vmul.f32 %v1582_v26, %v920_v22 }
 0x3b7   : > { %v924_v39 = vsel %vm923_vm13, %v920_v22, %v922_v16 }
 0x3b8   : > { %v927_v21 = vsel %vm925_vm14, %v926_v14, %v924_v39 }
 0x3b9   : > { %v928_v10 = vadd.f32 %v927_v21, %v918_v33 }
 0x3bb   : > { %1583 = vrcp.f32 %v928_v10 }
 0x3c5   : > { %v1584_v43 = vpop.eup %1583 }
 0x3c6   : > { %v930_v1 = vmul.f32 %v1584_v43, %v917_v42 }
 0x3c8   : > { %v931_v36 = vsel %vm2328_vm12, 0.0, %v930_v1 }
 0x3c9   : > { %v932_v24 = vmul.f32 %v931_v36, %v931_v36 }
 0x3cb   : > { %v933_v23 = vadd.f32 1.0, %v932_v24 }
 0x3cd   : > { %1585 = vrsqrt.f32 %v933_v23 }
 0x3d7   : > { %v1586_v49 = vpop.eup %1585 }
 0x3d8   : > { %v935_v34 = vmul.f32 %v1586_v49, %v931_v36  ;;  %v936_v51 = vmul.f32 %v1586_v49, %v1586_v49  ;;  %v949_v30 = vmul.f32 %v1586_v49, %v2262_v11  ;;  %v953_v53 = vmul.f32 %v1586_v49, %v2299_v0 }
 0x3d9   : > { %v955_v15 = vmul.f32 %v1586_v49, %v2272_v45  ;;  %v959_v54 = vmul.f32 %v1586_v49, %v2304_v38  ;;  %v961_v37 = vmul.f32 %v1586_v49, %v2274_v18  ;;  %v965_v56 = vmul.f32 %v1586_v49, %v2326_v44 }
 0x3da   : > { %v937_v48 = vmul.f32 %v935_v34, %v935_v34  ;;  %v938_v40 = vmul.f32 %v1586_v49, %v935_v34  ;;  %v947_v57 = vmul.f32 %v936_v51, %v887_v6  ;;  %v950_v59 = vmul.f32 %v935_v34, %v2299_v0 }
 0x3db   : > { %v952_v61 = vmul.f32 %v935_v34, %v2262_v11  ;;  %v956_v62 = vmul.f32 %v935_v34, %v2304_v38  ;;  %v958_v4 = vmul.f32 %v935_v34, %v2272_v45  ;;  %v939_v8 = vmul.f32 %v936_v51, %v2280_v46 }
 0x3dc   : > { %v940_v3 = vmul.f32 2.0, %v938_v40  ;;  %v945_v2 = vmul.f32 %v937_v48, %v2280_v46  ;;  %v962_v5 = vmul.f32 %v935_v34, %v2326_v44  ;;  %v2399_v7 = vsub.f32 %v949_v30, %v950_v59 }
 0x3dd   : > { %v2401_v27 = vadd.f32 %v953_v53, %v952_v61  ;;  %v2403_v19 = vsub.f32 %v955_v15, %v956_v62  ;;  %v2405_v0 = vadd.f32 %v959_v54, %v958_v4  ;;  %v943_v38 = vmul.f32 %v937_v48, %v887_v6 }
 0x3de   : > { %v941_v11 = vmul.f32 %v940_v3, %v2295_v28  ;;  %v2408_v22 = vsub.f32 %v961_v37, %v962_v5  ;;  %v964_v45 = vmul.f32 %v935_v34, %v2274_v18  ;;  %v985_v46 = vmul.f32 %v2310_v32, %v2399_v7 }
 0x3df   : > { %v986_v44 = vmul.f32 %v2315_v25, %v2403_v19  ;;  %v991_v26 = vmul.f32 %v2310_v32, %v2401_v27  ;;  %v992_v14 = vmul.f32 %v2315_v25, %v2405_v0  ;;  %v1003_v21 = vmul.f32 %v2322_v41, %v2399_v7 }
 0x3e0   : > { %v942_v33 = vsub.f32 %v939_v8, %v941_v11  ;;  %v946_v16 = vadd.f32 %v945_v2, %v941_v11  ;;  %v2419_v28 = vadd.f32 %v965_v56, %v964_v45  ;;  %v988_v6 = vmul.f32 %v2344_v52, %v2408_v22 }
 0x3e1   : > { %v987_v18 = vadd.f32 %v986_v44, %v985_v46  ;;  %v993_v39 = vadd.f32 %v992_v14, %v991_v26  ;;  %v1004_v10 = vmul.f32 %v2333_v50, %v2403_v19  ;;  %v1006_v36 = vmul.f32 %v2349_v55, %v2408_v22 }
 0x3e2   : > { %v944_v42 = vadd.f32 %v943_v38, %v942_v33  ;;  %v948_v43 = vadd.f32 %v947_v57, %v946_v16  ;;  %v994_v1 = vmul.f32 %v2344_v52, %v2419_v28  ;;  %v1009_v49 = vmul.f32 %v2322_v41, %v2401_v27 }
 0x3e3   : > { %v989_v24 = vadd.f32 %v988_v6, %v987_v18  ;;  %v1005_v23 = vadd.f32 %v1004_v10, %v1003_v21  ;;  %v1010_v34 = vmul.f32 %v2333_v50, %v2405_v0  ;;  %v1012_v15 = vmul.f32 %v2349_v55, %v2419_v28 }
 0x3e4   : > { %v968_v51 = vmax.f32 %v944_v42, 0.0  ;;  %v969_v30 = vmax.f32 %v948_v43, 0.0  ;;  %v995_v53 = vadd.f32 %v994_v1, %v993_v39  ;;  %v1021_v56 = vmul.f32 %v2354_v12, %v2399_v7 }
 0x3e5   : > { %v1007_v54 = vadd.f32 %v1006_v36, %v1005_v23  ;;  %v1011_v37 = vadd.f32 %v1010_v34, %v1009_v49  ;;  %v1022_v48 = vmul.f32 %v2360_v60, %v2403_v19  ;;  %v1024_v59 = vmul.f32 %v2365_v63, %v2408_v22 }
 0x3e6   : > { %v972_v40 = vmax.f32 %v968_v51, 1e-30  ;;  %v974_v57 = vmax.f32 %v969_v30, 1e-30  ;;  %v1027_v61 = vmul.f32 %v2354_v12, %v2401_v27  ;;  %v1028_v8 = vmul.f32 %v2360_v60, %v2405_v0 }
 0x3e7   : > { %v1013_v62 = vadd.f32 %v1012_v15, %v1011_v37  ;;  %v1023_v4 = vadd.f32 %v1022_v48, %v1021_v56  ;;  %v1030_v3 = vmul.f32 %v2365_v63, %v2419_v28  ;;  %v2452_v11 = vmul.f32 %v2372_v13, %v967_v58 }
 0x3e8   : > { %1587 = vrsqrt.f32 %v972_v40  ;;  %v1029_v5 = vadd.f32 %v1028_v8, %v1027_v61  ;;  %v1229_v10 = vmul.f32 %v2365_v63, %v2333_v50  ;;  %v1230_v42 = vmul.f32 %v2360_v60, %v2349_v55 }
 0x3e9   : > { %1589 = vrsqrt.f32 %v974_v57  ;;  %v1025_v2 = vadd.f32 %v1024_v59, %v1023_v4  ;;  %v1033_v45 = vmax.f32 %v2452_v11, 0.01  ;;  %v1233_v43 = vmul.f32 %v2365_v63, %v2322_v41 }
 0x3ea   : > { %v1031_v38 = vadd.f32 %v1030_v3, %v1029_v5  ;;  %v1234_v1 = vmul.f32 %v2354_v12, %v2349_v55  ;;  %v1238_v15 = vmul.f32 %v2360_v60, %v2322_v41  ;;  %v1239_v63 = vmul.f32 %v2354_v12, %v2333_v50 }
 0x3eb   : > { %1591 = vlog2.f32 %v1033_v45 }
 0x3ec   : > { %v1240_v60 = vsub.f32 %v1238_v15, %v1239_v63 }
 0x3ee   : > { %v1241_v8 = vmul.f32 %v2344_v52, %v1240_v60 }
 0x3f2   : > { %v1588_v46 = vpop.eup %1587 }
 0x3f3   : > { %v1590_v44 = vpop.eup %1589  ;;  %v2457_v26 = vmul.f32 %v1588_v46, %v968_v51  ;;  %v2459_v14 = vmul.f32 %v1588_v46, %v989_v24  ;;  %v2461_v33 = vmul.f32 %v1588_v46, %v1007_v54  ;;  %v2463_v16 = vmul.f32 %v1588_v46, %v1025_v2 }
 0x3f4   : > { %v2465_v31 = vmul.f32 %v1590_v44, %v969_v30  ;;  %v2467_v58 = vmul.f32 %v1590_v44, %v995_v53  ;;  %v2469_v13 = vmul.f32 %v1590_v44, %v1013_v62  ;;  %v2471_v6 = vmul.f32 %v1590_v44, %v1031_v38 }
 0x3f5   : > { %v1034_v18 = vmax.f32 %v2457_v26, 0.01  ;;  %v1592_v21 = vpop.eup %1591  ;;  %v1231_v51 = vsub.f32 %v1229_v10, %v1230_v42  ;;  %v1235_v53 = vsub.f32 %v1233_v43, %v1234_v1 }
 0x3f6   : > { %v1035_v39 = vmax.f32 %v2465_v31, 0.01  ;;  %v2487_v36 = vmul.f32 0.6931472, %v1592_v21 }
 0x3f7   : > { %1593 = vlog2.f32 %v1034_v18  ;;  %v1232_v40 = vmul.f32 %v2310_v32, %v1231_v51  ;;  %v1236_v41 = vmul.f32 %v2315_v25, %v1235_v53  ;;  %v1099_v51 = vstv %s1401_s23 }
 0x3f8   : > { %1595 = vlog2.f32 %v1035_v39  ;;  %v2492_v34 = vmax.f32 %v2487_v36, -2.9957323 }
 0x3f9   : > { %v1237_v4 = vsub.f32 %v1232_v40, %v1236_v41 }
 0x3fb   : > { %v1242_v42 = vadd.f32 %v1241_v8, %v1237_v4 }
 0x401   : > { %v1594_v24 = vpop.eup %1593 }
 0x402   : > { %v1596_v23 = vpop.eup %1595  ;;  %v2489_v49 = vmul.f32 0.6931472, %v1594_v24  ;;  %v1097_v24 = vstv %s1403_s20 }
 0x403   : > { %v2494_v30 = vmul.f32 0.6931472, %v1596_v23 }
 0x404   : > { %v1042_v55 = vadd.f32 %v2489_v49, %v2487_v36  ;;  %v2503_v54 = vmax.f32 %v2489_v49, -2.9957323 }
 0x405   : > { %v2506_v37 = vmax.f32 %v2494_v30, -2.9957323 }
 0x406   : > { %v1043_v56 = vadd.f32 %v1042_v55, %v2494_v30  ;;  %v1084_v48 = vadd.f32 %v2503_v54, %v2492_v34 }
 0x408   : > { %v1044_v50 = vmul.f32 0.33333334, %v1043_v56  ;;  %v1085_v12 = vadd.f32 %v1084_v48, %v2506_v37 }
 0x40a   : > { %v2515_v57 = vsub.f32 %v2487_v36, %v1044_v50  ;;  %v2518_v59 = vsub.f32 %v2489_v49, %v1044_v50  ;;  %v2521_v61 = vsub.f32 %v2494_v30, %v1044_v50  ;;  %v1086_v62 = vmul.f32 0.33333334, %v1085_v12 }
 0x40b   : > { %v1098_v23 = vsub.f32 %v1085_v12, %v1097_v24 }
 0x40c   : > { %v1048_v32 = vmul.f32 %v2515_v57, %v2515_v57  ;;  %v1049_v25 = vmul.f32 %v2518_v59, %v2518_v59  ;;  %v1051_v3 = vmul.f32 %v2521_v61, %v2521_v61  ;;  %v1087_v2 = vsub.f32 %v2492_v34, %v1086_v62 }
 0x40d   : > { %v1088_v5 = vsub.f32 %v2503_v54, %v1086_v62  ;;  %v1089_v38 = vsub.f32 %v2506_v37, %v1086_v62  ;;  %v1100_v56 = vmul.f32 %v1099_v51, %v1098_v23  ;;  %vm1104_vm2 = vcmp.lt.f32.partialorder %v1098_v23, 0.0 }
 0x40e   : > { %v1050_v46 = vadd.f32 %v1049_v25, %v1048_v32  ;;  %v1090_v44 = vmul.f32 %v1087_v2, %v1087_v2  ;;  %v1061_v25 = vstv %s173_s19 }
 0x40f   : > { %v1091_v21 = vmul.f32 %v1088_v5, %v1088_v5  ;;  %v1093_v52 = vmul.f32 %v1089_v38, %v1089_v38 }
 0x410   : > { %v1052_v10 = vadd.f32 %v1051_v3, %v1050_v46 }
 0x411   : > { %v1092_v43 = vadd.f32 %v1091_v21, %v1090_v44  ;;  %v1107_v21 = vstv %s1402_s29 }
 0x412   : > { %1597 = vrsqrt.f32 %v1052_v10  ;;  %vm1055_vm0 = vcmp.eq.f32.partialorder %v1052_v10, inf  ;;  %v1058_v15 = vand.u32 2147483648, %v1052_v10  ;;  %vm1057_vm1 = vcmp.eq.f32.partialorder %v1052_v10, 0.0 }
 0x413   : > { %v1094_v1 = vadd.f32 %v1093_v52, %v1092_v43  ;;  %1599 = vlog2.f32 %v1242_v42 }
 0x415   : > { %1601 = vrsqrt.f32 %v1094_v1 }
 0x41c   : > { %v1598_v53 = vpop.eup %1597 }
 0x41d   : > { %v1054_v63 = vmul.f32 %v1598_v53, %v1052_v10  ;;  %v1600_v55 = vpop.eup %1599 }
 0x41e   : > { %v1244_v62 = vmul.f32 0.6931472, %v1600_v55 }
 0x41f   : > { %v1602_v48 = vpop.eup %1601  ;;  %v1056_v40 = vsel %vm1055_vm0, %v1052_v10, %v1054_v63 }
 0x420   : > { %v1059_v41 = vsel %vm1057_vm1, %v1058_v15, %v1056_v40  ;;  %v1096_v60 = vmul.f32 %v1602_v48, %v1094_v1  ;;  %v1245_v12 = vmul.f32 0.33333334, %v1244_v62 }
 0x421   : > { %v1060_v50 = vadd.f32 1e-05, %v1059_v41 }
 0x422   : > { %v1101_v4 = vadd.f32 %v1100_v56, %v1096_v60  ;;  %v1246_v52 = vmul.f32 1.442695, %v1245_v12 }
 0x423   : > { %1603 = vrcp.f32 %v1060_v50  ;;  %v2533_v42 = vsub.f32 %v1060_v50, %v1061_v25 }
 0x424   : > { %v1102_v8 = vmax.f32 %v1101_v4, 0.0  ;;  %1605 = vpow2.f32 %v1246_v52 }
 0x425   : > { %vm1065_vm3 = vcmp.gt.f32.partialorder %v2533_v42, 0.0 }
 0x426   : > { %v1103_v32 = vmul.f32 %v1602_v48, %v1102_v8 }
 0x428   : > { %v1105_v3 = vmul.f32 %v1103_v32, %v1087_v2  ;;  %v1111_v46 = vmul.f32 %v1103_v32, %v1088_v5  ;;  %v1116_v44 = vmul.f32 %v1103_v32, %v1089_v38 }
 0x42a   : > { %v1106_v10 = vsub.f32 %v2492_v34, %v1105_v3  ;;  %v1112_v43 = vsub.f32 %v2503_v54, %v1111_v46  ;;  %v1117_v1 = vsub.f32 %v2506_v37, %v1116_v44 }
 0x42c   : > { %v1108_v24 = vsel %vm1104_vm2, %v1106_v10, %v1107_v21  ;;  %v1113_v51 = vsel %vm1104_vm2, %v1112_v43, %v1107_v21  ;;  %v1118_v53 = vsel %vm1104_vm2, %v1117_v1, %v1107_v21 }
 0x42d   : > { %v1604_v15 = vpop.eup %1603  ;;  %v1109_v63 = vmul.f32 1.442695, %v1108_v24  ;;  %v1114_v55 = vmul.f32 1.442695, %v1113_v51  ;;  %v1119_v2 = vmul.f32 1.442695, %v1118_v53 }
 0x42e   : > { %v1064_v5 = vmul.f32 %v1604_v15, %v2533_v42  ;;  %v1606_v60 = vpop.eup %1605 }
 0x42f   : > { %1607 = vpow2.f32 %v1109_v63 }
 0x430   : > { %v1066_v38 = vmul.f32 %v1064_v5, %v2515_v57  ;;  %v1071_v23 = vmul.f32 %v1064_v5, %v2518_v59  ;;  %v1076_v34 = vmul.f32 %v1064_v5, %v2521_v61  ;;  %1609 = vpow2.f32 %v1114_v55 }
 0x431   : > { %1611 = vpow2.f32 %v1119_v2 }
 0x432   : > { %v1067_v54 = vsub.f32 %v2487_v36, %v1066_v38  ;;  %v1072_v37 = vsub.f32 %v2489_v49, %v1071_v23  ;;  %v1077_v56 = vsub.f32 %v2494_v30, %v1076_v34  ;;  %v2550_v36 = vmul.f32 0.2, %v1606_v60 }
 0x434   : > { %v1068_v48 = vmul.f32 1.442695, %v1067_v54  ;;  %v1073_v40 = vmul.f32 1.442695, %v1072_v37  ;;  %v1078_v41 = vmul.f32 1.442695, %v1077_v56 }
 0x436   : > { %1613 = vpow2.f32 %v1068_v48 }
 0x437   : > { %1615 = vpow2.f32 %v1073_v40 }
 0x438   : > { %1617 = vpow2.f32 %v1078_v41 }
 0x439   : > { %v1608_v57 = vpop.eup %1607 }
 0x43a   : > { %v1610_v50 = vpop.eup %1609  ;;  %v1175_v59 = vmul.f32 %v1608_v57, %v2375_v20  ;;  %v2548_v61 = vmul.f32 %v1608_v57, %v2378_v17  ;;  %v2557_v4 = vmul.f32 %v1608_v57, %v2381_v29 }
 0x43b   : > { %v1612_v49 = vpop.eup %1611  ;;  %v1176_v30 = vmul.f32 %v1610_v50, %v2459_v14  ;;  %v2554_v62 = vmul.f32 %v1610_v50, %v2461_v33  ;;  %v2560_v8 = vmul.f32 %v1610_v50, %v2463_v16 }
 0x43c   : > { %v1177_v12 = vmul.f32 %v1612_v49, %v2467_v58  ;;  %v2564_v32 = vmul.f32 %v1612_v49, %v2469_v13  ;;  %v2567_v25 = vmul.f32 %v1612_v49, %v2471_v6  ;;  %v1184_v3 = vmul.f32 %v1175_v59, %v2297_v35 }
 0x43d   : > { %v1185_v46 = vmul.f32 %v1176_v30, %v2399_v7  ;;  %v1189_v44 = vmul.f32 %v1175_v59, %v2301_v9  ;;  %v1190_v21 = vmul.f32 %v1176_v30, %v2403_v19  ;;  %v1194_v52 = vmul.f32 %v1175_v59, %v2319_v47 }
 0x43e   : > { %v1187_v10 = vmul.f32 %v1177_v12, %v2401_v27  ;;  %v1192_v43 = vmul.f32 %v1177_v12, %v2405_v0  ;;  %v1195_v1 = vmul.f32 %v1176_v30, %v2408_v22  ;;  %v2578_v24 = vmul.f32 %v1177_v12, %v2419_v28 }
 0x43f   : > { %v1186_v51 = vadd.f32 %v1185_v46, %v1184_v3  ;;  %v1191_v53 = vadd.f32 %v1190_v21, %v1189_v44  ;;  %v1199_v15 = vmul.f32 %v2548_v61, %v2297_v35  ;;  %v1200_v63 = vmul.f32 %v2554_v62, %v2399_v7 }
 0x440   : > { %v1614_v55 = vpop.eup %1613  ;;  %v1196_v2 = vadd.f32 %v1195_v1, %v1194_v52  ;;  %v2586_v5 = vmul.f32 %v2564_v32, %v2401_v27  ;;  %v2590_v38 = vmul.f32 %v2548_v61, %v2301_v9  ;;  %v1205_v23 = vmul.f32 %v2554_v62, %v2403_v19 }
 0x441   : > { %v1616_v34 = vpop.eup %1615  ;;  %v1070_v54 = vsel %vm1065_vm3, %v1614_v55, %v1033_v45  ;;  %v2598_v37 = vadd.f32 %v1187_v10, %v1186_v51  ;;  %v2600_v56 = vadd.f32 %v1192_v43, %v1191_v53  ;;  %v1201_v48 = vadd.f32 %v1200_v63, %v1199_v15 }
 0x442   : > { %v1618_v40 = vpop.eup %1617  ;;  %v1075_v41 = vsel %vm1065_vm3, %v1616_v34, %v1034_v18  ;;  %v1121_v60 = vmul.f32 %v1070_v54, %v2375_v20  ;;  %v1124_v57 = vmul.f32 %v1070_v54, %v2378_v17  ;;  %v1127_v11 = vmul.f32 %v1070_v54, %v2381_v29 }
 0x443   : > { %v1080_v45 = vsel %vm1065_vm3, %v1618_v40, %v1035_v39  ;;  %v1122_v50 = vmul.f32 %v1075_v41, %v2459_v14  ;;  %v1125_v59 = vmul.f32 %v1075_v41, %v2461_v33  ;;  %v1128_v26 = vmul.f32 %v1075_v41, %v2463_v16 }
 0x444   : > { %v1123_v49 = vmul.f32 %v1080_v45, %v2467_v58  ;;  %v1126_v18 = vmul.f32 %v1080_v45, %v2469_v13  ;;  %v1129_v20 = vmul.f32 %v1080_v45, %v2471_v6  ;;  %v1130_v17 = vmul.f32 %v1121_v60, %v2297_v35 }
 0x445   : > { %v1131_v29 = vmul.f32 %v1122_v50, %v2399_v7  ;;  %v1135_v31 = vmul.f32 %v1121_v60, %v2301_v9  ;;  %v1136_v39 = vmul.f32 %v1122_v50, %v2403_v19  ;;  %v1140_v14 = vmul.f32 %v1121_v60, %v2319_v47 }
 0x446   : > { %v1133_v33 = vmul.f32 %v1123_v49, %v2401_v27  ;;  %v1138_v16 = vmul.f32 %v1123_v49, %v2405_v0  ;;  %v1141_v58 = vmul.f32 %v1122_v50, %v2408_v22  ;;  %v1143_v13 = vmul.f32 %v1123_v49, %v2419_v28 }
 0x447   : > { %v1132_v42 = vadd.f32 %v1131_v29, %v1130_v17  ;;  %v1137_v6 = vadd.f32 %v1136_v39, %v1135_v31  ;;  %v1145_v30 = vmul.f32 %v1124_v57, %v2297_v35  ;;  %v1146_v12 = vmul.f32 %v1125_v59, %v2399_v7 }
 0x448   : > { %v1142_v3 = vadd.f32 %v1141_v58, %v1140_v14  ;;  %v1148_v46 = vmul.f32 %v1126_v18, %v2401_v27  ;;  %v1150_v44 = vmul.f32 %v1124_v57, %v2301_v9  ;;  %v1151_v21 = vmul.f32 %v1125_v59, %v2403_v19 }
 0x449   : > { %v1134_v52 = vadd.f32 %v1133_v33, %v1132_v42  ;;  %v1139_v10 = vadd.f32 %v1138_v16, %v1137_v6  ;;  %v1147_v43 = vadd.f32 %v1146_v12, %v1145_v30  ;;  %v1153_v1 = vmul.f32 %v1126_v18, %v2405_v0 }
 0x44a   : > { %v1144_v51 = vadd.f32 %v1143_v13, %v1142_v3  ;;  %v1152_v53 = vadd.f32 %v1151_v21, %v1150_v44  ;;  %v1155_v15 = vmul.f32 %v1124_v57, %v2319_v47  ;;  %v1156_v63 = vmul.f32 %v1125_v59, %v2408_v22 }
 0x44b   : > { %v1149_v55 = vadd.f32 %v1148_v46, %v1147_v43  ;;  %v1158_v34 = vmul.f32 %v1126_v18, %v2419_v28  ;;  %v1160_v54 = vmul.f32 %v1127_v11, %v2297_v35  ;;  %v1161_v40 = vmul.f32 %v1128_v26, %v2399_v7 }
 0x44c   : > { %v1154_v41 = vadd.f32 %v1153_v1, %v1152_v53  ;;  %v1157_v60 = vadd.f32 %v1156_v63, %v1155_v15  ;;  %v1163_v45 = vmul.f32 %v1129_v20, %v2401_v27  ;;  %v1165_v50 = vmul.f32 %v1127_v11, %v2301_v9 }
 0x44d   : > { %v1162_v49 = vadd.f32 %v1161_v40, %v1160_v54  ;;  %v1166_v17 = vmul.f32 %v1128_v26, %v2403_v19  ;;  %v1168_v57 = vmul.f32 %v1129_v20, %v2405_v0  ;;  %v1170_v59 = vmul.f32 %v1127_v11, %v2319_v47 }
 0x44e   : > { %v1159_v29 = vadd.f32 %v1158_v34, %v1157_v60  ;;  %v1171_v18 = vmul.f32 %v1128_v26, %v2408_v22  ;;  %v1173_v31 = vmul.f32 %v1129_v20, %v2419_v28  ;;  %v1198_v39 = vadd.f32 %v2578_v24, %v1196_v2 }
 0x44f   : > { %v1164_v14 = vadd.f32 %v1163_v45, %v1162_v49  ;;  %v1167_v33 = vadd.f32 %v1166_v17, %v1165_v50  ;;  %v1203_v16 = vadd.f32 %v2586_v5, %v1201_v48  ;;  %v1206_v58 = vadd.f32 %v1205_v23, %v2590_v38 }
 0x450   : > { %v1172_v13 = vadd.f32 %v1171_v18, %v1170_v59  ;;  %v1207_v42 = vmul.f32 %v2564_v32, %v2405_v0  ;;  %v1209_v11 = vmul.f32 %v2548_v61, %v2319_v47  ;;  %v1210_v26 = vmul.f32 %v2554_v62, %v2408_v22 }
 0x451   : > { %v1169_v6 = vadd.f32 %v1168_v57, %v1167_v33  ;;  %v1212_v24 = vmul.f32 %v2564_v32, %v2419_v28  ;;  %v1214_v2 = vmul.f32 %v2557_v4, %v2297_v35  ;;  %v1215_v5 = vmul.f32 %v2560_v8, %v2399_v7 }
 0x452   : > { %v1174_v38 = vadd.f32 %v1173_v31, %v1172_v13  ;;  %v1208_v23 = vadd.f32 %v1207_v42, %v1206_v58  ;;  %v1211_v48 = vadd.f32 %v1210_v26, %v1209_v11  ;;  %v1217_v20 = vmul.f32 %v2567_v25, %v2401_v27 }
 0x453   : > { %v1216_v61 = vadd.f32 %v1215_v5, %v1214_v2  ;;  %v1219_v62 = vmul.f32 %v2557_v4, %v2301_v9  ;;  %v1220_v30 = vmul.f32 %v2560_v8, %v2403_v19  ;;  %v1222_v32 = vmul.f32 %v2567_v25, %v2405_v0 }
 0x454   : > { %v1213_v35 = vadd.f32 %v1212_v24, %v1211_v48  ;;  %v1224_v7 = vmul.f32 %v2557_v4, %v2319_v47  ;;  %v1225_v12 = vmul.f32 %v2560_v8, %v2408_v22  ;;  %v1227_v27 = vmul.f32 %v2567_v25, %v2419_v28 }
 0x455   : > { %v1218_v3 = vadd.f32 %v1217_v20, %v1216_v61  ;;  %v1221_v46 = vadd.f32 %v1220_v30, %v1219_v62  ;;  %v1248_v44 = vmul.f32 0.5, %v1134_v52  ;;  %v1249_v9 = vmul.f32 0.3, %v2598_v37 }
 0x456   : > { %v1226_v21 = vadd.f32 %v1225_v12, %v1224_v7  ;;  %v1254_v19 = vmul.f32 0.5, %v1139_v10  ;;  %v1255_v0 = vmul.f32 0.3, %v2600_v56  ;;  %v1259_v43 = vmul.f32 0.5, %v1144_v51 }
 0x457   : > { %v1223_v1 = vadd.f32 %v1222_v32, %v1221_v46  ;;  %v1250_v53 = vadd.f32 %v1249_v9, %v1248_v44  ;;  %v1260_v47 = vmul.f32 0.3, %v1198_v39  ;;  %v1264_v4 = vmul.f32 0.5, %v1149_v55 }
 0x458   : > { %v1228_v15 = vadd.f32 %v1227_v27, %v1226_v21  ;;  %v1256_v22 = vadd.f32 %v1255_v0, %v1254_v19  ;;  %v1265_v8 = vmul.f32 0.3, %v1203_v16  ;;  %v1269_v63 = vmul.f32 0.5, %v1154_v41 }
 0x459   : > { %v1252_v28 = vadd.f32 %v2550_v36, %v1250_v53  ;;  %v1261_v25 = vadd.f32 %v1260_v47, %v1259_v43  ;;  %v1270_v52 = vmul.f32 0.3, %v1208_v23  ;;  %v1275_v37 = vmul.f32 0.5, %v1159_v29 }
 0x45a   : > { %1412 = vst [vmem:[%s172_s30 + $0x8] sm:$0xff] %v1256_v22  ;;  %v1266_v10 = vadd.f32 %v1265_v8, %v1264_v4  ;;  %v1276_v56 = vmul.f32 0.3, %v1213_v35  ;;  %v1280_v51 = vmul.f32 0.5, %v1164_v14  ;;  %v1281_v34 = vmul.f32 0.3, %v1218_v3 }
 0x45b   : > { %1253 = vst [vmem:[%s172_s30] sm:$0xff] %v1252_v28  ;;  %1413 = vst [vmem:[%s172_s30 + $0x10] sm:$0xff] %v1261_v25  ;;  %v1271_v55 = vadd.f32 %v1270_v52, %v1269_v63  ;;  %v1285_v54 = vmul.f32 0.5, %v1169_v6  ;;  %v1286_v40 = vmul.f32 0.3, %v1223_v1  ;;  %v1290_v60 = vmul.f32 0.5, %v1174_v38 }
 0x45c   : > { %1414 = vst [vmem:[%s172_s30 + $0x18] sm:$0xff] %v1266_v10  ;;  %v1277_v41 = vadd.f32 %v1276_v56, %v1275_v37  ;;  %v1282_v45 = vadd.f32 %v1281_v34, %v1280_v51  ;;  %v1291_v50 = vmul.f32 0.3, %v1228_v15 }
 0x45d   : > { %v1272_v49 = vadd.f32 %v1271_v55, %v2550_v36  ;;  %v1287_v17 = vadd.f32 %v1286_v40, %v1285_v54 }
 0x45e   : > { %1416 = vst [vmem:[%s172_s30 + $0x28] sm:$0xff] %v1277_v41  ;;  %1417 = vst [vmem:[%s172_s30 + $0x30] sm:$0xff] %v1282_v45  ;;  %v1292_v57 = vadd.f32 %v1291_v50, %v1290_v60 }
 0x45f   : > { %1415 = vst [vmem:[%s172_s30 + $0x20] sm:$0xff] %v1272_v49  ;;  %1418 = vst [vmem:[%s172_s30 + $0x38] sm:$0xff] %v1287_v17 }
 0x460   : > { %v1293_v59 = vadd.f32 %v1292_v57, %v2550_v36 }
 0x462   : > { %1419 = vst [vmem:[%s172_s30 + $0x40] sm:$0xff] %v1293_v59 }
 0x463   : > { %1684 = shalt.err (!%p1681_p6)
}
 0x464   : > { %s1685_s28 = scalar_lea.hbm %s2685_s27, 1152  ;;  %s1689_s26 = scalar_lea.hbm %s2733_s2, 3456 }
 0x465   : > { %p1686_p7 = scmp.ne.s32.totalorder %s2685_s27, %s1685_s28  ;;  %p1690_p4 = scmp.lt.u32.totalorder %s2685_s27, %s2733_s2 }
 0x466   : > { %p1691_p2 = scmp.lt.u32.totalorder %s1689_s26, %s1685_s28  ;;  %p1693_p12 = scmp.lt.u32.totalorder %s1685_s28, %s2685_s27 }
 0x467   : > { %p1687_p8 = pnand %p1686_p7, %p2770_p13 }
 0x468   : > { %p1692_p11 = por %p1691_p2, %p1690_p4 }
 0x469   : > { %p1688_p9 = pneg %p1687_p8 }
 0x46a   : > { %p1694_p0 = por %p1693_p12, %p1692_p11 }
 0x46c   : > { %p1695_p3 = pnand %p1694_p0, %p1688_p9 }
 0x46e   : > { %1698 = shalt.err (!%p1695_p3)
}
 0x46f   : > { %s1750_s19 = smov 128   ;;  %s1751_s29 = smov 384  }
 0x470   : > { %s1752_s30 = smov 8  }
 0x471   : > { %1431 = dma.vmem_to_hbm [thread:$0]  (%p2770_p13), %s2687_s6, 1152, %s2685_s27, %s1297_s13, %s1750_s19, %s1751_s29, %s1752_s30  }
 0x472 PF: > { %p1448_p10 = scmp.ge.s32.totalorder %s1741_s12, 2  ;;  %s1324_s5 = sand.u32 1, %s1729_s9  }
 0x473   : > { %p2771_p5 = scmp.ne.s32.totalorder %s2740_s22, 0  ;;  %s1325_s7 = scalar_lea.sflag [#allocation4], %s1324_s5 }
 0x475   : > { %p1442_p1 = pnand %p1448_p10, %p2771_p5 }
 0x477   : > { %1724 = dma.done.wait (!%p1442_p1), %s1325_s7, 1152  }
 0x478   : > { %1726 = vsyncadd (!%p1442_p1), %s1325_s7, 4294966144  ;;  %p16_p6 = scmp.ge.s32.totalorder %s1793_s15, 5   ;;  %s2772_s9 = smov %s1733_s10 }
 0x479   : > { %s2773_s10 = smov %s1737_s11  ;;  %s2774_s11 = smov %s1805_s18 }
 0x47a   : > { %s2775_s12 = smov %s1793_s15  ;;  %18 = sbr.rel (!%p16_p6) target bundleno = 6 (0x6), region = 94 }
 0x481   :  { %1330 = vsyncpa [#allocation3], 1 }
 0x482   :  { %1332 = vsyncpa [#allocation3 + $0x1], 1 }
 0x483   :  { %1333 = vsyncpa [#allocation4], 1 }
 0x484   :  { %1335 = vsyncpa [#allocation4 + $0x1], 1 }
 0x485   :  { %1336 = vsyncpa [#allocation5], 1 }
 0x486   :  { %1338 = vsyncpa [#allocation5 + $0x1], 1 }

</bundles_post_ra>
